<compile_context>
chip_gen: v5e
topology: v5e:2x2
jax: 0.10.0
libtpu: 0.0.40
codegen_flags: <defaults>
</compile_context>

<pallas_src>
import functools
import math

import jax
import jax.numpy as jnp
from jax import lax
from jax.experimental import pallas as pl
from jax.experimental.pallas import tpu as pltpu


def _bitonic_sort_desc(x, s):
    """Sort each row of x (shape (R, s)) in descending order along the last axis.

    s must be a power of two.  Uses only lane rotations (pltpu.roll, XLU) plus
    a minimal number of VALU compare/select ops per stage; the iota-derived
    masks are computed once (hoisted) instead of once per stage.
    """
    last = x.ndim - 1
    n = int(math.log2(s))
    idx = lax.broadcasted_iota(jnp.int32, x.shape, dimension=last)
    # Hoisted partner-direction masks, one per exchange distance j = 2**jb:
    #   lower half of a pair (bit j == 0) -> partner at i + j, else at i - j.
    is_lower = [(idx & (1 << jb)) == 0 for jb in range(n)]
    for kb in range(1, n + 1):
        k = 1 << kb
        # Hoisted per outer phase: block is sorted descending iff (i & k) == 0
        # (overall descending sort).
        desc_block = (idx & k) == 0
        for jb in reversed(range(kb)):
            j = 1 << jb
            low = is_lower[jb]
            up_val = pltpu.roll(x, s - j, last)   # x[(i + j) % s]
            dn_val = pltpu.roll(x, j, last)       # x[(i - j) % s]
            partner = jnp.where(low, up_val, dn_val)
            take_max = desc_block == low
            ge = x >= partner
            # take_max & ge -> keep x ; take_max & ~ge -> partner ;
            # ~take_max & ge -> partner ; ~take_max & ~ge -> keep x.
            x = jnp.where(take_max == ge, x, partner)
    return x


def _grp_kernel(x_ref, w_ref, b_ref, o_ref, *, s):
    # x_ref: (TB, C, S) block of batch elements
    # w_ref: (C, S) depthwise conv weight (resident)
    # b_ref: (1, C) bias (resident)
    # o_ref: (TB, C) output block (lane-dense, no trailing size-1 dim)
    tb, c, _ = x_ref.shape
    x2 = x_ref[...].reshape(tb * c, s)            # layout-free when C % 8 == 0
    x_sorted = _bitonic_sort_desc(x2, s).reshape(tb, c, s)
    # Depthwise conv with kernel_size == length == S -> weighted lane reduction
    # (VPU mul + XLU reduce; intentionally NOT an MXU matmul).
    acc = jnp.sum(x_sorted * w_ref[...][None, :, :], axis=-1)   # (TB, C)
    o_ref[...] = acc + b_ref[...]


def global_rank_pooling(x, weight, bias, *, batch_tile=64):
    """x: (B, C, H, W) f32; weight: (C, S) f32; bias: (C,) f32  ->  (B, C) f32."""
    B, C, H, W = x.shape
    S = H * W
    assert weight.shape == (C, S), (weight.shape, (C, S))
    assert bias.shape == (C,)
    # TODO(synk): general (non power-of-two) spatial sizes would need padded
    # sort keys + a lane mask; not needed for the reference module's use case.
    assert S & (S - 1) == 0, "in-kernel bitonic sort requires S = H*W to be a power of two"

    x_r = x.reshape(B, C, S)
    b_r = bias.reshape(1, C)

    # Batch tiling: large blocks so each grid step moves ~0.5+ MiB instead of a
    # single tiny batch element.  When tiling (B > batch_tile) keep TB a
    # multiple of 8 so the 2-D (TB, C) output BlockSpec stays legal.
    if B > batch_tile:
        TB = batch_tile
        Bp = pl.cdiv(B, TB) * TB
        if Bp != B:
            x_r = jnp.pad(x_r, ((0, Bp - B), (0, 0), (0, 0)))
    else:
        TB = B
        Bp = B
    grid = (Bp // TB,)

    n = int(math.log2(S))
    n_stages = n * (n + 1) // 2
    cost = pl.CostEstimate(
        flops=B * C * S * (3 * n_stages + 2),
        transcendentals=0,
        bytes_accessed=4 * (B * C * S + C * S + C + B * C),
    )

    out = pl.pallas_call(
        functools.partial(_grp_kernel, s=S),
        out_shape=jax.ShapeDtypeStruct((Bp, C), x.dtype),
        grid=grid,
        in_specs=[
            pl.BlockSpec((TB, C, S), lambda i: (i, 0, 0)),   # x, TB batch rows per step
            pl.BlockSpec((C, S), lambda i: (0, 0)),          # weight (resident)
            pl.BlockSpec((1, C), lambda i: (0, 0)),          # bias (resident)
        ],
        out_specs=pl.BlockSpec((TB, C), lambda i: (i, 0)),
        compiler_params=pltpu.CompilerParams(
            dimension_semantics=("parallel",),
            vmem_limit_bytes=32 * 1024 * 1024,
        ),
        cost_estimate=cost,
    )(x_r, weight, b_r)

    return out[:B]


if __name__ == "__main__":
    key = jax.random.PRNGKey(0)
    B, C, H, W = 2, 8, 16, 16
    S = H * W

    kx, kw, kb = jax.random.split(key, 3)
    x = jax.random.normal(kx, (B, C, H, W), dtype=jnp.float32)

    # Deterministic init matching nn.Conv1d's shapes/scale:
    # weight (C, 1, S) -> (C, S), bias (C,), uniform(-1/sqrt(S), 1/sqrt(S)).
    bound = 1.0 / math.sqrt(S)
    weight = jax.random.uniform(kw, (C, S), jnp.float32, -bound, bound)
    bias = jax.random.uniform(kb, (C,), jnp.float32, -bound, bound)

    out = global_rank_pooling(x, weight, bias)
    out = jax.block_until_ready(out)

    # Pure-JAX reference: descending sort (topk values) + depthwise full-length conv.
    x_sorted = -jnp.sort(-x.reshape(B, C, S), axis=-1)
    ref = jnp.einsum("bcs,cs->bc", x_sorted, weight) + bias

    assert out.shape == (B, C), out.shape
    assert jnp.allclose(out, ref, atol=1e-4, rtol=1e-4), (out, ref)
    print("KERNEL_OK")
</pallas_src>

<mosaic_0001>
module attributes {stable_mosaic.version = 11 : i64} {
  func.func @_grp_kernel(%arg0: i32, %arg1: memref<2x8x256xf32, #tpu.memory_space<vmem>>, %arg2: memref<8x256xf32, #tpu.memory_space<vmem>>, %arg3: memref<1x8xf32, #tpu.memory_space<vmem>>, %arg4: memref<2x8xf32, #tpu.memory_space<vmem>>) attributes {dimension_semantics = [#tpu.dimension_semantics<parallel>], iteration_bounds = array<i64: 1>, scalar_prefetch = 0 : i64, scratch_operands = 0 : i64, tpu.core_type = #tpu.core_type<tc>, window_params = [{transform_indices = @transform_0, window_bounds = array<i64: 2, 8, 256>}, {pipeline_mode = #tpu.pipeline_mode<synchronous>, transform_indices = @transform_1, window_bounds = array<i64: 8, 256>}, {pipeline_mode = #tpu.pipeline_mode<synchronous>, transform_indices = @transform_2, window_bounds = array<i64: 1, 8>}, {transform_indices = @transform_3, window_bounds = array<i64: 2, 8>}]} {
    %c0 = arith.constant 0 : index
    %c0_0 = arith.constant 0 : index
    %c0_1 = arith.constant 0 : index
    %0 = vector.load %arg1[%c0, %c0_0, %c0_1] : memref<2x8x256xf32, #tpu.memory_space<vmem>>, vector<2x8x256xf32>
    %1 = vector.shape_cast %0 : vector<2x8x256xf32> to vector<16x256xf32>
    %2 = tpu.iota {dimensions = array<i32: 1>} : vector<16x256xi32>
    %c1_i32 = arith.constant 1 : i32
    %3 = vector.broadcast %c1_i32 : i32 to vector<16x256xi32>
    %4 = arith.andi %2, %3 : vector<16x256xi32>
    %c0_i32 = arith.constant 0 : i32
    %5 = vector.broadcast %c0_i32 : i32 to vector<16x256xi32>
    %6 = arith.cmpi eq, %4, %5 : vector<16x256xi32>
    %c2_i32 = arith.constant 2 : i32
    %7 = vector.broadcast %c2_i32 : i32 to vector<16x256xi32>
    %8 = arith.andi %2, %7 : vector<16x256xi32>
    %c0_i32_2 = arith.constant 0 : i32
    %9 = vector.broadcast %c0_i32_2 : i32 to vector<16x256xi32>
    %10 = arith.cmpi eq, %8, %9 : vector<16x256xi32>
    %c4_i32 = arith.constant 4 : i32
    %11 = vector.broadcast %c4_i32 : i32 to vector<16x256xi32>
    %12 = arith.andi %2, %11 : vector<16x256xi32>
    %c0_i32_3 = arith.constant 0 : i32
    %13 = vector.broadcast %c0_i32_3 : i32 to vector<16x256xi32>
    %14 = arith.cmpi eq, %12, %13 : vector<16x256xi32>
    %c8_i32 = arith.constant 8 : i32
    %15 = vector.broadcast %c8_i32 : i32 to vector<16x256xi32>
    %16 = arith.andi %2, %15 : vector<16x256xi32>
    %c0_i32_4 = arith.constant 0 : i32
    %17 = vector.broadcast %c0_i32_4 : i32 to vector<16x256xi32>
    %18 = arith.cmpi eq, %16, %17 : vector<16x256xi32>
    %c16_i32 = arith.constant 16 : i32
    %19 = vector.broadcast %c16_i32 : i32 to vector<16x256xi32>
    %20 = arith.andi %2, %19 : vector<16x256xi32>
    %c0_i32_5 = arith.constant 0 : i32
    %21 = vector.broadcast %c0_i32_5 : i32 to vector<16x256xi32>
    %22 = arith.cmpi eq, %20, %21 : vector<16x256xi32>
    %c32_i32 = arith.constant 32 : i32
    %23 = vector.broadcast %c32_i32 : i32 to vector<16x256xi32>
    %24 = arith.andi %2, %23 : vector<16x256xi32>
    %c0_i32_6 = arith.constant 0 : i32
    %25 = vector.broadcast %c0_i32_6 : i32 to vector<16x256xi32>
    %26 = arith.cmpi eq, %24, %25 : vector<16x256xi32>
    %c64_i32 = arith.constant 64 : i32
    %27 = vector.broadcast %c64_i32 : i32 to vector<16x256xi32>
    %28 = arith.andi %2, %27 : vector<16x256xi32>
    %c0_i32_7 = arith.constant 0 : i32
    %29 = vector.broadcast %c0_i32_7 : i32 to vector<16x256xi32>
    %30 = arith.cmpi eq, %28, %29 : vector<16x256xi32>
    %c128_i32 = arith.constant 128 : i32
    %31 = vector.broadcast %c128_i32 : i32 to vector<16x256xi32>
    %32 = arith.andi %2, %31 : vector<16x256xi32>
    %c0_i32_8 = arith.constant 0 : i32
    %33 = vector.broadcast %c0_i32_8 : i32 to vector<16x256xi32>
    %34 = arith.cmpi eq, %32, %33 : vector<16x256xi32>
    %c2_i32_9 = arith.constant 2 : i32
    %35 = vector.broadcast %c2_i32_9 : i32 to vector<16x256xi32>
    %36 = arith.andi %2, %35 : vector<16x256xi32>
    %c0_i32_10 = arith.constant 0 : i32
    %37 = vector.broadcast %c0_i32_10 : i32 to vector<16x256xi32>
    %38 = arith.cmpi eq, %36, %37 : vector<16x256xi32>
    %c255_i32 = arith.constant 255 : i32
    %39 = tpu.dynamic_rotate %1 by %c255_i32 dim 1 : vector<16x256xf32>, i32 -> vector<16x256xf32>
    %c1_i32_11 = arith.constant 1 : i32
    %40 = tpu.dynamic_rotate %1 by %c1_i32_11 dim 1 : vector<16x256xf32>, i32 -> vector<16x256xf32>
    %41 = arith.select %6, %39, %40 : vector<16x256xi1>, vector<16x256xf32>
    %42 = arith.xori %38, %6 : vector<16x256xi1>
    %cst = arith.constant dense<true> : vector<16x256xi1>
    %43 = arith.xori %42, %cst : vector<16x256xi1>
    %44 = arith.cmpf oge, %1, %41 : vector<16x256xf32>
    %45 = arith.xori %43, %44 : vector<16x256xi1>
    %cst_12 = arith.constant dense<true> : vector<16x256xi1>
    %46 = arith.xori %45, %cst_12 : vector<16x256xi1>
    %47 = arith.select %46, %1, %41 : vector<16x256xi1>, vector<16x256xf32>
    %c4_i32_13 = arith.constant 4 : i32
    %48 = vector.broadcast %c4_i32_13 : i32 to vector<16x256xi32>
    %49 = arith.andi %2, %48 : vector<16x256xi32>
    %c0_i32_14 = arith.constant 0 : i32
    %50 = vector.broadcast %c0_i32_14 : i32 to vector<16x256xi32>
    %51 = arith.cmpi eq, %49, %50 : vector<16x256xi32>
    %c254_i32 = arith.constant 254 : i32
    %52 = tpu.dynamic_rotate %47 by %c254_i32 dim 1 : vector<16x256xf32>, i32 -> vector<16x256xf32>
    %c2_i32_15 = arith.constant 2 : i32
    %53 = tpu.dynamic_rotate %47 by %c2_i32_15 dim 1 : vector<16x256xf32>, i32 -> vector<16x256xf32>
    %54 = arith.select %10, %52, %53 : vector<16x256xi1>, vector<16x256xf32>
    %55 = arith.xori %51, %10 : vector<16x256xi1>
    %cst_16 = arith.constant dense<true> : vector<16x256xi1>
    %56 = arith.xori %55, %cst_16 : vector<16x256xi1>
    %57 = arith.cmpf oge, %47, %54 : vector<16x256xf32>
    %58 = arith.xori %56, %57 : vector<16x256xi1>
    %cst_17 = arith.constant dense<true> : vector<16x256xi1>
    %59 = arith.xori %58, %cst_17 : vector<16x256xi1>
    %60 = arith.select %59, %47, %54 : vector<16x256xi1>, vector<16x256xf32>
    %c255_i32_18 = arith.constant 255 : i32
    %61 = tpu.dynamic_rotate %60 by %c255_i32_18 dim 1 : vector<16x256xf32>, i32 -> vector<16x256xf32>
    %c1_i32_19 = arith.constant 1 : i32
    %62 = tpu.dynamic_rotate %60 by %c1_i32_19 dim 1 : vector<16x256xf32>, i32 -> vector<16x256xf32>
    %63 = arith.select %6, %61, %62 : vector<16x256xi1>, vector<16x256xf32>
    %64 = arith.xori %51, %6 : vector<16x256xi1>
    %cst_20 = arith.constant dense<true> : vector<16x256xi1>
    %65 = arith.xori %64, %cst_20 : vector<16x256xi1>
    %66 = arith.cmpf oge, %60, %63 : vector<16x256xf32>
    %67 = arith.xori %65, %66 : vector<16x256xi1>
    %cst_21 = arith.constant dense<true> : vector<16x256xi1>
    %68 = arith.xori %67, %cst_21 : vector<16x256xi1>
    %69 = arith.select %68, %60, %63 : vector<16x256xi1>, vector<16x256xf32>
    %c8_i32_22 = arith.constant 8 : i32
    %70 = vector.broadcast %c8_i32_22 : i32 to vector<16x256xi32>
    %71 = arith.andi %2, %70 : vector<16x256xi32>
    %c0_i32_23 = arith.constant 0 : i32
    %72 = vector.broadcast %c0_i32_23 : i32 to vector<16x256xi32>
    %73 = arith.cmpi eq, %71, %72 : vector<16x256xi32>
    %c252_i32 = arith.constant 252 : i32
    %74 = tpu.dynamic_rotate %69 by %c252_i32 dim 1 : vector<16x256xf32>, i32 -> vector<16x256xf32>
    %c4_i32_24 = arith.constant 4 : i32
    %75 = tpu.dynamic_rotate %69 by %c4_i32_24 dim 1 : vector<16x256xf32>, i32 -> vector<16x256xf32>
    %76 = arith.select %14, %74, %75 : vector<16x256xi1>, vector<16x256xf32>
    %77 = arith.xori %73, %14 : vector<16x256xi1>
    %cst_25 = arith.constant dense<true> : vector<16x256xi1>
    %78 = arith.xori %77, %cst_25 : vector<16x256xi1>
    %79 = arith.cmpf oge, %69, %76 : vector<16x256xf32>
    %80 = arith.xori %78, %79 : vector<16x256xi1>
    %cst_26 = arith.constant dense<true> : vector<16x256xi1>
    %81 = arith.xori %80, %cst_26 : vector<16x256xi1>
    %82 = arith.select %81, %69, %76 : vector<16x256xi1>, vector<16x256xf32>
    %c254_i32_27 = arith.constant 254 : i32
    %83 = tpu.dynamic_rotate %82 by %c254_i32_27 dim 1 : vector<16x256xf32>, i32 -> vector<16x256xf32>
    %c2_i32_28 = arith.constant 2 : i32
    %84 = tpu.dynamic_rotate %82 by %c2_i32_28 dim 1 : vector<16x256xf32>, i32 -> vector<16x256xf32>
    %85 = arith.select %10, %83, %84 : vector<16x256xi1>, vector<16x256xf32>
    %86 = arith.xori %73, %10 : vector<16x256xi1>
    %cst_29 = arith.constant dense<true> : vector<16x256xi1>
    %87 = arith.xori %86, %cst_29 : vector<16x256xi1>
    %88 = arith.cmpf oge, %82, %85 : vector<16x256xf32>
    %89 = arith.xori %87, %88 : vector<16x256xi1>
    %cst_30 = arith.constant dense<true> : vector<16x256xi1>
    %90 = arith.xori %89, %cst_30 : vector<16x256xi1>
    %91 = arith.select %90, %82, %85 : vector<16x256xi1>, vector<16x256xf32>
    %c255_i32_31 = arith.constant 255 : i32
    %92 = tpu.dynamic_rotate %91 by %c255_i32_31 dim 1 : vector<16x256xf32>, i32 -> vector<16x256xf32>
    %c1_i32_32 = arith.constant 1 : i32
    %93 = tpu.dynamic_rotate %91 by %c1_i32_32 dim 1 : vector<16x256xf32>, i32 -> vector<16x256xf32>
    %94 = arith.select %6, %92, %93 : vector<16x256xi1>, vector<16x256xf32>
    %95 = arith.xori %73, %6 : vector<16x256xi1>
    %cst_33 = arith.constant dense<true> : vector<16x256xi1>
    %96 = arith.xori %95, %cst_33 : vector<16x256xi1>
    %97 = arith.cmpf oge, %91, %94 : vector<16x256xf32>
    %98 = arith.xori %96, %97 : vector<16x256xi1>
    %cst_34 = arith.constant dense<true> : vector<16x256xi1>
    %99 = arith.xori %98, %cst_34 : vector<16x256xi1>
    %100 = arith.select %99, %91, %94 : vector<16x256xi1>, vector<16x256xf32>
    %c16_i32_35 = arith.constant 16 : i32
    %101 = vector.broadcast %c16_i32_35 : i32 to vector<16x256xi32>
    %102 = arith.andi %2, %101 : vector<16x256xi32>
    %c0_i32_36 = arith.constant 0 : i32
    %103 = vector.broadcast %c0_i32_36 : i32 to vector<16x256xi32>
    %104 = arith.cmpi eq, %102, %103 : vector<16x256xi32>
    %c248_i32 = arith.constant 248 : i32
    %105 = tpu.dynamic_rotate %100 by %c248_i32 dim 1 : vector<16x256xf32>, i32 -> vector<16x256xf32>
    %c8_i32_37 = arith.constant 8 : i32
    %106 = tpu.dynamic_rotate %100 by %c8_i32_37 dim 1 : vector<16x256xf32>, i32 -> vector<16x256xf32>
    %107 = arith.select %18, %105, %106 : vector<16x256xi1>, vector<16x256xf32>
    %108 = arith.xori %104, %18 : vector<16x256xi1>
    %cst_38 = arith.constant dense<true> : vector<16x256xi1>
    %109 = arith.xori %108, %cst_38 : vector<16x256xi1>
    %110 = arith.cmpf oge, %100, %107 : vector<16x256xf32>
    %111 = arith.xori %109, %110 : vector<16x256xi1>
    %cst_39 = arith.constant dense<true> : vector<16x256xi1>
    %112 = arith.xori %111, %cst_39 : vector<16x256xi1>
    %113 = arith.select %112, %100, %107 : vector<16x256xi1>, vector<16x256xf32>
    %c252_i32_40 = arith.constant 252 : i32
    %114 = tpu.dynamic_rotate %113 by %c252_i32_40 dim 1 : vector<16x256xf32>, i32 -> vector<16x256xf32>
    %c4_i32_41 = arith.constant 4 : i32
    %115 = tpu.dynamic_rotate %113 by %c4_i32_41 dim 1 : vector<16x256xf32>, i32 -> vector<16x256xf32>
    %116 = arith.select %14, %114, %115 : vector<16x256xi1>, vector<16x256xf32>
    %117 = arith.xori %104, %14 : vector<16x256xi1>
    %cst_42 = arith.constant dense<true> : vector<16x256xi1>
    %118 = arith.xori %117, %cst_42 : vector<16x256xi1>
    %119 = arith.cmpf oge, %113, %116 : vector<16x256xf32>
    %120 = arith.xori %118, %119 : vector<16x256xi1>
    %cst_43 = arith.constant dense<true> : vector<16x256xi1>
    %121 = arith.xori %120, %cst_43 : vector<16x256xi1>
    %122 = arith.select %121, %113, %116 : vector<16x256xi1>, vector<16x256xf32>
    %c254_i32_44 = arith.constant 254 : i32
    %123 = tpu.dynamic_rotate %122 by %c254_i32_44 dim 1 : vector<16x256xf32>, i32 -> vector<16x256xf32>
    %c2_i32_45 = arith.constant 2 : i32
    %124 = tpu.dynamic_rotate %122 by %c2_i32_45 dim 1 : vector<16x256xf32>, i32 -> vector<16x256xf32>
    %125 = arith.select %10, %123, %124 : vector<16x256xi1>, vector<16x256xf32>
    %126 = arith.xori %104, %10 : vector<16x256xi1>
    %cst_46 = arith.constant dense<true> : vector<16x256xi1>
    %127 = arith.xori %126, %cst_46 : vector<16x256xi1>
    %128 = arith.cmpf oge, %122, %125 : vector<16x256xf32>
    %129 = arith.xori %127, %128 : vector<16x256xi1>
    %cst_47 = arith.constant dense<true> : vector<16x256xi1>
    %130 = arith.xori %129, %cst_47 : vector<16x256xi1>
    %131 = arith.select %130, %122, %125 : vector<16x256xi1>, vector<16x256xf32>
    %c255_i32_48 = arith.constant 255 : i32
    %132 = tpu.dynamic_rotate %131 by %c255_i32_48 dim 1 : vector<16x256xf32>, i32 -> vector<16x256xf32>
    %c1_i32_49 = arith.constant 1 : i32
    %133 = tpu.dynamic_rotate %131 by %c1_i32_49 dim 1 : vector<16x256xf32>, i32 -> vector<16x256xf32>
    %134 = arith.select %6, %132, %133 : vector<16x256xi1>, vector<16x256xf32>
    %135 = arith.xori %104, %6 : vector<16x256xi1>
    %cst_50 = arith.constant dense<true> : vector<16x256xi1>
    %136 = arith.xori %135, %cst_50 : vector<16x256xi1>
    %137 = arith.cmpf oge, %131, %134 : vector<16x256xf32>
    %138 = arith.xori %136, %137 : vector<16x256xi1>
    %cst_51 = arith.constant dense<true> : vector<16x256xi1>
    %139 = arith.xori %138, %cst_51 : vector<16x256xi1>
    %140 = arith.select %139, %131, %134 : vector<16x256xi1>, vector<16x256xf32>
    %c32_i32_52 = arith.constant 32 : i32
    %141 = vector.broadcast %c32_i32_52 : i32 to vector<16x256xi32>
    %142 = arith.andi %2, %141 : vector<16x256xi32>
    %c0_i32_53 = arith.constant 0 : i32
    %143 = vector.broadcast %c0_i32_53 : i32 to vector<16x256xi32>
    %144 = arith.cmpi eq, %142, %143 : vector<16x256xi32>
    %c240_i32 = arith.constant 240 : i32
    %145 = tpu.dynamic_rotate %140 by %c240_i32 dim 1 : vector<16x256xf32>, i32 -> vector<16x256xf32>
    %c16_i32_54 = arith.constant 16 : i32
    %146 = tpu.dynamic_rotate %140 by %c16_i32_54 dim 1 : vector<16x256xf32>, i32 -> vector<16x256xf32>
    %147 = arith.select %22, %145, %146 : vector<16x256xi1>, vector<16x256xf32>
    %148 = arith.xori %144, %22 : vector<16x256xi1>
    %cst_55 = arith.constant dense<true> : vector<16x256xi1>
    %149 = arith.xori %148, %cst_55 : vector<16x256xi1>
    %150 = arith.cmpf oge, %140, %147 : vector<16x256xf32>
    %151 = arith.xori %149, %150 : vector<16x256xi1>
    %cst_56 = arith.constant dense<true> : vector<16x256xi1>
    %152 = arith.xori %151, %cst_56 : vector<16x256xi1>
    %153 = arith.select %152, %140, %147 : vector<16x256xi1>, vector<16x256xf32>
    %c248_i32_57 = arith.constant 248 : i32
    %154 = tpu.dynamic_rotate %153 by %c248_i32_57 dim 1 : vector<16x256xf32>, i32 -> vector<16x256xf32>
    %c8_i32_58 = arith.constant 8 : i32
    %155 = tpu.dynamic_rotate %153 by %c8_i32_58 dim 1 : vector<16x256xf32>, i32 -> vector<16x256xf32>
    %156 = arith.select %18, %154, %155 : vector<16x256xi1>, vector<16x256xf32>
    %157 = arith.xori %144, %18 : vector<16x256xi1>
    %cst_59 = arith.constant dense<true> : vector<16x256xi1>
    %158 = arith.xori %157, %cst_59 : vector<16x256xi1>
    %159 = arith.cmpf oge, %153, %156 : vector<16x256xf32>
    %160 = arith.xori %158, %159 : vector<16x256xi1>
    %cst_60 = arith.constant dense<true> : vector<16x256xi1>
    %161 = arith.xori %160, %cst_60 : vector<16x256xi1>
    %162 = arith.select %161, %153, %156 : vector<16x256xi1>, vector<16x256xf32>
    %c252_i32_61 = arith.constant 252 : i32
    %163 = tpu.dynamic_rotate %162 by %c252_i32_61 dim 1 : vector<16x256xf32>, i32 -> vector<16x256xf32>
    %c4_i32_62 = arith.constant 4 : i32
    %164 = tpu.dynamic_rotate %162 by %c4_i32_62 dim 1 : vector<16x256xf32>, i32 -> vector<16x256xf32>
    %165 = arith.select %14, %163, %164 : vector<16x256xi1>, vector<16x256xf32>
    %166 = arith.xori %144, %14 : vector<16x256xi1>
    %cst_63 = arith.constant dense<true> : vector<16x256xi1>
    %167 = arith.xori %166, %cst_63 : vector<16x256xi1>
    %168 = arith.cmpf oge, %162, %165 : vector<16x256xf32>
    %169 = arith.xori %167, %168 : vector<16x256xi1>
    %cst_64 = arith.constant dense<true> : vector<16x256xi1>
    %170 = arith.xori %169, %cst_64 : vector<16x256xi1>
    %171 = arith.select %170, %162, %165 : vector<16x256xi1>, vector<16x256xf32>
    %c254_i32_65 = arith.constant 254 : i32
    %172 = tpu.dynamic_rotate %171 by %c254_i32_65 dim 1 : vector<16x256xf32>, i32 -> vector<16x256xf32>
    %c2_i32_66 = arith.constant 2 : i32
    %173 = tpu.dynamic_rotate %171 by %c2_i32_66 dim 1 : vector<16x256xf32>, i32 -> vector<16x256xf32>
    %174 = arith.select %10, %172, %173 : vector<16x256xi1>, vector<16x256xf32>
    %175 = arith.xori %144, %10 : vector<16x256xi1>
    %cst_67 = arith.constant dense<true> : vector<16x256xi1>
    %176 = arith.xori %175, %cst_67 : vector<16x256xi1>
    %177 = arith.cmpf oge, %171, %174 : vector<16x256xf32>
    %178 = arith.xori %176, %177 : vector<16x256xi1>
    %cst_68 = arith.constant dense<true> : vector<16x256xi1>
    %179 = arith.xori %178, %cst_68 : vector<16x256xi1>
    %180 = arith.select %179, %171, %174 : vector<16x256xi1>, vector<16x256xf32>
    %c255_i32_69 = arith.constant 255 : i32
    %181 = tpu.dynamic_rotate %180 by %c255_i32_69 dim 1 : vector<16x256xf32>, i32 -> vector<16x256xf32>
    %c1_i32_70 = arith.constant 1 : i32
    %182 = tpu.dynamic_rotate %180 by %c1_i32_70 dim 1 : vector<16x256xf32>, i32 -> vector<16x256xf32>
    %183 = arith.select %6, %181, %182 : vector<16x256xi1>, vector<16x256xf32>
    %184 = arith.xori %144, %6 : vector<16x256xi1>
    %cst_71 = arith.constant dense<true> : vector<16x256xi1>
    %185 = arith.xori %184, %cst_71 : vector<16x256xi1>
    %186 = arith.cmpf oge, %180, %183 : vector<16x256xf32>
    %187 = arith.xori %185, %186 : vector<16x256xi1>
    %cst_72 = arith.constant dense<true> : vector<16x256xi1>
    %188 = arith.xori %187, %cst_72 : vector<16x256xi1>
    %189 = arith.select %188, %180, %183 : vector<16x256xi1>, vector<16x256xf32>
    %c64_i32_73 = arith.constant 64 : i32
    %190 = vector.broadcast %c64_i32_73 : i32 to vector<16x256xi32>
    %191 = arith.andi %2, %190 : vector<16x256xi32>
    %c0_i32_74 = arith.constant 0 : i32
    %192 = vector.broadcast %c0_i32_74 : i32 to vector<16x256xi32>
    %193 = arith.cmpi eq, %191, %192 : vector<16x256xi32>
    %c224_i32 = arith.constant 224 : i32
    %194 = tpu.dynamic_rotate %189 by %c224_i32 dim 1 : vector<16x256xf32>, i32 -> vector<16x256xf32>
    %c32_i32_75 = arith.constant 32 : i32
    %195 = tpu.dynamic_rotate %189 by %c32_i32_75 dim 1 : vector<16x256xf32>, i32 -> vector<16x256xf32>
    %196 = arith.select %26, %194, %195 : vector<16x256xi1>, vector<16x256xf32>
    %197 = arith.xori %193, %26 : vector<16x256xi1>
    %cst_76 = arith.constant dense<true> : vector<16x256xi1>
    %198 = arith.xori %197, %cst_76 : vector<16x256xi1>
    %199 = arith.cmpf oge, %189, %196 : vector<16x256xf32>
    %200 = arith.xori %198, %199 : vector<16x256xi1>
    %cst_77 = arith.constant dense<true> : vector<16x256xi1>
    %201 = arith.xori %200, %cst_77 : vector<16x256xi1>
    %202 = arith.select %201, %189, %196 : vector<16x256xi1>, vector<16x256xf32>
    %c240_i32_78 = arith.constant 240 : i32
    %203 = tpu.dynamic_rotate %202 by %c240_i32_78 dim 1 : vector<16x256xf32>, i32 -> vector<16x256xf32>
    %c16_i32_79 = arith.constant 16 : i32
    %204 = tpu.dynamic_rotate %202 by %c16_i32_79 dim 1 : vector<16x256xf32>, i32 -> vector<16x256xf32>
    %205 = arith.select %22, %203, %204 : vector<16x256xi1>, vector<16x256xf32>
    %206 = arith.xori %193, %22 : vector<16x256xi1>
    %cst_80 = arith.constant dense<true> : vector<16x256xi1>
    %207 = arith.xori %206, %cst_80 : vector<16x256xi1>
    %208 = arith.cmpf oge, %202, %205 : vector<16x256xf32>
    %209 = arith.xori %207, %208 : vector<16x256xi1>
    %cst_81 = arith.constant dense<true> : vector<16x256xi1>
    %210 = arith.xori %209, %cst_81 : vector<16x256xi1>
    %211 = arith.select %210, %202, %205 : vector<16x256xi1>, vector<16x256xf32>
    %c248_i32_82 = arith.constant 248 : i32
    %212 = tpu.dynamic_rotate %211 by %c248_i32_82 dim 1 : vector<16x256xf32>, i32 -> vector<16x256xf32>
    %c8_i32_83 = arith.constant 8 : i32
    %213 = tpu.dynamic_rotate %211 by %c8_i32_83 dim 1 : vector<16x256xf32>, i32 -> vector<16x256xf32>
    %214 = arith.select %18, %212, %213 : vector<16x256xi1>, vector<16x256xf32>
    %215 = arith.xori %193, %18 : vector<16x256xi1>
    %cst_84 = arith.constant dense<true> : vector<16x256xi1>
    %216 = arith.xori %215, %cst_84 : vector<16x256xi1>
    %217 = arith.cmpf oge, %211, %214 : vector<16x256xf32>
    %218 = arith.xori %216, %217 : vector<16x256xi1>
    %cst_85 = arith.constant dense<true> : vector<16x256xi1>
    %219 = arith.xori %218, %cst_85 : vector<16x256xi1>
    %220 = arith.select %219, %211, %214 : vector<16x256xi1>, vector<16x256xf32>
    %c252_i32_86 = arith.constant 252 : i32
    %221 = tpu.dynamic_rotate %220 by %c252_i32_86 dim 1 : vector<16x256xf32>, i32 -> vector<16x256xf32>
    %c4_i32_87 = arith.constant 4 : i32
    %222 = tpu.dynamic_rotate %220 by %c4_i32_87 dim 1 : vector<16x256xf32>, i32 -> vector<16x256xf32>
    %223 = arith.select %14, %221, %222 : vector<16x256xi1>, vector<16x256xf32>
    %224 = arith.xori %193, %14 : vector<16x256xi1>
    %cst_88 = arith.constant dense<true> : vector<16x256xi1>
    %225 = arith.xori %224, %cst_88 : vector<16x256xi1>
    %226 = arith.cmpf oge, %220, %223 : vector<16x256xf32>
    %227 = arith.xori %225, %226 : vector<16x256xi1>
    %cst_89 = arith.constant dense<true> : vector<16x256xi1>
    %228 = arith.xori %227, %cst_89 : vector<16x256xi1>
    %229 = arith.select %228, %220, %223 : vector<16x256xi1>, vector<16x256xf32>
    %c254_i32_90 = arith.constant 254 : i32
    %230 = tpu.dynamic_rotate %229 by %c254_i32_90 dim 1 : vector<16x256xf32>, i32 -> vector<16x256xf32>
    %c2_i32_91 = arith.constant 2 : i32
    %231 = tpu.dynamic_rotate %229 by %c2_i32_91 dim 1 : vector<16x256xf32>, i32 -> vector<16x256xf32>
    %232 = arith.select %10, %230, %231 : vector<16x256xi1>, vector<16x256xf32>
    %233 = arith.xori %193, %10 : vector<16x256xi1>
    %cst_92 = arith.constant dense<true> : vector<16x256xi1>
    %234 = arith.xori %233, %cst_92 : vector<16x256xi1>
    %235 = arith.cmpf oge, %229, %232 : vector<16x256xf32>
    %236 = arith.xori %234, %235 : vector<16x256xi1>
    %cst_93 = arith.constant dense<true> : vector<16x256xi1>
    %237 = arith.xori %236, %cst_93 : vector<16x256xi1>
    %238 = arith.select %237, %229, %232 : vector<16x256xi1>, vector<16x256xf32>
    %c255_i32_94 = arith.constant 255 : i32
    %239 = tpu.dynamic_rotate %238 by %c255_i32_94 dim 1 : vector<16x256xf32>, i32 -> vector<16x256xf32>
    %c1_i32_95 = arith.constant 1 : i32
    %240 = tpu.dynamic_rotate %238 by %c1_i32_95 dim 1 : vector<16x256xf32>, i32 -> vector<16x256xf32>
    %241 = arith.select %6, %239, %240 : vector<16x256xi1>, vector<16x256xf32>
    %242 = arith.xori %193, %6 : vector<16x256xi1>
    %cst_96 = arith.constant dense<true> : vector<16x256xi1>
    %243 = arith.xori %242, %cst_96 : vector<16x256xi1>
    %244 = arith.cmpf oge, %238, %241 : vector<16x256xf32>
    %245 = arith.xori %243, %244 : vector<16x256xi1>
    %cst_97 = arith.constant dense<true> : vector<16x256xi1>
    %246 = arith.xori %245, %cst_97 : vector<16x256xi1>
    %247 = arith.select %246, %238, %241 : vector<16x256xi1>, vector<16x256xf32>
    %c128_i32_98 = arith.constant 128 : i32
    %248 = vector.broadcast %c128_i32_98 : i32 to vector<16x256xi32>
    %249 = arith.andi %2, %248 : vector<16x256xi32>
    %c0_i32_99 = arith.constant 0 : i32
    %250 = vector.broadcast %c0_i32_99 : i32 to vector<16x256xi32>
    %251 = arith.cmpi eq, %249, %250 : vector<16x256xi32>
    %c192_i32 = arith.constant 192 : i32
    %252 = tpu.dynamic_rotate %247 by %c192_i32 dim 1 : vector<16x256xf32>, i32 -> vector<16x256xf32>
    %c64_i32_100 = arith.constant 64 : i32
    %253 = tpu.dynamic_rotate %247 by %c64_i32_100 dim 1 : vector<16x256xf32>, i32 -> vector<16x256xf32>
    %254 = arith.select %30, %252, %253 : vector<16x256xi1>, vector<16x256xf32>
    %255 = arith.xori %251, %30 : vector<16x256xi1>
    %cst_101 = arith.constant dense<true> : vector<16x256xi1>
    %256 = arith.xori %255, %cst_101 : vector<16x256xi1>
    %257 = arith.cmpf oge, %247, %254 : vector<16x256xf32>
    %258 = arith.xori %256, %257 : vector<16x256xi1>
    %cst_102 = arith.constant dense<true> : vector<16x256xi1>
    %259 = arith.xori %258, %cst_102 : vector<16x256xi1>
    %260 = arith.select %259, %247, %254 : vector<16x256xi1>, vector<16x256xf32>
    %c224_i32_103 = arith.constant 224 : i32
    %261 = tpu.dynamic_rotate %260 by %c224_i32_103 dim 1 : vector<16x256xf32>, i32 -> vector<16x256xf32>
    %c32_i32_104 = arith.constant 32 : i32
    %262 = tpu.dynamic_rotate %260 by %c32_i32_104 dim 1 : vector<16x256xf32>, i32 -> vector<16x256xf32>
    %263 = arith.select %26, %261, %262 : vector<16x256xi1>, vector<16x256xf32>
    %264 = arith.xori %251, %26 : vector<16x256xi1>
    %cst_105 = arith.constant dense<true> : vector<16x256xi1>
    %265 = arith.xori %264, %cst_105 : vector<16x256xi1>
    %266 = arith.cmpf oge, %260, %263 : vector<16x256xf32>
    %267 = arith.xori %265, %266 : vector<16x256xi1>
    %cst_106 = arith.constant dense<true> : vector<16x256xi1>
    %268 = arith.xori %267, %cst_106 : vector<16x256xi1>
    %269 = arith.select %268, %260, %263 : vector<16x256xi1>, vector<16x256xf32>
    %c240_i32_107 = arith.constant 240 : i32
    %270 = tpu.dynamic_rotate %269 by %c240_i32_107 dim 1 : vector<16x256xf32>, i32 -> vector<16x256xf32>
    %c16_i32_108 = arith.constant 16 : i32
    %271 = tpu.dynamic_rotate %269 by %c16_i32_108 dim 1 : vector<16x256xf32>, i32 -> vector<16x256xf32>
    %272 = arith.select %22, %270, %271 : vector<16x256xi1>, vector<16x256xf32>
    %273 = arith.xori %251, %22 : vector<16x256xi1>
    %cst_109 = arith.constant dense<true> : vector<16x256xi1>
    %274 = arith.xori %273, %cst_109 : vector<16x256xi1>
    %275 = arith.cmpf oge, %269, %272 : vector<16x256xf32>
    %276 = arith.xori %274, %275 : vector<16x256xi1>
    %cst_110 = arith.constant dense<true> : vector<16x256xi1>
    %277 = arith.xori %276, %cst_110 : vector<16x256xi1>
    %278 = arith.select %277, %269, %272 : vector<16x256xi1>, vector<16x256xf32>
    %c248_i32_111 = arith.constant 248 : i32
    %279 = tpu.dynamic_rotate %278 by %c248_i32_111 dim 1 : vector<16x256xf32>, i32 -> vector<16x256xf32>
    %c8_i32_112 = arith.constant 8 : i32
    %280 = tpu.dynamic_rotate %278 by %c8_i32_112 dim 1 : vector<16x256xf32>, i32 -> vector<16x256xf32>
    %281 = arith.select %18, %279, %280 : vector<16x256xi1>, vector<16x256xf32>
    %282 = arith.xori %251, %18 : vector<16x256xi1>
    %cst_113 = arith.constant dense<true> : vector<16x256xi1>
    %283 = arith.xori %282, %cst_113 : vector<16x256xi1>
    %284 = arith.cmpf oge, %278, %281 : vector<16x256xf32>
    %285 = arith.xori %283, %284 : vector<16x256xi1>
    %cst_114 = arith.constant dense<true> : vector<16x256xi1>
    %286 = arith.xori %285, %cst_114 : vector<16x256xi1>
    %287 = arith.select %286, %278, %281 : vector<16x256xi1>, vector<16x256xf32>
    %c252_i32_115 = arith.constant 252 : i32
    %288 = tpu.dynamic_rotate %287 by %c252_i32_115 dim 1 : vector<16x256xf32>, i32 -> vector<16x256xf32>
    %c4_i32_116 = arith.constant 4 : i32
    %289 = tpu.dynamic_rotate %287 by %c4_i32_116 dim 1 : vector<16x256xf32>, i32 -> vector<16x256xf32>
    %290 = arith.select %14, %288, %289 : vector<16x256xi1>, vector<16x256xf32>
    %291 = arith.xori %251, %14 : vector<16x256xi1>
    %cst_117 = arith.constant dense<true> : vector<16x256xi1>
    %292 = arith.xori %291, %cst_117 : vector<16x256xi1>
    %293 = arith.cmpf oge, %287, %290 : vector<16x256xf32>
    %294 = arith.xori %292, %293 : vector<16x256xi1>
    %cst_118 = arith.constant dense<true> : vector<16x256xi1>
    %295 = arith.xori %294, %cst_118 : vector<16x256xi1>
    %296 = arith.select %295, %287, %290 : vector<16x256xi1>, vector<16x256xf32>
    %c254_i32_119 = arith.constant 254 : i32
    %297 = tpu.dynamic_rotate %296 by %c254_i32_119 dim 1 : vector<16x256xf32>, i32 -> vector<16x256xf32>
    %c2_i32_120 = arith.constant 2 : i32
    %298 = tpu.dynamic_rotate %296 by %c2_i32_120 dim 1 : vector<16x256xf32>, i32 -> vector<16x256xf32>
    %299 = arith.select %10, %297, %298 : vector<16x256xi1>, vector<16x256xf32>
    %300 = arith.xori %251, %10 : vector<16x256xi1>
    %cst_121 = arith.constant dense<true> : vector<16x256xi1>
    %301 = arith.xori %300, %cst_121 : vector<16x256xi1>
    %302 = arith.cmpf oge, %296, %299 : vector<16x256xf32>
    %303 = arith.xori %301, %302 : vector<16x256xi1>
    %cst_122 = arith.constant dense<true> : vector<16x256xi1>
    %304 = arith.xori %303, %cst_122 : vector<16x256xi1>
    %305 = arith.select %304, %296, %299 : vector<16x256xi1>, vector<16x256xf32>
    %c255_i32_123 = arith.constant 255 : i32
    %306 = tpu.dynamic_rotate %305 by %c255_i32_123 dim 1 : vector<16x256xf32>, i32 -> vector<16x256xf32>
    %c1_i32_124 = arith.constant 1 : i32
    %307 = tpu.dynamic_rotate %305 by %c1_i32_124 dim 1 : vector<16x256xf32>, i32 -> vector<16x256xf32>
    %308 = arith.select %6, %306, %307 : vector<16x256xi1>, vector<16x256xf32>
    %309 = arith.xori %251, %6 : vector<16x256xi1>
    %cst_125 = arith.constant dense<true> : vector<16x256xi1>
    %310 = arith.xori %309, %cst_125 : vector<16x256xi1>
    %311 = arith.cmpf oge, %305, %308 : vector<16x256xf32>
    %312 = arith.xori %310, %311 : vector<16x256xi1>
    %cst_126 = arith.constant dense<true> : vector<16x256xi1>
    %313 = arith.xori %312, %cst_126 : vector<16x256xi1>
    %314 = arith.select %313, %305, %308 : vector<16x256xi1>, vector<16x256xf32>
    %c256_i32 = arith.constant 256 : i32
    %315 = vector.broadcast %c256_i32 : i32 to vector<16x256xi32>
    %316 = arith.andi %2, %315 : vector<16x256xi32>
    %c0_i32_127 = arith.constant 0 : i32
    %317 = vector.broadcast %c0_i32_127 : i32 to vector<16x256xi32>
    %318 = arith.cmpi eq, %316, %317 : vector<16x256xi32>
    %c128_i32_128 = arith.constant 128 : i32
    %319 = tpu.dynamic_rotate %314 by %c128_i32_128 dim 1 : vector<16x256xf32>, i32 -> vector<16x256xf32>
    %c128_i32_129 = arith.constant 128 : i32
    %320 = tpu.dynamic_rotate %314 by %c128_i32_129 dim 1 : vector<16x256xf32>, i32 -> vector<16x256xf32>
    %321 = arith.select %34, %319, %320 : vector<16x256xi1>, vector<16x256xf32>
    %322 = arith.xori %318, %34 : vector<16x256xi1>
    %cst_130 = arith.constant dense<true> : vector<16x256xi1>
    %323 = arith.xori %322, %cst_130 : vector<16x256xi1>
    %324 = arith.cmpf oge, %314, %321 : vector<16x256xf32>
    %325 = arith.xori %323, %324 : vector<16x256xi1>
    %cst_131 = arith.constant dense<true> : vector<16x256xi1>
    %326 = arith.xori %325, %cst_131 : vector<16x256xi1>
    %327 = arith.select %326, %314, %321 : vector<16x256xi1>, vector<16x256xf32>
    %c192_i32_132 = arith.constant 192 : i32
    %328 = tpu.dynamic_rotate %327 by %c192_i32_132 dim 1 : vector<16x256xf32>, i32 -> vector<16x256xf32>
    %c64_i32_133 = arith.constant 64 : i32
    %329 = tpu.dynamic_rotate %327 by %c64_i32_133 dim 1 : vector<16x256xf32>, i32 -> vector<16x256xf32>
    %330 = arith.select %30, %328, %329 : vector<16x256xi1>, vector<16x256xf32>
    %331 = arith.xori %318, %30 : vector<16x256xi1>
    %cst_134 = arith.constant dense<true> : vector<16x256xi1>
    %332 = arith.xori %331, %cst_134 : vector<16x256xi1>
    %333 = arith.cmpf oge, %327, %330 : vector<16x256xf32>
    %334 = arith.xori %332, %333 : vector<16x256xi1>
    %cst_135 = arith.constant dense<true> : vector<16x256xi1>
    %335 = arith.xori %334, %cst_135 : vector<16x256xi1>
    %336 = arith.select %335, %327, %330 : vector<16x256xi1>, vector<16x256xf32>
    %c224_i32_136 = arith.constant 224 : i32
    %337 = tpu.dynamic_rotate %336 by %c224_i32_136 dim 1 : vector<16x256xf32>, i32 -> vector<16x256xf32>
    %c32_i32_137 = arith.constant 32 : i32
    %338 = tpu.dynamic_rotate %336 by %c32_i32_137 dim 1 : vector<16x256xf32>, i32 -> vector<16x256xf32>
    %339 = arith.select %26, %337, %338 : vector<16x256xi1>, vector<16x256xf32>
    %340 = arith.xori %318, %26 : vector<16x256xi1>
    %cst_138 = arith.constant dense<true> : vector<16x256xi1>
    %341 = arith.xori %340, %cst_138 : vector<16x256xi1>
    %342 = arith.cmpf oge, %336, %339 : vector<16x256xf32>
    %343 = arith.xori %341, %342 : vector<16x256xi1>
    %cst_139 = arith.constant dense<true> : vector<16x256xi1>
    %344 = arith.xori %343, %cst_139 : vector<16x256xi1>
    %345 = arith.select %344, %336, %339 : vector<16x256xi1>, vector<16x256xf32>
    %c240_i32_140 = arith.constant 240 : i32
    %346 = tpu.dynamic_rotate %345 by %c240_i32_140 dim 1 : vector<16x256xf32>, i32 -> vector<16x256xf32>
    %c16_i32_141 = arith.constant 16 : i32
    %347 = tpu.dynamic_rotate %345 by %c16_i32_141 dim 1 : vector<16x256xf32>, i32 -> vector<16x256xf32>
    %348 = arith.select %22, %346, %347 : vector<16x256xi1>, vector<16x256xf32>
    %349 = arith.xori %318, %22 : vector<16x256xi1>
    %cst_142 = arith.constant dense<true> : vector<16x256xi1>
    %350 = arith.xori %349, %cst_142 : vector<16x256xi1>
    %351 = arith.cmpf oge, %345, %348 : vector<16x256xf32>
    %352 = arith.xori %350, %351 : vector<16x256xi1>
    %cst_143 = arith.constant dense<true> : vector<16x256xi1>
    %353 = arith.xori %352, %cst_143 : vector<16x256xi1>
    %354 = arith.select %353, %345, %348 : vector<16x256xi1>, vector<16x256xf32>
    %c248_i32_144 = arith.constant 248 : i32
    %355 = tpu.dynamic_rotate %354 by %c248_i32_144 dim 1 : vector<16x256xf32>, i32 -> vector<16x256xf32>
    %c8_i32_145 = arith.constant 8 : i32
    %356 = tpu.dynamic_rotate %354 by %c8_i32_145 dim 1 : vector<16x256xf32>, i32 -> vector<16x256xf32>
    %357 = arith.select %18, %355, %356 : vector<16x256xi1>, vector<16x256xf32>
    %358 = arith.xori %318, %18 : vector<16x256xi1>
    %cst_146 = arith.constant dense<true> : vector<16x256xi1>
    %359 = arith.xori %358, %cst_146 : vector<16x256xi1>
    %360 = arith.cmpf oge, %354, %357 : vector<16x256xf32>
    %361 = arith.xori %359, %360 : vector<16x256xi1>
    %cst_147 = arith.constant dense<true> : vector<16x256xi1>
    %362 = arith.xori %361, %cst_147 : vector<16x256xi1>
    %363 = arith.select %362, %354, %357 : vector<16x256xi1>, vector<16x256xf32>
    %c252_i32_148 = arith.constant 252 : i32
    %364 = tpu.dynamic_rotate %363 by %c252_i32_148 dim 1 : vector<16x256xf32>, i32 -> vector<16x256xf32>
    %c4_i32_149 = arith.constant 4 : i32
    %365 = tpu.dynamic_rotate %363 by %c4_i32_149 dim 1 : vector<16x256xf32>, i32 -> vector<16x256xf32>
    %366 = arith.select %14, %364, %365 : vector<16x256xi1>, vector<16x256xf32>
    %367 = arith.xori %318, %14 : vector<16x256xi1>
    %cst_150 = arith.constant dense<true> : vector<16x256xi1>
    %368 = arith.xori %367, %cst_150 : vector<16x256xi1>
    %369 = arith.cmpf oge, %363, %366 : vector<16x256xf32>
    %370 = arith.xori %368, %369 : vector<16x256xi1>
    %cst_151 = arith.constant dense<true> : vector<16x256xi1>
    %371 = arith.xori %370, %cst_151 : vector<16x256xi1>
    %372 = arith.select %371, %363, %366 : vector<16x256xi1>, vector<16x256xf32>
    %c254_i32_152 = arith.constant 254 : i32
    %373 = tpu.dynamic_rotate %372 by %c254_i32_152 dim 1 : vector<16x256xf32>, i32 -> vector<16x256xf32>
    %c2_i32_153 = arith.constant 2 : i32
    %374 = tpu.dynamic_rotate %372 by %c2_i32_153 dim 1 : vector<16x256xf32>, i32 -> vector<16x256xf32>
    %375 = arith.select %10, %373, %374 : vector<16x256xi1>, vector<16x256xf32>
    %376 = arith.xori %318, %10 : vector<16x256xi1>
    %cst_154 = arith.constant dense<true> : vector<16x256xi1>
    %377 = arith.xori %376, %cst_154 : vector<16x256xi1>
    %378 = arith.cmpf oge, %372, %375 : vector<16x256xf32>
    %379 = arith.xori %377, %378 : vector<16x256xi1>
    %cst_155 = arith.constant dense<true> : vector<16x256xi1>
    %380 = arith.xori %379, %cst_155 : vector<16x256xi1>
    %381 = arith.select %380, %372, %375 : vector<16x256xi1>, vector<16x256xf32>
    %c255_i32_156 = arith.constant 255 : i32
    %382 = tpu.dynamic_rotate %381 by %c255_i32_156 dim 1 : vector<16x256xf32>, i32 -> vector<16x256xf32>
    %c1_i32_157 = arith.constant 1 : i32
    %383 = tpu.dynamic_rotate %381 by %c1_i32_157 dim 1 : vector<16x256xf32>, i32 -> vector<16x256xf32>
    %384 = arith.select %6, %382, %383 : vector<16x256xi1>, vector<16x256xf32>
    %385 = arith.xori %318, %6 : vector<16x256xi1>
    %cst_158 = arith.constant dense<true> : vector<16x256xi1>
    %386 = arith.xori %385, %cst_158 : vector<16x256xi1>
    %387 = arith.cmpf oge, %381, %384 : vector<16x256xf32>
    %388 = arith.xori %386, %387 : vector<16x256xi1>
    %cst_159 = arith.constant dense<true> : vector<16x256xi1>
    %389 = arith.xori %388, %cst_159 : vector<16x256xi1>
    %390 = arith.select %389, %381, %384 : vector<16x256xi1>, vector<16x256xf32>
    %391 = vector.shape_cast %390 : vector<16x256xf32> to vector<2x8x256xf32>
    %c0_160 = arith.constant 0 : index
    %c0_161 = arith.constant 0 : index
    %392 = vector.load %arg2[%c0_160, %c0_161] : memref<8x256xf32, #tpu.memory_space<vmem>>, vector<8x256xf32>
    %393 = vector.shape_cast %392 : vector<8x256xf32> to vector<1x8x256xf32>
    %394 = vector.broadcast %393 : vector<1x8x256xf32> to vector<2x8x256xf32>
    %395 = arith.mulf %391, %394 : vector<2x8x256xf32>
    %cst_162 = arith.constant dense<0.000000e+00> : vector<2x8xf32>
    %396 = vector.multi_reduction <add>, %395, %cst_162 [2] : vector<2x8x256xf32> to vector<2x8xf32>
    %c0_163 = arith.constant 0 : index
    %c0_164 = arith.constant 0 : index
    %397 = vector.load %arg3[%c0_163, %c0_164] : memref<1x8xf32, #tpu.memory_space<vmem>>, vector<1x8xf32>
    %398 = vector.broadcast %397 : vector<1x8xf32> to vector<2x8xf32>
    %399 = arith.addf %396, %398 : vector<2x8xf32>
    %c0_165 = arith.constant 0 : index
    %c0_166 = arith.constant 0 : index
    %400 = vector.load %arg4[%c0_165, %c0_166] : memref<2x8xf32, #tpu.memory_space<vmem>>, vector<2x8xf32>
    tpu.vector_store %arg4[%c0_165, %c0_166], %399 {strides = array<i32>} : memref<2x8xf32, #tpu.memory_space<vmem>>, vector<2x8xf32>,
    return
  }
  func.func @transform_0(%arg0: i32) -> (i32, i32, i32) {
    %c0_i32 = arith.constant 0 : i32
    %c0_i32_0 = arith.constant 0 : i32
    %c0_i32_1 = arith.constant 0 : i32
    return %arg0, %c0_i32, %c0_i32_0 : i32, i32, i32
  }
  func.func @transform_1(%arg0: i32) -> (i32, i32) {
    %c0_i32 = arith.constant 0 : i32
    %c0_i32_0 = arith.constant 0 : i32
    %c0_i32_1 = arith.constant 0 : i32
    return %c0_i32, %c0_i32_0 : i32, i32
  }
  func.func @transform_2(%arg0: i32) -> (i32, i32) {
    %c0_i32 = arith.constant 0 : i32
    %c0_i32_0 = arith.constant 0 : i32
    %c0_i32_1 = arith.constant 0 : i32
    return %c0_i32, %c0_i32_0 : i32, i32
  }
  func.func @transform_3(%arg0: i32) -> (i32, i32) {
    %c0_i32 = arith.constant 0 : i32
    %c0_i32_0 = arith.constant 0 : i32
    return %arg0, %c0_i32 : i32, i32
  }
}

</mosaic_0001>

<bundles_post_ra>
// kernel: tpu_custom_call.1
= control target key start
LH: loop header
LB: loop body
LE: loop exit
PB: predicated region body
PF: predicated region fallthrough
CT: control target
= control target key end

     0   :  { %8 = vsyncpa [#allocation3], 0  ;;  %s4151_s0 = inlined_call_operand.hbm [shape: f32[2,8,256], index: 0, kind: input, shape index: {}]   ;;  %s4152_s1 = inlined_call_operand.hbm [shape: f32[8,256], index: 1, kind: input, shape index: {}]   ;;  %s4153_s2 = inlined_call_operand.vmem [shape: f32[1,8], index: 2, kind: input, shape index: {}]   ;;  %s4154_s3 = inlined_call_operand.hbm [shape: f32[2,8], index: 3, kind: output, shape index: {}]  }
   0x1   :  { %9 = vsyncpa [#allocation6], 0 }
   0x2   :  { %10 = vsyncpa [#allocation4], 0  ;;  %s15_s14 = sshll.u32 %s4151_s0, 4  ;;  %s1935_s15 = smov [#allocation2]   ;;  %s16_s14 = int_to_ptr.hbm [resolvable:$true] %s15_s14 }
   0x3   :  { %s17_s16 = sshll.u32 %s1935_s15, 4  ;;  %s29_s19 = sshll.u32 %s4152_s1, 4  ;;  %s18_s16 = int_to_ptr.vmem [resolvable:$true] %s17_s16  ;;  %s30_s19 = int_to_ptr.hbm [resolvable:$true] %s29_s19 }
   0x4   :  { %s1936_s20 = smov 256   ;;  %s1937_s21 = smov 16  }
   0x5   :  { %23 = dma.hbm_to_vmem [thread:$0]  %s16_s14, 512, %s18_s16, [#allocation3], %s1936_s20, %s1936_s20, %s1937_s21  }
   0x6   :  { %s1938_s22 = smov [#allocation5]  }
   0x7   :  { %s31_s23 = sshll.u32 %s1938_s22, 4  ;;  %s32_s23 = int_to_ptr.vmem [resolvable:$true] %s31_s23 }
   0x8   :  { %34 = dma.hbm_to_vmem [thread:$0]  %s30_s19, 256, %s32_s23, [#allocation6]  }
   0x9   :  { %1929 = dma.done.wait [#allocation3], 512  }
   0xa   :  { %1930 = vsyncadd [#allocation3], 4294966784 }
   0xb   :  { %1931 = dma.done.wait [#allocation6], 256  }
   0xc   :  { %1932 = vsyncadd [#allocation6], 4294967040  ;;  %v1981_v0 = vld [vmem:[#allocation2 + $0x8] sm:$0xff]  ;;  %v1983_v1 = vld [vmem:[#allocation2] sm:$0xff]  ;;  %s1939_s0 = smov 127   ;;  %s1940_s1 = smov 1   ;;  %v49_v4 = vlaneseq }
   0xd   :  { %88 = vrot.lane.b32.xlu1 %v1981_v0, %s1939_s0  ;;  %84 = vrot.lane.b32.xlu0 %v1983_v1, %s1939_s0  ;;  %v1991_v2 = vld [vmem:[#allocation2 + $0x18] sm:$0xff]  ;;  %v47_v3 = vld [vmem:[#allocation2 + $0x10] sm:$0xff]  ;;  %v4235_v16 = vmov 0  ;;  %v4237_v17 = vmov 0  ;;  %v4239_v18 = vmov 0  ;;  %v4241_v19 = vmov 0 }
   0xe   :  { %97 = vrot.lane.b32.xlu2 %v1983_v1, %s1940_s1  ;;  %v2002_v7 = vand.u32 127, %v49_v4  ;;  %vm1941_vm8 = vmmov 1   ;;  %s1942_s24 = smov 126   ;;  %s1943_s25 = smov 2   ;;  %v4245_v45 = vmov 0  ;;  %v4247_v46 = vmov 0 }
   0xf   :  { %s1944_s26 = smov 124   ;;  %s1945_s27 = smov 4  }
  0x10   :  { %v2005_v9 = vadd.s32 128, %v2002_v7  ;;  %v52_v10 = vand.u32 1, %v2002_v7  ;;  %v56_v11 = vand.u32 2, %v2002_v7  ;;  %vm4156_vm2 = vcmp.lt.s32.totalorder %v2002_v7, 127  ;;  %s1946_s28 = smov 120   ;;  %s1947_s29 = smov 8  }
  0x11   :  { %vm4155_vm5 = vcmp.lt.s32.totalorder %v2002_v7, 1  ;;  %v60_v42 = vand.u32 4, %v2002_v7  ;;  %s1948_s30 = smov 112   ;;  %s1949_s4 = smov 96  }
  0x12   :  { %v53_v14 = vand.u32 1, %v2005_v9  ;;  %v57_v15 = vand.u32 2, %v2005_v9  ;;  %vm2011_vm0 = vcmp.eq.s32.totalorder %v52_v10, 0  ;;  %vm2015_vm1 = vcmp.eq.s32.totalorder %v56_v11, 0  ;;  %s1950_s5 = smov 32   ;;  %s1951_s6 = smov 64  }
  0x13   :  { %v4236_v16 = vsel %vm2011_vm0, 4294967295, %v4235_v16  ;;  %v4238_v17 = vsel %vm2015_vm1, 4294967295, %v4237_v17  ;;  %vm114_vm6 = vmxor %vm2015_vm1, %vm2011_vm0  ;;  %v61_v44 = vand.u32 4, %v2005_v9  ;;  %s1823_s12 = sshll.u32 %s4154_s3, 4  ;;  %s1824_s12 = int_to_ptr.hbm [resolvable:$true] %s1823_s12 }
  0x14   :  { %vm2020_vm3 = vcmp.eq.s32.totalorder %v53_v14, 0  ;;  %vm2024_vm4 = vcmp.eq.s32.totalorder %v57_v15, 0  ;;  %vm116_vm9 = vmxor %vm114_vm6, %vm1941_vm8 }
  0x15   :  { %90 = vrot.lane.b32.xlu1 %v1991_v2, %s1939_s0  ;;  %86 = vrot.lane.b32.xlu0 %v47_v3, %s1939_s0  ;;  %v4240_v18 = vsel %vm2020_vm3, 4294967295, %v4239_v18  ;;  %v4242_v19 = vsel %vm2024_vm4, 4294967295, %v4241_v19  ;;  %vm115_vm7 = vmxor %vm2024_vm4, %vm2020_vm3 }
  0x16   :  { %99 = vrot.lane.b32.xlu2 %v47_v3, %s1940_s1  ;;  %vm2062_vm12 = vmxor %vm115_vm7, %vm1941_vm8 }
  0x1d   :  { %103 = vrot.lane.b32.xlu1 %v1991_v2, %s1940_s1  ;;  %101 = vrot.lane.b32.xlu0 %v1981_v0, %s1940_s1 }
  0x68   :  { %v98_v8 = vpop.permute.xlu2 %97 }
  0x70   :  { %v100_v20 = vpop.permute.xlu2 %99 }
  0x7f   :  { %v89_v5 = vpop.permute.xlu1 %88  ;;  %v85_v6 = vpop.permute.xlu0 %84 }
  0x80   :  { %v93_v21 = vsel %vm4156_vm2, %v85_v6, %v89_v5  ;;  %v95_v22 = vsel %vm4156_vm2, %v89_v5, %v85_v6 }
  0x87   :  { %v91_v12 = vpop.permute.xlu1 %90  ;;  %v87_v13 = vpop.permute.xlu0 %86 }
  0x88   :  { %v94_v23 = vsel %vm4156_vm2, %v87_v13, %v91_v12  ;;  %v96_v33 = vsel %vm4156_vm2, %v91_v12, %v87_v13 }
  0x8f   :  { %v104_v24 = vpop.permute.xlu1 %103  ;;  %v102_v25 = vpop.permute.xlu0 %101 }
  0x90   :  { %v107_v26 = vsel %vm4155_vm5, %v100_v20, %v104_v24  ;;  %v109_v27 = vsel %vm4155_vm5, %v104_v24, %v100_v20  ;;  %v106_v28 = vsel %vm4155_vm5, %v98_v8, %v102_v25  ;;  %v108_v29 = vsel %vm4155_vm5, %v102_v25, %v98_v8 }
  0x91   :  { %v112_v30 = vsel %vm2011_vm0, %v94_v23, %v109_v27  ;;  %v110_v31 = vsel %vm2011_vm0, %v93_v21, %v108_v29  ;;  %v111_v32 = vsel %vm2020_vm3, %v95_v22, %v106_v28  ;;  %v113_v35 = vsel %vm2020_vm3, %v96_v33, %v107_v26 }
  0x92   :  { %vm120_vm10 = vcmp.ge.f32.partialorder %v47_v3, %v112_v30  ;;  %vm118_vm11 = vcmp.ge.f32.partialorder %v1983_v1, %v110_v31  ;;  %vm119_vm15 = vcmp.ge.f32.partialorder %v1981_v0, %v111_v32  ;;  %vm121_vm5 = vcmp.ge.f32.partialorder %v1991_v2, %v113_v35 }
  0x93   :  { %vm124_vm13 = vmxor %vm116_vm9, %vm120_vm10 }
  0x94   :  { %vm128_vm14 = vmxor %vm124_vm13, %vm1941_vm8 }
  0x95   :  { %v2070_v36 = vsel %vm128_vm14, %v47_v3, %v112_v30  ;;  %vm122_vm6 = vmxor %vm116_vm9, %vm118_vm11  ;;  %vm4158_vm14 = vcmp.lt.s32.totalorder %v2002_v7, 126 }
  0x96   :  { %136 = vrot.lane.b32.xlu0 %v2070_v36, %s1942_s24  ;;  %vm126_vm7 = vmxor %vm122_vm6, %vm1941_vm8 }
  0x97   :  { %v130_v37 = vsel %vm126_vm7, %v1983_v1, %v110_v31  ;;  %vm123_vm10 = vmxor %vm2062_vm12, %vm119_vm15  ;;  %vm4157_vm15 = vcmp.lt.s32.totalorder %v2002_v7, 2 }
  0x98   :  { %134 = vrot.lane.b32.xlu2 %v130_v37, %s1942_s24  ;;  %vm127_vm13 = vmxor %vm123_vm10, %vm1941_vm8 }
  0x99   :  { %v131_v38 = vsel %vm127_vm13, %v1981_v0, %v111_v32  ;;  %vm125_vm9 = vmxor %vm2062_vm12, %vm121_vm5  ;;  %vm2095_vm5 = vcmp.eq.s32.totalorder %v60_v42, 0  ;;  %vm2099_vm12 = vcmp.eq.s32.totalorder %v61_v44, 0  ;;  %v4268_v44 = vmov 0 }
  0x9a   :  { %138 = vrot.lane.b32.xlu1 %v131_v38, %s1942_s24  ;;  %vm129_vm11 = vmxor %vm125_vm9, %vm1941_vm8  ;;  %v4246_v45 = vsel %vm2095_vm5, 4294967295, %v4245_v45  ;;  %v4248_v46 = vsel %vm2099_vm12, 4294967295, %v4247_v46 }
  0x9b   :  { %v133_v39 = vsel %vm129_vm11, %v1991_v2, %v113_v35  ;;  %vm164_vm6 = vmxor %vm2095_vm5, %vm2015_vm1 }
  0x9c   :  { %vm165_vm7 = vmxor %vm2099_vm12, %vm2024_vm4 }
  0x9d   :  { %vm2122_vm10 = vmxor %vm164_vm6, %vm1941_vm8 }
  0x9e   :  { %147 = vrot.lane.b32.xlu0 %v130_v37, %s1943_s25  ;;  %vm2131_vm9 = vmxor %vm165_vm7, %vm1941_vm8  ;;  %vm4253_vm7 = vcmp.lt.s32.totalorder %v2002_v7, 126 }
  0xa0   :  { %140 = vrot.lane.b32.xlu2 %v133_v39, %s1942_s24 }
  0xa2   :  { %149 = vrot.lane.b32.xlu1 %v2070_v36, %s1943_s25 }
  0xa6   :  { %153 = vrot.lane.b32.xlu0 %v133_v39, %s1943_s25 }
  0xa8   :  { %151 = vrot.lane.b32.xlu2 %v131_v38, %s1943_s25 }
  0xf2   :  { %v135_v40 = vpop.permute.xlu2 %134 }
  0xfa   :  { %v141_v41 = vpop.permute.xlu2 %140 }
 0x102   :  { %v152_v48 = vpop.permute.xlu2 %151 }
 0x108   :  { %v137_v43 = vpop.permute.xlu0 %136 }
 0x109   :  { %v144_v62 = vsel %vm4253_vm7, %v137_v43, %v141_v41 }
 0x10c   :  { %v139_v47 = vpop.permute.xlu1 %138 }
 0x10d   :  { %v143_v50 = vsel %vm4158_vm14, %v135_v40, %v139_v47  ;;  %v145_v51 = vsel %vm4158_vm14, %v139_v47, %v135_v40 }
 0x110   :  { %v148_v49 = vpop.permute.xlu0 %147 }
 0x111   :  { %v156_v52 = vsel %vm4157_vm15, %v148_v49, %v152_v48  ;;  %v158_v53 = vsel %vm4157_vm15, %v152_v48, %v148_v49 }
 0x112   :  { %v160_v55 = vsel %vm2015_vm1, %v143_v50, %v158_v53  ;;  %v161_v56 = vsel %vm2024_vm4, %v145_v51, %v156_v52  ;;  %v65_v53 = vand.u32 8, %v2005_v9 }
 0x113   :  { %vm168_vm13 = vcmp.ge.f32.partialorder %v130_v37, %v160_v55  ;;  %vm169_vm11 = vcmp.ge.f32.partialorder %v131_v38, %v161_v56 }
 0x114   :  { %vm172_vm2 = vmxor %vm2122_vm10, %vm168_vm13  ;;  %v150_v59 = vpop.permute.xlu1 %149 }
 0x115   :  { %vm176_vm6 = vmxor %vm172_vm2, %vm1941_vm8  ;;  %vm4255_vm2 = vcmp.lt.s32.totalorder %v2002_v7, 2 }
 0x116   :  { %v2138_v58 = vsel %vm176_vm6, %v130_v37, %v160_v55  ;;  %vm173_vm15 = vmxor %vm2131_vm9, %vm169_vm11  ;;  %v4272_v55 = vmov 0 }
 0x117   :  { %184 = vrot.lane.b32.xlu1 %v2138_v58, %s1939_s0  ;;  %vm177_vm14 = vmxor %vm173_vm15, %vm1941_vm8 }
 0x118   :  { %v181_v60 = vsel %vm177_vm14, %v131_v38, %v161_v56  ;;  %v154_v61 = vpop.permute.xlu0 %153  ;;  %vm4254_vm13 = vmmov %vm4253_vm7 }
 0x119   :  { %v146_v63 = vsel %vm4254_vm13, %v141_v41, %v137_v43  ;;  %188 = vrot.lane.b32.xlu0 %v181_v60, %s1939_s0  ;;  %v157_v0 = vsel %vm4255_vm2, %v150_v59, %v154_v61  ;;  %vm4256_vm11 = vmmov %vm4255_vm2  ;;  %v64_v41 = vand.u32 8, %v2002_v7 }
 0x11a   :  { %v159_v1 = vsel %vm4256_vm11, %v154_v61, %v150_v59  ;;  %v163_v3 = vsel %vm2024_vm4, %v146_v63, %v157_v0  ;;  %vm4258_vm11 = vcmp.lt.s32.totalorder %v2002_v7, 1 }
 0x11b   :  { %v162_v2 = vsel %vm2015_vm1, %v144_v62, %v159_v1  ;;  %vm171_vm15 = vcmp.ge.f32.partialorder %v133_v39, %v163_v3 }
 0x11c   :  { %vm170_vm14 = vcmp.ge.f32.partialorder %v2070_v36, %v162_v2  ;;  %vm175_vm13 = vmxor %vm2131_vm9, %vm171_vm15  ;;  %vm4257_vm9 = vcmp.lt.s32.totalorder %v2002_v7, 127 }
 0x11d   :  { %vm174_vm6 = vmxor %vm2122_vm10, %vm170_vm14 }
 0x11e   :  { %vm178_vm7 = vmxor %vm174_vm6, %vm1941_vm8 }
 0x11f   :  { %v182_v5 = vsel %vm178_vm7, %v2070_v36, %v162_v2  ;;  %vm179_vm2 = vmxor %vm175_vm13, %vm1941_vm8 }
 0x120   :  { %186 = vrot.lane.b32.xlu2 %v182_v5, %s1939_s0  ;;  %v183_v6 = vsel %vm179_vm2, %v133_v39, %v163_v3  ;;  %vm212_vm10 = vmxor %vm2095_vm5, %vm2011_vm0 }
 0x121   :  { %198 = vrot.lane.b32.xlu0 %v182_v5, %s1940_s1  ;;  %190 = vrot.lane.b32.xlu1 %v183_v6, %s1939_s0  ;;  %vm2182_vm14 = vmxor %vm212_vm10, %vm1941_vm8 }
 0x122   :  { %vm4261_vm13 = vmmov %vm4257_vm9 }
 0x123   :  { %vm4262_vm2 = vmmov %vm4257_vm9 }
 0x124   :  { %vm213_vm10 = vmxor %vm2099_vm12, %vm2020_vm3 }
 0x128   :  { %196 = vrot.lane.b32.xlu2 %v2138_v58, %s1940_s1 }
 0x129   :  { %200 = vrot.lane.b32.xlu1 %v181_v60, %s1940_s1 }
 0x130   :  { %202 = vrot.lane.b32.xlu2 %v183_v6, %s1940_s1 }
 0x17a   :  { %v187_v8 = vpop.permute.xlu2 %186 }
 0x182   :  { %v197_v10 = vpop.permute.xlu2 %196 }
 0x189   :  { %v185_v11 = vpop.permute.xlu1 %184 }
 0x18a   :  { %v203_v13 = vpop.permute.xlu2 %202 }
 0x18b   :  { %v189_v12 = vpop.permute.xlu0 %188 }
 0x18c   :  { %v192_v25 = vsel %vm4261_vm13, %v185_v11, %v189_v12  ;;  %v194_v26 = vsel %vm4262_vm2, %v189_v12, %v185_v11 }
 0x193   :  { %v191_v14 = vpop.permute.xlu1 %190  ;;  %v199_v15 = vpop.permute.xlu0 %198 }
 0x194   :  { %v193_v20 = vsel %vm4257_vm9, %v187_v8, %v191_v14  ;;  %v207_v21 = vsel %vm4258_vm11, %v203_v13, %v199_v15  ;;  %vm4263_vm9 = vmmov %vm4262_vm2  ;;  %v205_v29 = vsel %vm4258_vm11, %v199_v15, %v203_v13 }
 0x195   :  { %v210_v23 = vsel %vm2011_vm0, %v193_v20, %v207_v21  ;;  %v195_v28 = vsel %vm4263_vm9, %v191_v14, %v187_v8 }
 0x196   :  { %vm218_vm15 = vcmp.ge.f32.partialorder %v182_v5, %v210_v23  ;;  %v211_v35 = vsel %vm2020_vm3, %v195_v28, %v205_v29 }
 0x197   :  { %vm222_vm6 = vmxor %vm2182_vm14, %vm218_vm15 }
 0x198   :  { %vm226_vm7 = vmxor %vm222_vm6, %vm1941_vm8 }
 0x199   :  { %v230_v24 = vsel %vm226_vm7, %v182_v5, %v210_v23  ;;  %vm4264_vm15 = vmmov %vm4258_vm11 }
 0x19a   :  { %234 = vrot.lane.b32.xlu1 %v230_v24, %s1944_s26  ;;  %vm4265_vm6 = vmmov %vm4258_vm11 }
 0x19b   :  { %v201_v27 = vpop.permute.xlu1 %200  ;;  %vm2213_vm7 = vmxor %vm213_vm10, %vm1941_vm8 }
 0x19c   :  { %v204_v30 = vsel %vm4264_vm15, %v197_v10, %v201_v27  ;;  %v206_v31 = vsel %vm4265_vm6, %v201_v27, %v197_v10  ;;  %vm219_vm6 = vcmp.ge.f32.partialorder %v183_v6, %v211_v35 }
 0x19d   :  { %v209_v32 = vsel %vm2020_vm3, %v194_v26, %v204_v30  ;;  %v208_v33 = vsel %vm2011_vm0, %v192_v25, %v206_v31  ;;  %v4302_v26 = vmov 0 }
 0x19e   :  { %vm217_vm13 = vcmp.ge.f32.partialorder %v181_v60, %v209_v32  ;;  %vm216_vm2 = vcmp.ge.f32.partialorder %v2138_v58, %v208_v33 }
 0x19f   :  { %vm221_vm9 = vmxor %vm2213_vm7, %vm217_vm13 }
 0x1a0   :  { %vm225_vm11 = vmxor %vm221_vm9, %vm1941_vm8 }
 0x1a1   :  { %v229_v36 = vsel %vm225_vm11, %v181_v60, %v209_v32  ;;  %vm220_vm15 = vmxor %vm2182_vm14, %vm216_vm2  ;;  %vm2238_vm14 = vcmp.eq.s32.totalorder %v64_v41, 0  ;;  %vm4159_vm11 = vcmp.lt.s32.totalorder %v2002_v7, 124 }
 0x1a2   :  { %236 = vrot.lane.b32.xlu2 %v229_v36, %s1944_s26  ;;  %vm224_vm10 = vmxor %vm220_vm15, %vm1941_vm8  ;;  %v4269_v44 = vsel %vm2238_vm14, 4294967295, %v4268_v44 }
 0x1a3   :  { %v228_v37 = vsel %vm224_vm10, %v2138_v58, %v208_v33  ;;  %vm223_vm13 = vmxor %vm2213_vm7, %vm219_vm6  ;;  %vm4164_vm7 = vcmp.lt.s32.totalorder %v2002_v7, 4 }
 0x1a4   :  { %232 = vrot.lane.b32.xlu0 %v228_v37, %s1944_s26  ;;  %245 = vrot.lane.b32.xlu1 %v228_v37, %s1945_s27  ;;  %vm227_vm9 = vmxor %vm223_vm13, %vm1941_vm8 }
 0x1a5   :  { %v231_v38 = vsel %vm227_vm9, %v183_v6, %v211_v35  ;;  %vm262_vm2 = vmxor %vm2238_vm14, %vm2095_vm5  ;;  %vm2263_vm9 = vcmp.eq.s32.totalorder %v65_v53, 0 }
 0x1a6   :  { %vm2253_vm15 = vmxor %vm262_vm2, %vm1941_vm8  ;;  %v4273_v55 = vsel %vm2263_vm9, 4294967295, %v4272_v55 }
 0x1a7   :  { %vm263_vm2 = vmxor %vm2263_vm9, %vm2099_vm12 }
 0x1aa   :  { %247 = vrot.lane.b32.xlu2 %v230_v24, %s1945_s27 }
 0x1ac   :  { %251 = vrot.lane.b32.xlu1 %v231_v38, %s1945_s27  ;;  %238 = vrot.lane.b32.xlu0 %v231_v38, %s1944_s26 }
 0x1b4   :  { %249 = vrot.lane.b32.xlu0 %v229_v36, %s1945_s27 }
 0x1fc   :  { %v237_v40 = vpop.permute.xlu2 %236 }
 0x204   :  { %v248_v47 = vpop.permute.xlu2 %247 }
 0x20c   :  { %v235_v39 = vpop.permute.xlu1 %234 }
 0x216   :  { %v246_v42 = vpop.permute.xlu1 %245  ;;  %v233_v43 = vpop.permute.xlu0 %232 }
 0x217   :  { %v241_v60 = vsel %vm4159_vm11, %v233_v43, %v237_v40  ;;  %v243_v61 = vsel %vm4159_vm11, %v237_v40, %v233_v43 }
 0x21e   :  { %v252_v48 = vpop.permute.xlu1 %251  ;;  %v239_v49 = vpop.permute.xlu0 %238 }
 0x21f   :  { %v257_v50 = vsel %vm4164_vm7, %v252_v48, %v248_v47  ;;  %v242_v51 = vsel %vm4159_vm11, %v235_v39, %v239_v49  ;;  %v255_v57 = vsel %vm4164_vm7, %v248_v47, %v252_v48  ;;  %v244_v58 = vsel %vm4159_vm11, %v239_v49, %v235_v39 }
 0x220   :  { %v260_v54 = vsel %vm2095_vm5, %v242_v51, %v257_v50  ;;  %v261_v2 = vsel %vm2099_vm12, %v244_v58, %v255_v57 }
 0x221   :  { %vm268_vm10 = vcmp.ge.f32.partialorder %v230_v24, %v260_v54  ;;  %vm269_vm0 = vcmp.ge.f32.partialorder %v231_v38, %v261_v2 }
 0x222   :  { %vm272_vm6 = vmxor %vm2253_vm15, %vm268_vm10 }
 0x223   :  { %vm276_vm13 = vmxor %vm272_vm6, %vm1941_vm8 }
 0x224   :  { %v2267_v56 = vsel %vm276_vm13, %v230_v24, %v260_v54  ;;  %vm265_vm6 = vmxor %vm263_vm2, %vm1941_vm8 }
 0x225   :  { %284 = vrot.lane.b32.xlu0 %v2267_v56, %s1942_s24 }
 0x226   :  { %v250_v59 = vpop.permute.xlu0 %249 }
 0x227   :  { %v254_v62 = vsel %vm4164_vm7, %v246_v42, %v250_v59  ;;  %v256_v63 = vsel %vm4164_vm7, %v250_v59, %v246_v42 }
 0x228   :  { %v258_v0 = vsel %vm2095_vm5, %v241_v60, %v256_v63  ;;  %v259_v1 = vsel %vm2099_vm12, %v243_v61, %v254_v62  ;;  %vm273_vm12 = vmxor %vm265_vm6, %vm269_vm0 }
 0x229   :  { %vm266_vm10 = vcmp.ge.f32.partialorder %v228_v37, %v258_v0  ;;  %vm267_vm13 = vcmp.ge.f32.partialorder %v229_v36, %v259_v1  ;;  %vm277_vm2 = vmxor %vm273_vm12, %vm1941_vm8 }
 0x22a   :  { %vm270_vm11 = vmxor %vm2253_vm15, %vm266_vm10  ;;  %v281_v6 = vsel %vm277_vm2, %v231_v38, %v261_v2 }
 0x22b   :  { %vm274_vm3 = vmxor %vm270_vm11, %vm1941_vm8 }
 0x22c   :  { %v278_v3 = vsel %vm274_vm3, %v228_v37, %v258_v0  ;;  %vm271_vm7 = vmxor %vm265_vm6, %vm267_vm13  ;;  %vm4274_vm3 = vcmp.lt.s32.totalorder %v2002_v7, 2 }
 0x22d   :  { %294 = vrot.lane.b32.xlu0 %v278_v3, %s1943_s25  ;;  %282 = vrot.lane.b32.xlu2 %v278_v3, %s1942_s24  ;;  %vm275_vm5 = vmxor %vm271_vm7, %vm1941_vm8  ;;  %vm4276_vm7 = vcmp.lt.s32.totalorder %v2002_v7, 126 }
 0x22e   :  { %v279_v5 = vsel %vm275_vm5, %v229_v36, %v259_v1  ;;  %vm310_vm0 = vmxor %vm2238_vm14, %vm2015_vm1 }
 0x22f   :  { %286 = vrot.lane.b32.xlu1 %v279_v5, %s1942_s24  ;;  %vm4275_vm5 = vmmov %vm4274_vm3 }
 0x230   :  { %vm311_vm12 = vmxor %vm2263_vm9, %vm2024_vm4 }
 0x231   :  { %vm4277_vm11 = vmmov %vm4276_vm7 }
 0x232   :  { %vm2324_vm15 = vmxor %vm310_vm0, %vm1941_vm8 }
 0x233   :  { %vm2333_vm6 = vmxor %vm311_vm12, %vm1941_vm8 }
 0x234   :  { %vm4282_vm12 = vmmov %vm4276_vm7 }
 0x235   :  { %300 = vrot.lane.b32.xlu0 %v281_v6, %s1943_s25  ;;  %288 = vrot.lane.b32.xlu2 %v281_v6, %s1942_s24 }
 0x237   :  { %296 = vrot.lane.b32.xlu1 %v2267_v56, %s1943_s25 }
 0x23d   :  { %298 = vrot.lane.b32.xlu2 %v279_v5, %s1943_s25 }
 0x287   :  { %v283_v8 = vpop.permute.xlu2 %282 }
 0x28f   :  { %v289_v10 = vpop.permute.xlu2 %288 }
 0x297   :  { %v285_v11 = vpop.permute.xlu0 %284  ;;  %v299_v12 = vpop.permute.xlu2 %298 }
 0x298   :  { %v291_v31 = vsel %vm4282_vm12, %v285_v11, %v289_v10  ;;  %v293_v32 = vsel %vm4276_vm7, %v289_v10, %v285_v11  ;;  %v68_v10 = vand.u32 16, %v2002_v7 }
 0x29f   :  { %v295_v13 = vpop.permute.xlu0 %294 }
 0x2a0   :  { %v302_v14 = vsel %vm4274_vm3, %v295_v13, %v299_v12  ;;  %v304_v15 = vsel %vm4275_vm5, %v299_v12, %v295_v13  ;;  %v4298_v13 = vmov 0 }
 0x2a1   :  { %v287_v20 = vpop.permute.xlu1 %286 }
 0x2a2   :  { %v290_v21 = vsel %vm4276_vm7, %v283_v8, %v287_v20  ;;  %v292_v22 = vsel %vm4277_vm11, %v287_v20, %v283_v8  ;;  %vm4283_vm11 = vcmp.lt.s32.totalorder %v2002_v7, 2  ;;  %vm4286_vm7 = vcmp.lt.s32.totalorder %v2002_v7, 127 }
 0x2a3   :  { %v306_v24 = vsel %vm2015_vm1, %v290_v21, %v304_v15  ;;  %v307_v25 = vsel %vm2024_vm4, %v292_v22, %v302_v14 }
 0x2a4   :  { %vm314_vm10 = vcmp.ge.f32.partialorder %v278_v3, %v306_v24  ;;  %vm315_vm13 = vcmp.ge.f32.partialorder %v279_v5, %v307_v25 }
 0x2a5   :  { %vm318_vm2 = vmxor %vm2324_vm15, %vm314_vm10 }
 0x2a6   :  { %vm322_vm0 = vmxor %vm318_vm2, %vm1941_vm8 }
 0x2a7   :  { %v2340_v27 = vsel %vm322_vm0, %v278_v3, %v306_v24  ;;  %vm319_vm3 = vmxor %vm2333_vm6, %vm315_vm13  ;;  %v301_v28 = vpop.permute.xlu0 %300  ;;  %v69_v24 = vand.u32 16, %v2005_v9 }
 0x2a8   :  { %330 = vrot.lane.b32.xlu1 %v2340_v27, %s1939_s0  ;;  %vm323_vm5 = vmxor %vm319_vm3, %vm1941_vm8 }
 0x2a9   :  { %v327_v29 = vsel %vm323_vm5, %v279_v5, %v307_v25  ;;  %v297_v30 = vpop.permute.xlu1 %296  ;;  %vm4284_vm10 = vmmov %vm4283_vm11 }
 0x2aa   :  { %334 = vrot.lane.b32.xlu0 %v327_v29, %s1939_s0  ;;  %v303_v33 = vsel %vm4283_vm11, %v297_v30, %v301_v28  ;;  %v305_v34 = vsel %vm4284_vm10, %v301_v28, %v297_v30  ;;  %vm4287_vm11 = vcmp.lt.s32.totalorder %v2002_v7, 1 }
 0x2ab   :  { %v308_v35 = vsel %vm2015_vm1, %v291_v31, %v305_v34  ;;  %v309_v36 = vsel %vm2024_vm4, %v293_v32, %v303_v33 }
 0x2ac   :  { %vm316_vm13 = vcmp.ge.f32.partialorder %v2267_v56, %v308_v35  ;;  %vm317_vm2 = vcmp.ge.f32.partialorder %v281_v6, %v309_v36 }
 0x2ad   :  { %vm320_vm0 = vmxor %vm2324_vm15, %vm316_vm13  ;;  %vm4285_vm15 = vnez %v4236_v16 }
 0x2ae   :  { %vm324_vm3 = vmxor %vm320_vm0, %vm1941_vm8 }
 0x2af   :  { %v328_v37 = vsel %vm324_vm3, %v2267_v56, %v308_v35  ;;  %vm321_vm5 = vmxor %vm2333_vm6, %vm317_vm2 }
 0x2b0   :  { %332 = vrot.lane.b32.xlu2 %v328_v37, %s1939_s0  ;;  %vm325_vm12 = vmxor %vm321_vm5, %vm1941_vm8 }
 0x2b1   :  { %v329_v38 = vsel %vm325_vm12, %v281_v6, %v309_v36  ;;  %vm358_vm6 = vmxor %vm2238_vm14, %vm4285_vm15  ;;  %vm4292_vm12 = vnez %v4240_v18 }
 0x2b2   :  { %344 = vrot.lane.b32.xlu0 %v328_v37, %s1940_s1  ;;  %336 = vrot.lane.b32.xlu1 %v329_v38, %s1939_s0  ;;  %vm2384_vm10 = vmxor %vm358_vm6, %vm1941_vm8 }
 0x2b3   :  { %vm4290_vm3 = vmmov %vm4286_vm7 }
 0x2b4   :  { %vm4291_vm5 = vmmov %vm4290_vm3 }
 0x2b5   :  { %vm359_vm6 = vmxor %vm2263_vm9, %vm4292_vm12 }
 0x2b8   :  { %342 = vrot.lane.b32.xlu2 %v2340_v27, %s1940_s1 }
 0x2ba   :  { %346 = vrot.lane.b32.xlu1 %v327_v29, %s1940_s1 }
 0x2c0   :  { %348 = vrot.lane.b32.xlu2 %v329_v38, %s1940_s1 }
 0x30a   :  { %v333_v39 = vpop.permute.xlu2 %332 }
 0x312   :  { %v343_v40 = vpop.permute.xlu2 %342 }
 0x31a   :  { %v331_v41 = vpop.permute.xlu1 %330  ;;  %v349_v43 = vpop.permute.xlu2 %348 }
 0x31c   :  { %v335_v42 = vpop.permute.xlu0 %334 }
 0x31d   :  { %v338_v54 = vsel %vm4290_vm3, %v331_v41, %v335_v42  ;;  %v340_v56 = vsel %vm4291_vm5, %v335_v42, %v331_v41 }
 0x324   :  { %v337_v47 = vpop.permute.xlu1 %336  ;;  %v345_v48 = vpop.permute.xlu0 %344 }
 0x325   :  { %v339_v49 = vsel %vm4286_vm7, %v333_v39, %v337_v47  ;;  %v353_v50 = vsel %vm4287_vm11, %v349_v43, %v345_v48  ;;  %vm4293_vm7 = vmmov %vm4290_vm3  ;;  %v351_v59 = vsel %vm4287_vm11, %v345_v48, %v349_v43 }
 0x326   :  { %v356_v52 = vsel %vm4285_vm15, %v339_v49, %v353_v50  ;;  %v341_v58 = vsel %vm4293_vm7, %v337_v47, %v333_v39 }
 0x327   :  { %vm364_vm13 = vcmp.ge.f32.partialorder %v328_v37, %v356_v52  ;;  %v357_v1 = vsel %vm4292_vm12, %v341_v58, %v351_v59 }
 0x328   :  { %vm368_vm2 = vmxor %vm2384_vm10, %vm364_vm13 }
 0x329   :  { %vm372_vm0 = vmxor %vm368_vm2, %vm1941_vm8 }
 0x32a   :  { %v376_v53 = vsel %vm372_vm0, %v328_v37, %v356_v52  ;;  %vm4294_vm13 = vmmov %vm4287_vm11 }
 0x32b   :  { %380 = vrot.lane.b32.xlu1 %v376_v53, %s1946_s28  ;;  %vm4295_vm2 = vmmov %vm4287_vm11 }
 0x32c   :  { %v347_v57 = vpop.permute.xlu1 %346  ;;  %vm2415_vm0 = vmxor %vm359_vm6, %vm1941_vm8 }
 0x32d   :  { %v350_v60 = vsel %vm4294_vm13, %v343_v40, %v347_v57  ;;  %v352_v61 = vsel %vm4295_vm2, %v347_v57, %v343_v40  ;;  %vm365_vm2 = vcmp.ge.f32.partialorder %v329_v38, %v357_v1 }
 0x32e   :  { %v355_v62 = vsel %vm4292_vm12, %v340_v56, %v350_v60  ;;  %v354_v63 = vsel %vm4285_vm15, %v338_v54, %v352_v61 }
 0x32f   :  { %vm363_vm3 = vcmp.ge.f32.partialorder %v327_v29, %v355_v62  ;;  %vm362_vm5 = vcmp.ge.f32.partialorder %v2340_v27, %v354_v63 }
 0x330   :  { %vm367_vm7 = vmxor %vm2415_vm0, %vm363_vm3 }
 0x331   :  { %vm371_vm11 = vmxor %vm367_vm7, %vm1941_vm8 }
 0x332   :  { %v375_v2 = vsel %vm371_vm11, %v327_v29, %v355_v62  ;;  %vm366_vm13 = vmxor %vm2384_vm10, %vm362_vm5  ;;  %vm2440_vm10 = vcmp.eq.s32.totalorder %v68_v10, 0  ;;  %vm4169_vm11 = vcmp.lt.s32.totalorder %v2002_v7, 120 }
 0x333   :  { %382 = vrot.lane.b32.xlu2 %v375_v2, %s1946_s28  ;;  %vm370_vm6 = vmxor %vm366_vm13, %vm1941_vm8  ;;  %v4299_v13 = vsel %vm2440_vm10, 4294967295, %v4298_v13 }
 0x334   :  { %v374_v3 = vsel %vm370_vm6, %v2340_v27, %v354_v63  ;;  %vm369_vm3 = vmxor %vm2415_vm0, %vm365_vm2  ;;  %vm4172_vm0 = vcmp.lt.s32.totalorder %v2002_v7, 8 }
 0x335   :  { %378 = vrot.lane.b32.xlu0 %v374_v3, %s1946_s28  ;;  %391 = vrot.lane.b32.xlu1 %v374_v3, %s1947_s29  ;;  %vm373_vm7 = vmxor %vm369_vm3, %vm1941_vm8 }
 0x336   :  { %v377_v5 = vsel %vm373_vm7, %v329_v38, %v357_v1  ;;  %vm408_vm5 = vmxor %vm2440_vm10, %vm2238_vm14  ;;  %vm2465_vm7 = vcmp.eq.s32.totalorder %v69_v24, 0 }
 0x337   :  { %vm2455_vm13 = vmxor %vm408_vm5, %vm1941_vm8  ;;  %v4303_v26 = vsel %vm2465_vm7, 4294967295, %v4302_v26 }
 0x338   :  { %vm409_vm5 = vmxor %vm2465_vm7, %vm2263_vm9 }
 0x33b   :  { %393 = vrot.lane.b32.xlu2 %v376_v53, %s1947_s29 }
 0x33d   :  { %397 = vrot.lane.b32.xlu1 %v377_v5, %s1947_s29  ;;  %384 = vrot.lane.b32.xlu0 %v377_v5, %s1946_s28 }
 0x345   :  { %395 = vrot.lane.b32.xlu0 %v375_v2, %s1947_s29 }
 0x38d   :  { %v383_v8 = vpop.permute.xlu2 %382 }
 0x395   :  { %v394_v14 = vpop.permute.xlu2 %393 }
 0x39d   :  { %v381_v6 = vpop.permute.xlu1 %380 }
 0x3a7   :  { %v392_v11 = vpop.permute.xlu1 %391  ;;  %v379_v12 = vpop.permute.xlu0 %378 }
 0x3a8   :  { %v387_v31 = vsel %vm4169_vm11, %v379_v12, %v383_v8  ;;  %v389_v32 = vsel %vm4169_vm11, %v383_v8, %v379_v12 }
 0x3af   :  { %v398_v15 = vpop.permute.xlu1 %397  ;;  %v385_v20 = vpop.permute.xlu0 %384 }
 0x3b0   :  { %v403_v21 = vsel %vm4172_vm0, %v398_v15, %v394_v14  ;;  %v388_v22 = vsel %vm4169_vm11, %v381_v6, %v385_v20  ;;  %v401_v28 = vsel %vm4172_vm0, %v394_v14, %v398_v15  ;;  %v390_v29 = vsel %vm4169_vm11, %v385_v20, %v381_v6 }
 0x3b1   :  { %v406_v25 = vsel %vm2238_vm14, %v388_v22, %v403_v21  ;;  %v407_v37 = vsel %vm2263_vm9, %v390_v29, %v401_v28 }
 0x3b2   :  { %vm414_vm6 = vcmp.ge.f32.partialorder %v376_v53, %v406_v25  ;;  %vm415_vm15 = vcmp.ge.f32.partialorder %v377_v5, %v407_v37 }
 0x3b3   :  { %vm418_vm2 = vmxor %vm2455_vm13, %vm414_vm6 }
 0x3b4   :  { %vm422_vm3 = vmxor %vm418_vm2, %vm1941_vm8 }
 0x3b5   :  { %v2469_v27 = vsel %vm422_vm3, %v376_v53, %v406_v25  ;;  %vm411_vm2 = vmxor %vm409_vm5, %vm1941_vm8 }
 0x3b6   :  { %430 = vrot.lane.b32.xlu0 %v2469_v27, %s1944_s26 }
 0x3b7   :  { %v396_v30 = vpop.permute.xlu0 %395 }
 0x3b8   :  { %v400_v33 = vsel %vm4172_vm0, %v392_v11, %v396_v30  ;;  %v402_v34 = vsel %vm4172_vm0, %v396_v30, %v392_v11 }
 0x3b9   :  { %v404_v35 = vsel %vm2238_vm14, %v387_v31, %v402_v34  ;;  %v405_v36 = vsel %vm2263_vm9, %v389_v32, %v400_v33  ;;  %vm419_vm9 = vmxor %vm411_vm2, %vm415_vm15  ;;  %vm4305_vm15 = vcmp.lt.s32.totalorder %v2002_v7, 4 }
 0x3ba   :  { %vm412_vm6 = vcmp.ge.f32.partialorder %v374_v3, %v404_v35  ;;  %vm413_vm3 = vcmp.ge.f32.partialorder %v375_v2, %v405_v36  ;;  %vm423_vm5 = vmxor %vm419_vm9, %vm1941_vm8 }
 0x3bb   :  { %vm416_vm11 = vmxor %vm2455_vm13, %vm412_vm6  ;;  %v427_v40 = vsel %vm423_vm5, %v377_v5, %v407_v37  ;;  %vm4308_vm13 = vcmp.lt.s32.totalorder %v2002_v7, 124 }
 0x3bc   :  { %vm420_vm12 = vmxor %vm416_vm11, %vm1941_vm8 }
 0x3bd   :  { %v424_v38 = vsel %vm420_vm12, %v374_v3, %v404_v35  ;;  %vm417_vm0 = vmxor %vm411_vm2, %vm413_vm3 }
 0x3be   :  { %440 = vrot.lane.b32.xlu0 %v424_v38, %s1945_s27  ;;  %428 = vrot.lane.b32.xlu2 %v424_v38, %s1944_s26  ;;  %vm421_vm14 = vmxor %vm417_vm0, %vm1941_vm8  ;;  %vm4307_vm0 = vnez %v4248_v46 }
 0x3bf   :  { %v425_v39 = vsel %vm421_vm14, %v375_v2, %v405_v36  ;;  %vm4304_vm14 = vnez %v4246_v45  ;;  %vm4306_vm12 = vmmov %vm4305_vm15 }
 0x3c0   :  { %432 = vrot.lane.b32.xlu1 %v425_v39, %s1944_s26  ;;  %vm456_vm9 = vmxor %vm2440_vm10, %vm4304_vm14 }
 0x3c1   :  { %vm457_vm11 = vmxor %vm2465_vm7, %vm4307_vm0 }
 0x3c2   :  { %vm4309_vm6 = vmmov %vm4308_vm13 }
 0x3c3   :  { %vm2526_vm2 = vmxor %vm456_vm9, %vm1941_vm8 }
 0x3c4   :  { %vm2535_vm5 = vmxor %vm457_vm11, %vm1941_vm8 }
 0x3c6   :  { %446 = vrot.lane.b32.xlu0 %v427_v40, %s1945_s27  ;;  %434 = vrot.lane.b32.xlu2 %v427_v40, %s1944_s26 }
 0x3c8   :  { %442 = vrot.lane.b32.xlu1 %v2469_v27, %s1945_s27 }
 0x3ce   :  { %444 = vrot.lane.b32.xlu2 %v425_v39, %s1945_s27 }
 0x418   :  { %v429_v41 = vpop.permute.xlu2 %428 }
 0x420   :  { %v435_v42 = vpop.permute.xlu2 %434 }
 0x428   :  { %v431_v43 = vpop.permute.xlu0 %430  ;;  %v445_v47 = vpop.permute.xlu2 %444 }
 0x429   :  { %v437_v63 = vsel %vm4309_vm6, %v431_v43, %v435_v42 }
 0x430   :  { %v441_v48 = vpop.permute.xlu0 %440 }
 0x431   :  { %v448_v49 = vsel %vm4305_vm15, %v441_v48, %v445_v47  ;;  %v450_v50 = vsel %vm4306_vm12, %v445_v47, %v441_v48 }
 0x432   :  { %v433_v51 = vpop.permute.xlu1 %432 }
 0x433   :  { %v436_v52 = vsel %vm4308_vm13, %v429_v41, %v433_v51  ;;  %v438_v53 = vsel %vm4309_vm6, %v433_v51, %v429_v41 }
 0x434   :  { %v452_v56 = vsel %vm4304_vm14, %v436_v52, %v450_v50  ;;  %v453_v57 = vsel %vm4307_vm0, %v438_v53, %v448_v49 }
 0x435   :  { %vm460_vm3 = vcmp.ge.f32.partialorder %v424_v38, %v452_v56  ;;  %vm461_vm15 = vcmp.ge.f32.partialorder %v425_v39, %v453_v57 }
 0x436   :  { %vm464_vm12 = vmxor %vm2526_vm2, %vm460_vm3 }
 0x437   :  { %vm468_vm9 = vmxor %vm464_vm12, %vm1941_vm8  ;;  %vm4315_vm12 = vcmp.lt.s32.totalorder %v2002_v7, 4 }
 0x438   :  { %v2542_v59 = vsel %vm468_vm9, %v424_v38, %v452_v56  ;;  %vm465_vm13 = vmxor %vm2535_vm5, %vm461_vm15  ;;  %v447_v60 = vpop.permute.xlu0 %446 }
 0x439   :  { %476 = vrot.lane.b32.xlu1 %v2542_v59, %s1942_s24  ;;  %vm469_vm11 = vmxor %vm465_vm13, %vm1941_vm8 }
 0x43a   :  { %v473_v61 = vsel %vm469_vm11, %v425_v39, %v453_v57  ;;  %v443_v62 = vpop.permute.xlu1 %442  ;;  %vm4314_vm3 = vmmov %vm4309_vm6 }
 0x43b   :  { %v439_v0 = vsel %vm4314_vm3, %v435_v42, %v431_v43  ;;  %480 = vrot.lane.b32.xlu0 %v473_v61, %s1942_s24  ;;  %v449_v1 = vsel %vm4315_vm12, %v443_v62, %v447_v60  ;;  %vm4316_vm15 = vmmov %vm4315_vm12 }
 0x43c   :  { %v451_v2 = vsel %vm4316_vm15, %v447_v60, %v443_v62  ;;  %v455_v5 = vsel %vm4307_vm0, %v439_v0, %v449_v1  ;;  %vm4318_vm15 = vcmp.lt.s32.totalorder %v2002_v7, 2 }
 0x43d   :  { %v454_v3 = vsel %vm4304_vm14, %v437_v63, %v451_v2  ;;  %vm463_vm13 = vcmp.ge.f32.partialorder %v427_v40, %v455_v5 }
 0x43e   :  { %vm462_vm9 = vcmp.ge.f32.partialorder %v2469_v27, %v454_v3  ;;  %vm467_vm3 = vmxor %vm2535_vm5, %vm463_vm13  ;;  %vm4317_vm5 = vcmp.lt.s32.totalorder %v2002_v7, 126 }
 0x43f   :  { %vm466_vm11 = vmxor %vm2526_vm2, %vm462_vm9 }
 0x440   :  { %vm470_vm6 = vmxor %vm466_vm11, %vm1941_vm8 }
 0x441   :  { %v474_v6 = vsel %vm470_vm6, %v2469_v27, %v454_v3  ;;  %vm471_vm12 = vmxor %vm467_vm3, %vm1941_vm8 }
 0x442   :  { %478 = vrot.lane.b32.xlu2 %v474_v6, %s1942_s24  ;;  %v475_v8 = vsel %vm471_vm12, %v427_v40, %v455_v5  ;;  %vm504_vm2 = vmxor %vm2440_vm10, %vm2015_vm1 }
 0x443   :  { %490 = vrot.lane.b32.xlu0 %v474_v6, %s1943_s25  ;;  %482 = vrot.lane.b32.xlu1 %v475_v8, %s1942_s24  ;;  %vm2586_vm9 = vmxor %vm504_vm2, %vm1941_vm8 }
 0x444   :  { %vm4321_vm3 = vmmov %vm4317_vm5 }
 0x445   :  { %vm4322_vm12 = vmmov %vm4321_vm3 }
 0x446   :  { %vm505_vm2 = vmxor %vm2465_vm7, %vm2024_vm4 }
 0x44a   :  { %488 = vrot.lane.b32.xlu2 %v2542_v59, %s1943_s25 }
 0x44b   :  { %492 = vrot.lane.b32.xlu1 %v473_v61, %s1943_s25 }
 0x452   :  { %494 = vrot.lane.b32.xlu2 %v475_v8, %s1943_s25 }
 0x49c   :  { %v479_v10 = vpop.permute.xlu2 %478 }
 0x4a4   :  { %v489_v11 = vpop.permute.xlu2 %488 }
 0x4ab   :  { %v477_v12 = vpop.permute.xlu1 %476 }
 0x4ac   :  { %v495_v15 = vpop.permute.xlu2 %494 }
 0x4ad   :  { %v481_v14 = vpop.permute.xlu0 %480 }
 0x4ae   :  { %v484_v28 = vsel %vm4321_vm3, %v477_v12, %v481_v14  ;;  %v486_v29 = vsel %vm4322_vm12, %v481_v14, %v477_v12  ;;  %v72_v12 = vand.u32 32, %v2002_v7  ;;  %v73_v14 = vand.u32 32, %v2005_v9 }
 0x4b5   :  { %v483_v20 = vpop.permute.xlu1 %482  ;;  %v491_v21 = vpop.permute.xlu0 %490 }
 0x4b6   :  { %v485_v22 = vsel %vm4317_vm5, %v479_v10, %v483_v20  ;;  %v499_v23 = vsel %vm4318_vm15, %v495_v15, %v491_v21  ;;  %vm4323_vm5 = vmmov %vm4321_vm3  ;;  %v497_v32 = vsel %vm4318_vm15, %v491_v21, %v495_v15  ;;  %v4338_v15 = vmov 0 }
 0x4b7   :  { %v502_v25 = vsel %vm2015_vm1, %v485_v22, %v499_v23  ;;  %v487_v31 = vsel %vm4323_vm5, %v483_v20, %v479_v10  ;;  %v4340_v20 = vmov 0 }
 0x4b8   :  { %vm510_vm13 = vcmp.ge.f32.partialorder %v474_v6, %v502_v25  ;;  %v503_v37 = vsel %vm2024_vm4, %v487_v31, %v497_v32 }
 0x4b9   :  { %vm514_vm11 = vmxor %vm2586_vm9, %vm510_vm13 }
 0x4ba   :  { %vm518_vm6 = vmxor %vm514_vm11, %vm1941_vm8 }
 0x4bb   :  { %v522_v27 = vsel %vm518_vm6, %v474_v6, %v502_v25  ;;  %vm4324_vm13 = vmmov %vm4318_vm15 }
 0x4bc   :  { %526 = vrot.lane.b32.xlu1 %v522_v27, %s1939_s0  ;;  %vm4325_vm11 = vmmov %vm4324_vm13 }
 0x4bd   :  { %v493_v30 = vpop.permute.xlu1 %492  ;;  %vm507_vm6 = vmxor %vm505_vm2, %vm1941_vm8 }
 0x4be   :  { %v496_v33 = vsel %vm4324_vm13, %v489_v11, %v493_v30  ;;  %v498_v34 = vsel %vm4325_vm11, %v493_v30, %v489_v11 }
 0x4bf   :  { %v501_v35 = vsel %vm2024_vm4, %v486_v29, %v496_v33  ;;  %v500_v36 = vsel %vm2015_vm1, %v484_v28, %v498_v34  ;;  %vm511_vm1 = vcmp.ge.f32.partialorder %v475_v8, %v503_v37 }
 0x4c0   :  { %vm509_vm3 = vcmp.ge.f32.partialorder %v473_v61, %v501_v35  ;;  %vm508_vm12 = vcmp.ge.f32.partialorder %v2542_v59, %v500_v36  ;;  %vm515_vm2 = vmxor %vm507_vm6, %vm511_vm1 }
 0x4c1   :  { %vm513_vm5 = vmxor %vm507_vm6, %vm509_vm3  ;;  %vm4327_vm6 = vcmp.lt.s32.totalorder %v2002_v7, 1 }
 0x4c2   :  { %vm517_vm15 = vmxor %vm513_vm5, %vm1941_vm8 }
 0x4c3   :  { %v521_v38 = vsel %vm517_vm15, %v473_v61, %v501_v35  ;;  %vm512_vm13 = vmxor %vm2586_vm9, %vm508_vm12  ;;  %vm4326_vm9 = vnez %v4236_v16  ;;  %vm4328_vm12 = vcmp.lt.s32.totalorder %v2002_v7, 127 }
 0x4c4   :  { %528 = vrot.lane.b32.xlu2 %v521_v38, %s1939_s0  ;;  %vm516_vm11 = vmxor %vm512_vm13, %vm1941_vm8 }
 0x4c5   :  { %v520_v39 = vsel %vm516_vm11, %v2542_v59, %v500_v36  ;;  %vm519_vm3 = vmxor %vm515_vm2, %vm1941_vm8 }
 0x4c6   :  { %524 = vrot.lane.b32.xlu0 %v520_v39, %s1939_s0  ;;  %536 = vrot.lane.b32.xlu1 %v520_v39, %s1940_s1  ;;  %v523_v40 = vsel %vm519_vm3, %v475_v8, %v503_v37  ;;  %vm552_vm1 = vmxor %vm2440_vm10, %vm4326_vm9 }
 0x4c7   :  { %vm2642_vm5 = vmxor %vm552_vm1, %vm1941_vm8  ;;  %vm4333_vm1 = vnez %v4240_v18 }
 0x4c8   :  { %vm4331_vm2 = vmmov %vm4327_vm6 }
 0x4c9   :  { %vm4332_vm3 = vmmov %vm4328_vm12 }
 0x4cc   :  { %538 = vrot.lane.b32.xlu2 %v522_v27, %s1940_s1 }
 0x4ce   :  { %542 = vrot.lane.b32.xlu1 %v523_v40, %s1940_s1  ;;  %530 = vrot.lane.b32.xlu0 %v523_v40, %s1939_s0 }
 0x4d6   :  { %540 = vrot.lane.b32.xlu0 %v521_v38, %s1940_s1 }
 0x51e   :  { %v529_v42 = vpop.permute.xlu2 %528 }
 0x526   :  { %v539_v48 = vpop.permute.xlu2 %538 }
 0x52e   :  { %v527_v41 = vpop.permute.xlu1 %526 }
 0x538   :  { %v537_v43 = vpop.permute.xlu1 %536  ;;  %v525_v47 = vpop.permute.xlu0 %524 }
 0x540   :  { %v543_v49 = vpop.permute.xlu1 %542  ;;  %v531_v50 = vpop.permute.xlu0 %530 }
 0x541   :  { %v547_v51 = vsel %vm4327_vm6, %v543_v49, %v539_v48  ;;  %v533_v52 = vsel %vm4328_vm12, %v527_v41, %v531_v50  ;;  %v545_v57 = vsel %vm4331_vm2, %v539_v48, %v543_v49  ;;  %v535_v58 = vsel %vm4332_vm3, %v531_v50, %v527_v41  ;;  %vm553_vm6 = vmxor %vm2465_vm7, %vm4333_vm1 }
 0x542   :  { %v550_v54 = vsel %vm4326_vm9, %v533_v52, %v547_v51  ;;  %vm4334_vm12 = vmmov %vm4332_vm3  ;;  %v551_v2 = vsel %vm4333_vm1, %v535_v58, %v545_v57 }
 0x543   :  { %vm558_vm15 = vcmp.ge.f32.partialorder %v522_v27, %v550_v54  ;;  %v532_v60 = vsel %vm4334_vm12, %v525_v47, %v529_v42  ;;  %vm559_vm4 = vcmp.ge.f32.partialorder %v523_v40, %v551_v2 }
 0x544   :  { %vm562_vm13 = vmxor %vm2642_vm5, %vm558_vm15 }
 0x545   :  { %vm566_vm11 = vmxor %vm562_vm13, %vm1941_vm8 }
 0x546   :  { %v2651_v56 = vsel %vm566_vm11, %v522_v27, %v550_v54  ;;  %vm4335_vm15 = vmmov %vm4332_vm3 }
 0x547   :  { %574 = vrot.lane.b32.xlu0 %v2651_v56, %s1948_s30  ;;  %v534_v61 = vsel %vm4335_vm15, %v529_v42, %v525_v47  ;;  %vm4336_vm13 = vmmov %vm4331_vm2 }
 0x548   :  { %v541_v59 = vpop.permute.xlu0 %540  ;;  %vm4337_vm11 = vmmov %vm4331_vm2 }
 0x549   :  { %v544_v62 = vsel %vm4336_vm13, %v537_v43, %v541_v59  ;;  %v546_v63 = vsel %vm4337_vm11, %v541_v59, %v537_v43  ;;  %vm555_vm3 = vmxor %vm553_vm6, %vm1941_vm8 }
 0x54a   :  { %v548_v0 = vsel %vm4326_vm9, %v532_v60, %v546_v63  ;;  %v549_v1 = vsel %vm4333_vm1, %v534_v61, %v544_v62  ;;  %vm563_vm1 = vmxor %vm555_vm3, %vm559_vm4  ;;  %vm2693_vm4 = vcmp.eq.s32.totalorder %v72_v12, 0 }
 0x54b   :  { %vm556_vm2 = vcmp.ge.f32.partialorder %v520_v39, %v548_v0  ;;  %vm557_vm12 = vcmp.ge.f32.partialorder %v521_v38, %v549_v1  ;;  %vm567_vm6 = vmxor %vm563_vm1, %vm1941_vm8  ;;  %v4339_v15 = vsel %vm2693_vm4, 4294967295, %v4338_v15 }
 0x54c   :  { %vm560_vm15 = vmxor %vm2642_vm5, %vm556_vm2  ;;  %v571_v6 = vsel %vm567_vm6, %v523_v40, %v551_v2  ;;  %vm2698_vm5 = vcmp.eq.s32.totalorder %v73_v14, 0  ;;  %vm4184_vm2 = vcmp.lt.s32.totalorder %v2002_v7, 112 }
 0x54d   :  { %vm564_vm13 = vmxor %vm560_vm15, %vm1941_vm8  ;;  %v4341_v20 = vsel %vm2698_vm5, 4294967295, %v4340_v20 }
 0x54e   :  { %v568_v3 = vsel %vm564_vm13, %v520_v39, %v548_v0  ;;  %vm561_vm11 = vmxor %vm555_vm3, %vm557_vm12 }
 0x54f   :  { %585 = vrot.lane.b32.xlu0 %v568_v3, %s1937_s21  ;;  %572 = vrot.lane.b32.xlu2 %v568_v3, %s1948_s30  ;;  %vm565_vm9 = vmxor %vm561_vm11, %vm1941_vm8 }
 0x550   :  { %v569_v5 = vsel %vm565_vm9, %v521_v38, %v549_v1  ;;  %vm4183_vm9 = vcmp.lt.s32.totalorder %v2002_v7, 16  ;;  %vm602_vm1 = vmxor %vm2693_vm4, %vm2440_vm10 }
 0x551   :  { %576 = vrot.lane.b32.xlu1 %v569_v5, %s1948_s30  ;;  %vm603_vm3 = vmxor %vm2698_vm5, %vm2465_vm7 }
 0x552   :  { %vm2720_vm12 = vmxor %vm602_vm1, %vm1941_vm8 }
 0x553   :  { %vm2729_vm13 = vmxor %vm603_vm3, %vm1941_vm8 }
 0x557   :  { %591 = vrot.lane.b32.xlu0 %v571_v6, %s1937_s21  ;;  %578 = vrot.lane.b32.xlu2 %v571_v6, %s1948_s30 }
 0x559   :  { %587 = vrot.lane.b32.xlu1 %v2651_v56, %s1937_s21 }
 0x55f   :  { %589 = vrot.lane.b32.xlu2 %v569_v5, %s1937_s21 }
 0x5a9   :  { %v573_v8 = vpop.permute.xlu2 %572 }
 0x5b1   :  { %v579_v10 = vpop.permute.xlu2 %578 }
 0x5b9   :  { %v575_v11 = vpop.permute.xlu0 %574  ;;  %v590_v21 = vpop.permute.xlu2 %589 }
 0x5ba   :  { %v582_v37 = vsel %vm4184_vm2, %v575_v11, %v579_v10  ;;  %v584_v38 = vsel %vm4184_vm2, %v579_v10, %v575_v11 }
 0x5c1   :  { %v586_v22 = vpop.permute.xlu0 %585 }
 0x5c2   :  { %v594_v23 = vsel %vm4183_vm9, %v586_v22, %v590_v21  ;;  %v596_v24 = vsel %vm4183_vm9, %v590_v21, %v586_v22 }
 0x5c3   :  { %v577_v25 = vpop.permute.xlu1 %576 }
 0x5c4   :  { %v581_v27 = vsel %vm4184_vm2, %v573_v8, %v577_v25  ;;  %v583_v28 = vsel %vm4184_vm2, %v577_v25, %v573_v8 }
 0x5c5   :  { %v598_v30 = vsel %vm2440_vm10, %v581_v27, %v596_v24  ;;  %v599_v31 = vsel %vm2465_vm7, %v583_v28, %v594_v23 }
 0x5c6   :  { %vm606_vm15 = vcmp.ge.f32.partialorder %v568_v3, %v598_v30  ;;  %vm607_vm11 = vcmp.ge.f32.partialorder %v569_v5, %v599_v31 }
 0x5c7   :  { %vm610_vm6 = vmxor %vm2720_vm12, %vm606_vm15  ;;  %vm4346_vm15 = vcmp.lt.s32.totalorder %v2002_v7, 16 }
 0x5c8   :  { %vm614_vm1 = vmxor %vm610_vm6, %vm1941_vm8 }
 0x5c9   :  { %v2736_v33 = vsel %vm614_vm1, %v568_v3, %v598_v30  ;;  %vm611_vm9 = vmxor %vm2729_vm13, %vm607_vm11  ;;  %v592_v34 = vpop.permute.xlu0 %591 }
 0x5ca   :  { %622 = vrot.lane.b32.xlu1 %v2736_v33, %s1946_s28  ;;  %vm615_vm3 = vmxor %vm611_vm9, %vm1941_vm8 }
 0x5cb   :  { %v619_v35 = vsel %vm615_vm3, %v569_v5, %v599_v31  ;;  %v588_v36 = vpop.permute.xlu1 %587  ;;  %vm4347_vm11 = vmmov %vm4346_vm15 }
 0x5cc   :  { %626 = vrot.lane.b32.xlu0 %v619_v35, %s1946_s28  ;;  %v595_v39 = vsel %vm4346_vm15, %v588_v36, %v592_v34  ;;  %v597_v40 = vsel %vm4347_vm11, %v592_v34, %v588_v36 }
 0x5cd   :  { %v600_v41 = vsel %vm2440_vm10, %v582_v37, %v597_v40  ;;  %v601_v42 = vsel %vm2465_vm7, %v584_v38, %v595_v39 }
 0x5ce   :  { %vm608_vm9 = vcmp.ge.f32.partialorder %v2651_v56, %v600_v41  ;;  %vm609_vm6 = vcmp.ge.f32.partialorder %v571_v6, %v601_v42 }
 0x5cf   :  { %vm612_vm1 = vmxor %vm2720_vm12, %vm608_vm9  ;;  %vm4348_vm12 = vnez %v4269_v44  ;;  %vm4349_vm9 = vcmp.lt.s32.totalorder %v2002_v7, 120 }
 0x5d0   :  { %vm616_vm3 = vmxor %vm612_vm1, %vm1941_vm8 }
 0x5d1   :  { %v620_v43 = vsel %vm616_vm3, %v2651_v56, %v600_v41  ;;  %vm613_vm15 = vmxor %vm2729_vm13, %vm609_vm6  ;;  %vm4350_vm6 = vcmp.lt.s32.totalorder %v2002_v7, 8 }
 0x5d2   :  { %624 = vrot.lane.b32.xlu2 %v620_v43, %s1946_s28  ;;  %vm617_vm11 = vmxor %vm613_vm15, %vm1941_vm8 }
 0x5d3   :  { %v621_v47 = vsel %vm617_vm11, %v571_v6, %v601_v42  ;;  %vm650_vm13 = vmxor %vm2693_vm4, %vm4348_vm12 }
 0x5d4   :  { %636 = vrot.lane.b32.xlu0 %v620_v43, %s1947_s29  ;;  %628 = vrot.lane.b32.xlu1 %v621_v47, %s1946_s28  ;;  %vm2780_vm1 = vmxor %vm650_vm13, %vm1941_vm8 }
 0x5d5   :  { %vm4353_vm13 = vmmov %vm4349_vm9 }
 0x5d6   :  { %vm4355_vm7 = vmmov %vm4349_vm9 }
 0x5da   :  { %634 = vrot.lane.b32.xlu2 %v2736_v33, %s1947_s29 }
 0x5dc   :  { %638 = vrot.lane.b32.xlu1 %v619_v35, %s1947_s29 }
 0x5e2   :  { %640 = vrot.lane.b32.xlu2 %v621_v47, %s1947_s29 }
 0x62c   :  { %v625_v48 = vpop.permute.xlu2 %624 }
 0x634   :  { %v635_v49 = vpop.permute.xlu2 %634 }
 0x63c   :  { %v623_v50 = vpop.permute.xlu1 %622  ;;  %v641_v52 = vpop.permute.xlu2 %640 }
 0x63e   :  { %v627_v51 = vpop.permute.xlu0 %626 }
 0x63f   :  { %v630_v61 = vsel %vm4349_vm9, %v623_v50, %v627_v51  ;;  %v632_v62 = vsel %vm4353_vm13, %v627_v51, %v623_v50 }
 0x646   :  { %v629_v53 = vpop.permute.xlu1 %628  ;;  %v637_v54 = vpop.permute.xlu0 %636 }
 0x647   :  { %v631_v56 = vsel %vm4349_vm9, %v625_v48, %v629_v53  ;;  %v645_v57 = vsel %vm4350_vm6, %v641_v52, %v637_v54  ;;  %vm4354_vm6 = vnez %v4273_v55  ;;  %v633_v0 = vsel %vm4355_vm7, %v629_v53, %v625_v48 }
 0x648   :  { %v648_v59 = vsel %vm4348_vm12, %v631_v56, %v645_v57  ;;  %vm651_vm2 = vmxor %vm2698_vm5, %vm4354_vm6 }
 0x649   :  { %vm656_vm3 = vcmp.ge.f32.partialorder %v620_v43, %v648_v59  ;;  %vm653_vm9 = vmxor %vm651_vm2, %vm1941_vm8 }
 0x64a   :  { %vm660_vm15 = vmxor %vm2780_vm1, %vm656_vm3  ;;  %vm4356_vm3 = vcmp.lt.s32.totalorder %v2002_v7, 8 }
 0x64b   :  { %vm664_vm11 = vmxor %vm660_vm15, %vm1941_vm8  ;;  %v643_v1 = vsel %vm4356_vm3, %v637_v54, %v641_v52 }
 0x64c   :  { %v668_v60 = vsel %vm664_vm11, %v620_v43, %v648_v59  ;;  %vm4357_vm15 = vmmov %vm4356_vm3  ;;  %v649_v8 = vsel %vm4354_vm6, %v633_v0, %v643_v1 }
 0x64d   :  { %672 = vrot.lane.b32.xlu1 %v668_v60, %s1944_s26  ;;  %vm4358_vm11 = vmmov %vm4356_vm3 }
 0x64e   :  { %v639_v63 = vpop.permute.xlu1 %638 }
 0x64f   :  { %v642_v2 = vsel %vm4357_vm15, %v635_v49, %v639_v63  ;;  %v644_v3 = vsel %vm4358_vm11, %v639_v63, %v635_v49 }
 0x650   :  { %v647_v5 = vsel %vm4354_vm6, %v632_v62, %v642_v2  ;;  %v646_v6 = vsel %vm4348_vm12, %v630_v61, %v644_v3  ;;  %vm657_vm12 = vcmp.ge.f32.partialorder %v621_v47, %v649_v8 }
 0x651   :  { %vm655_vm13 = vcmp.ge.f32.partialorder %v619_v35, %v647_v5  ;;  %vm654_vm7 = vcmp.ge.f32.partialorder %v2736_v33, %v646_v6  ;;  %vm661_vm2 = vmxor %vm653_vm9, %vm657_vm12  ;;  %vm4359_vm12 = vcmp.lt.s32.totalorder %v2002_v7, 4 }
 0x652   :  { %vm659_vm10 = vmxor %vm653_vm9, %vm655_vm13 }
 0x653   :  { %vm663_vm3 = vmxor %vm659_vm10, %vm1941_vm8 }
 0x654   :  { %v667_v10 = vsel %vm663_vm3, %v619_v35, %v647_v5  ;;  %vm658_vm15 = vmxor %vm2780_vm1, %vm654_vm7  ;;  %vm4360_vm1 = vcmp.lt.s32.totalorder %v2002_v7, 124 }
 0x655   :  { %674 = vrot.lane.b32.xlu2 %v667_v10, %s1944_s26  ;;  %vm662_vm11 = vmxor %vm658_vm15, %vm1941_vm8 }
 0x656   :  { %v666_v11 = vsel %vm662_vm11, %v2736_v33, %v646_v6  ;;  %vm665_vm13 = vmxor %vm661_vm2, %vm1941_vm8 }
 0x657   :  { %670 = vrot.lane.b32.xlu0 %v666_v11, %s1944_s26  ;;  %682 = vrot.lane.b32.xlu1 %v666_v11, %s1945_s27  ;;  %v669_v12 = vsel %vm665_vm13, %v621_v47, %v649_v8  ;;  %vm698_vm10 = vmxor %vm2693_vm4, %vm4304_vm14 }
 0x658   :  { %vm2836_vm9 = vmxor %vm698_vm10, %vm1941_vm8 }
 0x659   :  { %vm4363_vm11 = vmmov %vm4359_vm12 }
 0x65a   :  { %vm4364_vm2 = vmmov %vm4360_vm1 }
 0x65b   :  { %vm699_vm13 = vmxor %vm2698_vm5, %vm4307_vm0 }
 0x65c   :  { %vm4365_vm10 = vmmov %vm4360_vm1 }
 0x65d   :  { %684 = vrot.lane.b32.xlu2 %v668_v60, %s1945_s27 }
 0x65f   :  { %688 = vrot.lane.b32.xlu1 %v669_v12, %s1945_s27  ;;  %676 = vrot.lane.b32.xlu0 %v669_v12, %s1944_s26 }
 0x667   :  { %686 = vrot.lane.b32.xlu0 %v667_v10, %s1945_s27 }
 0x6af   :  { %v675_v21 = vpop.permute.xlu2 %674 }
 0x6b7   :  { %v685_v24 = vpop.permute.xlu2 %684 }
 0x6bf   :  { %v673_v14 = vpop.permute.xlu1 %672 }
 0x6c9   :  { %v683_v22 = vpop.permute.xlu1 %682  ;;  %v671_v23 = vpop.permute.xlu0 %670 }
 0x6ca   :  { %v678_v36 = vsel %vm4365_vm10, %v671_v23, %v675_v21 }
 0x6d1   :  { %v689_v25 = vpop.permute.xlu1 %688  ;;  %v677_v27 = vpop.permute.xlu0 %676 }
 0x6d2   :  { %v693_v28 = vsel %vm4359_vm12, %v689_v25, %v685_v24  ;;  %v679_v29 = vsel %vm4360_vm1, %v673_v14, %v677_v27  ;;  %v691_v33 = vsel %vm4363_vm11, %v685_v24, %v689_v25  ;;  %v681_v34 = vsel %vm4364_vm2, %v677_v27, %v673_v14  ;;  %vm4366_vm12 = vmmov %vm4360_vm1 }
 0x6d3   :  { %v696_v31 = vsel %vm4304_vm14, %v679_v29, %v693_v28  ;;  %v680_v37 = vsel %vm4366_vm12, %v675_v21, %v671_v23  ;;  %vm4367_vm1 = vmmov %vm4363_vm11  ;;  %v697_v42 = vsel %vm4307_vm0, %v681_v34, %v691_v33 }
 0x6d4   :  { %vm704_vm7 = vcmp.ge.f32.partialorder %v668_v60, %v696_v31  ;;  %vm705_vm12 = vcmp.ge.f32.partialorder %v669_v12, %v697_v42 }
 0x6d5   :  { %vm708_vm3 = vmxor %vm2836_vm9, %vm704_vm7 }
 0x6d6   :  { %vm712_vm15 = vmxor %vm708_vm3, %vm1941_vm8 }
 0x6d7   :  { %v2845_v32 = vsel %vm712_vm15, %v668_v60, %v696_v31  ;;  %vm4368_vm7 = vmmov %vm4367_vm1 }
 0x6d8   :  { %720 = vrot.lane.b32.xlu0 %v2845_v32, %s1942_s24  ;;  %vm701_vm15 = vmxor %vm699_vm13, %vm1941_vm8 }
 0x6d9   :  { %v687_v35 = vpop.permute.xlu0 %686 }
 0x6da   :  { %v690_v38 = vsel %vm4367_vm1, %v683_v22, %v687_v35  ;;  %v692_v39 = vsel %vm4368_vm7, %v687_v35, %v683_v22 }
 0x6db   :  { %v694_v40 = vsel %vm4304_vm14, %v678_v36, %v692_v39  ;;  %v695_v41 = vsel %vm4307_vm0, %v680_v37, %v690_v38  ;;  %vm709_vm0 = vmxor %vm701_vm15, %vm705_vm12 }
 0x6dc   :  { %vm702_vm3 = vcmp.ge.f32.partialorder %v666_v11, %v694_v40  ;;  %vm703_vm11 = vcmp.ge.f32.partialorder %v667_v10, %v695_v41  ;;  %vm713_vm13 = vmxor %vm709_vm0, %vm1941_vm8 }
 0x6dd   :  { %vm706_vm2 = vmxor %vm2836_vm9, %vm702_vm3  ;;  %v717_v48 = vsel %vm713_vm13, %v669_v12, %v697_v42  ;;  %vm4369_vm9 = vnez %v4238_v17  ;;  %vm4370_vm3 = vcmp.lt.s32.totalorder %v2002_v7, 2 }
 0x6de   :  { %vm710_vm10 = vmxor %vm706_vm2, %vm1941_vm8 }
 0x6df   :  { %v714_v43 = vsel %vm710_vm10, %v666_v11, %v694_v40  ;;  %vm707_vm1 = vmxor %vm701_vm15, %vm703_vm11  ;;  %vm4372_vm11 = vnez %v4242_v19  ;;  %vm4373_vm10 = vcmp.lt.s32.totalorder %v2002_v7, 126 }
 0x6e0   :  { %730 = vrot.lane.b32.xlu0 %v714_v43, %s1943_s25  ;;  %718 = vrot.lane.b32.xlu2 %v714_v43, %s1942_s24  ;;  %vm711_vm7 = vmxor %vm707_vm1, %vm1941_vm8 }
 0x6e1   :  { %v715_v47 = vsel %vm711_vm7, %v667_v10, %v695_v41  ;;  %vm746_vm0 = vmxor %vm2693_vm4, %vm4369_vm9 }
 0x6e2   :  { %722 = vrot.lane.b32.xlu1 %v715_v47, %s1942_s24  ;;  %vm4371_vm15 = vmmov %vm4370_vm3 }
 0x6e3   :  { %vm747_vm2 = vmxor %vm2698_vm5, %vm4372_vm11 }
 0x6e4   :  { %vm4374_vm12 = vmmov %vm4373_vm10 }
 0x6e5   :  { %vm2902_vm1 = vmxor %vm746_vm0, %vm1941_vm8 }
 0x6e6   :  { %vm2911_vm13 = vmxor %vm747_vm2, %vm1941_vm8 }
 0x6e8   :  { %736 = vrot.lane.b32.xlu0 %v717_v48, %s1943_s25  ;;  %724 = vrot.lane.b32.xlu2 %v717_v48, %s1942_s24 }
 0x6ea   :  { %732 = vrot.lane.b32.xlu1 %v2845_v32, %s1943_s25 }
 0x6f0   :  { %734 = vrot.lane.b32.xlu2 %v715_v47, %s1943_s25 }
 0x73a   :  { %v719_v49 = vpop.permute.xlu2 %718 }
 0x742   :  { %v725_v50 = vpop.permute.xlu2 %724 }
 0x74a   :  { %v721_v51 = vpop.permute.xlu0 %720  ;;  %v735_v52 = vpop.permute.xlu2 %734 }
 0x74b   :  { %v727_v5 = vsel %vm4374_vm12, %v721_v51, %v725_v50 }
 0x752   :  { %v731_v53 = vpop.permute.xlu0 %730 }
 0x753   :  { %v738_v54 = vsel %vm4370_vm3, %v731_v53, %v735_v52  ;;  %v740_v56 = vsel %vm4371_vm15, %v735_v52, %v731_v53 }
 0x754   :  { %v723_v57 = vpop.permute.xlu1 %722 }
 0x755   :  { %v726_v58 = vsel %vm4373_vm10, %v719_v49, %v723_v57  ;;  %v728_v59 = vsel %vm4374_vm12, %v723_v57, %v719_v49 }
 0x756   :  { %v742_v61 = vsel %vm4369_vm9, %v726_v58, %v740_v56  ;;  %v743_v62 = vsel %vm4372_vm11, %v728_v59, %v738_v54  ;;  %v76_v54 = vand.u32 64, %v2002_v7 }
 0x757   :  { %vm750_vm7 = vcmp.ge.f32.partialorder %v714_v43, %v742_v61  ;;  %vm751_vm3 = vcmp.ge.f32.partialorder %v715_v47, %v743_v62 }
 0x758   :  { %vm754_vm15 = vmxor %vm2902_vm1, %vm750_vm7 }
 0x759   :  { %vm758_vm0 = vmxor %vm754_vm15, %vm1941_vm8  ;;  %vm4380_vm15 = vcmp.lt.s32.totalorder %v2002_v7, 2 }
 0x75a   :  { %v2918_v0 = vsel %vm758_vm0, %v714_v43, %v742_v61  ;;  %vm755_vm10 = vmxor %vm2911_vm13, %vm751_vm3  ;;  %v737_v1 = vpop.permute.xlu0 %736 }
 0x75b   :  { %766 = vrot.lane.b32.xlu1 %v2918_v0, %s1939_s0  ;;  %vm759_vm2 = vmxor %vm755_vm10, %vm1941_vm8 }
 0x75c   :  { %v763_v2 = vsel %vm759_vm2, %v715_v47, %v743_v62  ;;  %v733_v3 = vpop.permute.xlu1 %732  ;;  %vm4379_vm7 = vmmov %vm4374_vm12 }
 0x75d   :  { %v729_v6 = vsel %vm4379_vm7, %v725_v50, %v721_v51  ;;  %770 = vrot.lane.b32.xlu0 %v763_v2, %s1939_s0  ;;  %v739_v8 = vsel %vm4380_vm15, %v733_v3, %v737_v1  ;;  %vm4381_vm3 = vmmov %vm4380_vm15 }
 0x75e   :  { %v741_v10 = vsel %vm4381_vm3, %v737_v1, %v733_v3  ;;  %v745_v12 = vsel %vm4372_vm11, %v729_v6, %v739_v8  ;;  %vm4383_vm3 = vcmp.lt.s32.totalorder %v2002_v7, 127  ;;  %v77_v1 = vand.u32 64, %v2005_v9 }
 0x75f   :  { %v744_v11 = vsel %vm4369_vm9, %v727_v5, %v741_v10  ;;  %vm753_vm10 = vcmp.ge.f32.partialorder %v717_v48, %v745_v12 }
 0x760   :  { %vm752_vm0 = vcmp.ge.f32.partialorder %v2845_v32, %v744_v11  ;;  %vm757_vm7 = vmxor %vm2911_vm13, %vm753_vm10 }
 0x761   :  { %vm756_vm2 = vmxor %vm2902_vm1, %vm752_vm0  ;;  %vm4382_vm1 = vnez %v4236_v16  ;;  %vm4384_vm0 = vcmp.lt.s32.totalorder %v2002_v7, 1 }
 0x762   :  { %vm760_vm12 = vmxor %vm756_vm2, %vm1941_vm8 }
 0x763   :  { %v764_v14 = vsel %vm760_vm12, %v2845_v32, %v744_v11  ;;  %vm761_vm15 = vmxor %vm757_vm7, %vm1941_vm8 }
 0x764   :  { %768 = vrot.lane.b32.xlu2 %v764_v14, %s1939_s0  ;;  %v765_v21 = vsel %vm761_vm15, %v717_v48, %v745_v12  ;;  %vm794_vm13 = vmxor %vm2693_vm4, %vm4382_vm1 }
 0x765   :  { %780 = vrot.lane.b32.xlu0 %v764_v14, %s1940_s1  ;;  %772 = vrot.lane.b32.xlu1 %v765_v21, %s1939_s0  ;;  %vm2962_vm10 = vmxor %vm794_vm13, %vm1941_vm8 }
 0x766   :  { %vm4387_vm15 = vmmov %vm4383_vm3 }
 0x767   :  { %vm4388_vm13 = vmmov %vm4383_vm3 }
 0x76c   :  { %778 = vrot.lane.b32.xlu2 %v2918_v0, %s1940_s1 }
 0x76d   :  { %782 = vrot.lane.b32.xlu1 %v763_v2, %s1940_s1 }
 0x774   :  { %784 = vrot.lane.b32.xlu2 %v765_v21, %s1940_s1 }
 0x7be   :  { %v769_v22 = vpop.permute.xlu2 %768 }
 0x7c6   :  { %v779_v23 = vpop.permute.xlu2 %778 }
 0x7cd   :  { %v767_v24 = vpop.permute.xlu1 %766 }
 0x7ce   :  { %v785_v27 = vpop.permute.xlu2 %784 }
 0x7cf   :  { %v771_v25 = vpop.permute.xlu0 %770 }
 0x7d0   :  { %v774_v35 = vsel %vm4387_vm15, %v767_v24, %v771_v25  ;;  %v776_v36 = vsel %vm4388_vm13, %v771_v25, %v767_v24 }
 0x7d7   :  { %v773_v28 = vpop.permute.xlu1 %772  ;;  %v781_v29 = vpop.permute.xlu0 %780 }
 0x7d8   :  { %v775_v30 = vsel %vm4383_vm3, %v769_v22, %v773_v28  ;;  %v789_v31 = vsel %vm4384_vm0, %v785_v27, %v781_v29  ;;  %vm4389_vm3 = vnez %v4240_v18 }
 0x7d9   :  { %v792_v33 = vsel %vm4382_vm1, %v775_v30, %v789_v31  ;;  %vm795_vm0 = vmxor %vm2698_vm5, %vm4389_vm3 }
 0x7da   :  { %vm800_vm2 = vcmp.ge.f32.partialorder %v764_v14, %v792_v33 }
 0x7db   :  { %vm804_vm12 = vmxor %vm2962_vm10, %vm800_vm2 }
 0x7dc   :  { %vm808_vm7 = vmxor %vm804_vm12, %vm1941_vm8  ;;  %vm4391_vm12 = vcmp.lt.s32.totalorder %v2002_v7, 1 }
 0x7dd   :  { %v812_v34 = vsel %vm808_vm7, %v764_v14, %v792_v33  ;;  %vm4390_vm2 = vmmov %vm4388_vm13  ;;  %v787_v39 = vsel %vm4391_vm12, %v781_v29, %v785_v27 }
 0x7de   :  { %816 = vrot.lane.b32.xlu1 %v812_v34, %s1949_s4  ;;  %v777_v38 = vsel %vm4390_vm2, %v773_v28, %v769_v22  ;;  %vm4392_vm7 = vmmov %vm4391_vm12 }
 0x7df   :  { %v783_v37 = vpop.permute.xlu1 %782  ;;  %vm4393_vm15 = vmmov %vm4392_vm7  ;;  %v793_v48 = vsel %vm4389_vm3, %v777_v38, %v787_v39 }
 0x7e0   :  { %v786_v40 = vsel %vm4392_vm7, %v779_v23, %v783_v37  ;;  %v788_v41 = vsel %vm4393_vm15, %v783_v37, %v779_v23  ;;  %vm2993_vm13 = vmxor %vm795_vm0, %vm1941_vm8  ;;  %vm801_vm11 = vcmp.ge.f32.partialorder %v765_v21, %v793_v48 }
 0x7e1   :  { %v791_v42 = vsel %vm4389_vm3, %v776_v36, %v786_v40  ;;  %v790_v43 = vsel %vm4382_vm1, %v774_v35, %v788_v41 }
 0x7e2   :  { %vm799_vm2 = vcmp.ge.f32.partialorder %v763_v2, %v791_v42  ;;  %vm798_vm12 = vcmp.ge.f32.partialorder %v2918_v0, %v790_v43 }
 0x7e3   :  { %vm803_vm7 = vmxor %vm2993_vm13, %vm799_vm2 }
 0x7e4   :  { %vm807_vm15 = vmxor %vm803_vm7, %vm1941_vm8 }
 0x7e5   :  { %v811_v49 = vsel %vm807_vm15, %v763_v2, %v791_v42  ;;  %vm802_vm1 = vmxor %vm2962_vm10, %vm798_vm12 }
 0x7e6   :  { %818 = vrot.lane.b32.xlu2 %v811_v49, %s1949_s4  ;;  %vm806_vm0 = vmxor %vm802_vm1, %vm1941_vm8  ;;  %vm3018_vm1 = vcmp.eq.s32.totalorder %v76_v54, 0 }
 0x7e7   :  { %v810_v50 = vsel %vm806_vm0, %v2918_v0, %v790_v43  ;;  %vm805_vm2 = vmxor %vm2993_vm13, %vm801_vm11  ;;  %vm4196_vm11 = vcmp.lt.s32.totalorder %v2002_v7, 32  ;;  %vm4193_vm13 = vcmp.lt.s32.totalorder %v2002_v7, 96 }
 0x7e8   :  { %814 = vrot.lane.b32.xlu0 %v810_v50, %s1949_s4  ;;  %827 = vrot.lane.b32.xlu1 %v810_v50, %s1950_s5  ;;  %vm809_vm7 = vmxor %vm805_vm2, %vm1941_vm8 }
 0x7e9   :  { %v813_v51 = vsel %vm809_vm7, %v765_v21, %v793_v48  ;;  %vm844_vm10 = vmxor %vm3018_vm1, %vm2693_vm4  ;;  %vm3043_vm7 = vcmp.eq.s32.totalorder %v77_v1, 0 }
 0x7ea   :  { %vm3033_vm12 = vmxor %vm844_vm10, %vm1941_vm8 }
 0x7eb   :  { %vm845_vm10 = vmxor %vm3043_vm7, %vm2698_vm5 }
 0x7ee   :  { %829 = vrot.lane.b32.xlu2 %v812_v34, %s1950_s5 }
 0x7f0   :  { %833 = vrot.lane.b32.xlu1 %v813_v51, %s1950_s5  ;;  %820 = vrot.lane.b32.xlu0 %v813_v51, %s1949_s4 }
 0x7f8   :  { %831 = vrot.lane.b32.xlu0 %v811_v49, %s1950_s5 }
 0x840   :  { %v819_v53 = vpop.permute.xlu2 %818 }
 0x848   :  { %v830_v59 = vpop.permute.xlu2 %829 }
 0x850   :  { %v817_v52 = vpop.permute.xlu1 %816 }
 0x85a   :  { %v828_v56 = vpop.permute.xlu1 %827  ;;  %v815_v57 = vpop.permute.xlu0 %814 }
 0x85b   :  { %v823_v10 = vsel %vm4193_vm13, %v815_v57, %v819_v53  ;;  %v825_v11 = vsel %vm4193_vm13, %v819_v53, %v815_v57 }
 0x862   :  { %v834_v60 = vpop.permute.xlu1 %833  ;;  %v821_v61 = vpop.permute.xlu0 %820 }
 0x863   :  { %v839_v62 = vsel %vm4196_vm11, %v834_v60, %v830_v59  ;;  %v824_v63 = vsel %vm4193_vm13, %v817_v52, %v821_v61  ;;  %v837_v6 = vsel %vm4196_vm11, %v830_v59, %v834_v60  ;;  %v826_v9 = vsel %vm4193_vm13, %v821_v61, %v817_v52 }
 0x864   :  { %v842_v2 = vsel %vm2693_vm4, %v824_v63, %v839_v62  ;;  %v843_v23 = vsel %vm2698_vm5, %v826_v9, %v837_v6 }
 0x865   :  { %vm850_vm15 = vcmp.ge.f32.partialorder %v812_v34, %v842_v2  ;;  %vm851_vm9 = vcmp.ge.f32.partialorder %v813_v51, %v843_v23 }
 0x866   :  { %vm854_vm0 = vmxor %vm3033_vm12, %vm850_vm15 }
 0x867   :  { %vm858_vm2 = vmxor %vm854_vm0, %vm1941_vm8 }
 0x868   :  { %v3047_v5 = vsel %vm858_vm2, %v812_v34, %v842_v2  ;;  %vm847_vm0 = vmxor %vm845_vm10, %vm1941_vm8 }
 0x869   :  { %866 = vrot.lane.b32.xlu0 %v3047_v5, %s1948_s30 }
 0x86a   :  { %v832_v8 = vpop.permute.xlu0 %831 }
 0x86b   :  { %v836_v12 = vsel %vm4196_vm11, %v828_v56, %v832_v8  ;;  %v838_v14 = vsel %vm4196_vm11, %v832_v8, %v828_v56 }
 0x86c   :  { %v840_v21 = vsel %vm2693_vm4, %v823_v10, %v838_v14  ;;  %v841_v22 = vsel %vm2698_vm5, %v825_v11, %v836_v12  ;;  %vm855_vm5 = vmxor %vm847_vm0, %vm851_vm9 }
 0x86d   :  { %vm848_vm15 = vcmp.ge.f32.partialorder %v810_v50, %v840_v21  ;;  %vm849_vm2 = vcmp.ge.f32.partialorder %v811_v49, %v841_v22  ;;  %vm859_vm10 = vmxor %vm855_vm5, %vm1941_vm8  ;;  %vm4403_vm5 = vnez %v4303_v26 }
 0x86e   :  { %vm852_vm13 = vmxor %vm3033_vm12, %vm848_vm15  ;;  %v863_v27 = vsel %vm859_vm10, %v813_v51, %v843_v23  ;;  %vm4406_vm12 = vcmp.lt.s32.totalorder %v2002_v7, 112 }
 0x86f   :  { %vm856_vm3 = vmxor %vm852_vm13, %vm1941_vm8 }
 0x870   :  { %v860_v24 = vsel %vm856_vm3, %v810_v50, %v840_v21  ;;  %vm853_vm11 = vmxor %vm847_vm0, %vm849_vm2 }
 0x871   :  { %876 = vrot.lane.b32.xlu0 %v860_v24, %s1937_s21  ;;  %864 = vrot.lane.b32.xlu2 %v860_v24, %s1948_s30  ;;  %vm857_vm4 = vmxor %vm853_vm11, %vm1941_vm8  ;;  %vm4404_vm11 = vcmp.lt.s32.totalorder %v2002_v7, 16 }
 0x872   :  { %v861_v25 = vsel %vm857_vm4, %v811_v49, %v841_v22  ;;  %vm4402_vm4 = vnez %v4299_v13  ;;  %vm893_vm3 = vmxor %vm3043_vm7, %vm4403_vm5 }
 0x873   :  { %868 = vrot.lane.b32.xlu1 %v861_v25, %s1948_s30  ;;  %vm892_vm9 = vmxor %vm3018_vm1, %vm4402_vm4 }
 0x874   :  { %vm4405_vm13 = vmmov %vm4404_vm11 }
 0x875   :  { %vm4407_vm15 = vmmov %vm4406_vm12 }
 0x876   :  { %vm3104_vm0 = vmxor %vm892_vm9, %vm1941_vm8 }
 0x877   :  { %vm3109_vm2 = vmxor %vm893_vm3, %vm1941_vm8 }
 0x879   :  { %882 = vrot.lane.b32.xlu0 %v863_v27, %s1937_s21  ;;  %870 = vrot.lane.b32.xlu2 %v863_v27, %s1948_s30 }
 0x87b   :  { %878 = vrot.lane.b32.xlu1 %v3047_v5, %s1937_s21 }
 0x881   :  { %880 = vrot.lane.b32.xlu2 %v861_v25, %s1937_s21 }
 0x8cb   :  { %v865_v28 = vpop.permute.xlu2 %864 }
 0x8d3   :  { %v871_v29 = vpop.permute.xlu2 %870 }
 0x8db   :  { %v867_v30 = vpop.permute.xlu0 %866  ;;  %v881_v31 = vpop.permute.xlu2 %880 }
 0x8dc   :  { %v873_v49 = vsel %vm4407_vm15, %v867_v30, %v871_v29 }
 0x8e3   :  { %v877_v32 = vpop.permute.xlu0 %876 }
 0x8e4   :  { %v884_v33 = vsel %vm4404_vm11, %v877_v32, %v881_v31  ;;  %v886_v34 = vsel %vm4405_vm13, %v881_v31, %v877_v32 }
 0x8e5   :  { %v869_v35 = vpop.permute.xlu1 %868 }
 0x8e6   :  { %v872_v36 = vsel %vm4406_vm12, %v865_v28, %v869_v35  ;;  %v874_v37 = vsel %vm4407_vm15, %v869_v35, %v865_v28 }
 0x8e7   :  { %v888_v40 = vsel %vm4402_vm4, %v872_v36, %v886_v34  ;;  %v889_v41 = vsel %vm4403_vm5, %v874_v37, %v884_v33 }
 0x8e8   :  { %vm896_vm10 = vcmp.ge.f32.partialorder %v860_v24, %v888_v40  ;;  %vm897_vm11 = vcmp.ge.f32.partialorder %v861_v25, %v889_v41 }
 0x8e9   :  { %vm900_vm13 = vmxor %vm3104_vm0, %vm896_vm10 }
 0x8ea   :  { %vm901_vm9 = vmxor %vm3109_vm2, %vm897_vm11  ;;  %vm4413_vm11 = vcmp.lt.s32.totalorder %v2002_v7, 16 }
 0x8eb   :  { %vm904_vm12 = vmxor %vm900_vm13, %vm1941_vm8  ;;  %v883_v42 = vpop.permute.xlu0 %882 }
 0x8ec   :  { %v3122_v43 = vsel %vm904_vm12, %v860_v24, %v888_v40  ;;  %vm905_vm3 = vmxor %vm901_vm9, %vm1941_vm8 }
 0x8ed   :  { %912 = vrot.lane.b32.xlu1 %v3122_v43, %s1946_s28  ;;  %v909_v47 = vsel %vm905_vm3, %v861_v25, %v889_v41  ;;  %v879_v48 = vpop.permute.xlu1 %878  ;;  %vm4412_vm10 = vmmov %vm4407_vm15 }
 0x8ee   :  { %v875_v50 = vsel %vm4412_vm10, %v871_v29, %v867_v30  ;;  %916 = vrot.lane.b32.xlu0 %v909_v47, %s1946_s28  ;;  %v885_v51 = vsel %vm4413_vm11, %v879_v48, %v883_v42  ;;  %vm4414_vm13 = vmmov %vm4413_vm11 }
 0x8ef   :  { %v887_v52 = vsel %vm4414_vm13, %v883_v42, %v879_v48  ;;  %v891_v54 = vsel %vm4403_vm5, %v875_v50, %v885_v51  ;;  %vm4416_vm13 = vcmp.lt.s32.totalorder %v2002_v7, 120 }
 0x8f0   :  { %v890_v53 = vsel %vm4402_vm4, %v873_v49, %v887_v52  ;;  %vm899_vm12 = vcmp.ge.f32.partialorder %v863_v27, %v891_v54 }
 0x8f1   :  { %vm898_vm9 = vcmp.ge.f32.partialorder %v3047_v5, %v890_v53  ;;  %vm903_vm15 = vmxor %vm3109_vm2, %vm899_vm12  ;;  %vm4419_vm12 = vcmp.lt.s32.totalorder %v2002_v7, 8 }
 0x8f2   :  { %vm902_vm3 = vmxor %vm3104_vm0, %vm898_vm9  ;;  %vm4415_vm0 = vnez %v4269_v44 }
 0x8f3   :  { %vm906_vm10 = vmxor %vm902_vm3, %vm1941_vm8 }
 0x8f4   :  { %v910_v56 = vsel %vm906_vm10, %v3047_v5, %v890_v53  ;;  %vm907_vm11 = vmxor %vm903_vm15, %vm1941_vm8 }
 0x8f5   :  { %914 = vrot.lane.b32.xlu2 %v910_v56, %s1946_s28  ;;  %v911_v57 = vsel %vm907_vm11, %v863_v27, %v891_v54  ;;  %vm940_vm2 = vmxor %vm3018_vm1, %vm4415_vm0 }
 0x8f6   :  { %926 = vrot.lane.b32.xlu0 %v910_v56, %s1947_s29  ;;  %918 = vrot.lane.b32.xlu1 %v911_v57, %s1946_s28  ;;  %vm3162_vm9 = vmxor %vm940_vm2, %vm1941_vm8 }
 0x8f7   :  { %vm4420_vm11 = vmmov %vm4416_vm13 }
 0x8f8   :  { %vm4421_vm2 = vmmov %vm4420_vm11 }
 0x8fd   :  { %924 = vrot.lane.b32.xlu2 %v3122_v43, %s1947_s29 }
 0x8fe   :  { %928 = vrot.lane.b32.xlu1 %v909_v47, %s1947_s29 }
 0x905   :  { %930 = vrot.lane.b32.xlu2 %v911_v57, %s1947_s29 }
 0x94f   :  { %v915_v59 = vpop.permute.xlu2 %914 }
 0x957   :  { %v925_v60 = vpop.permute.xlu2 %924 }
 0x95f   :  { %v913_v61 = vpop.permute.xlu1 %912  ;;  %v931_v63 = vpop.permute.xlu2 %930 }
 0x960   :  { %v917_v62 = vpop.permute.xlu0 %916 }
 0x961   :  { %v920_v10 = vsel %vm4420_vm11, %v913_v61, %v917_v62  ;;  %v922_v11 = vsel %vm4421_vm2, %v917_v62, %v913_v61 }
 0x968   :  { %v919_v0 = vpop.permute.xlu1 %918  ;;  %v927_v1 = vpop.permute.xlu0 %926 }
 0x969   :  { %v921_v2 = vsel %vm4416_vm13, %v915_v59, %v919_v0  ;;  %v935_v6 = vsel %vm4419_vm12, %v931_v63, %v927_v1  ;;  %vm941_vm13 = vmxor %vm3043_vm7, %vm4354_vm6 }
 0x96a   :  { %v938_v9 = vsel %vm4415_vm0, %v921_v2, %v935_v6  ;;  %vm4422_vm12 = vmmov %vm4421_vm2 }
 0x96b   :  { %vm946_vm3 = vcmp.ge.f32.partialorder %v910_v56, %v938_v9  ;;  %v923_v14 = vsel %vm4422_vm12, %v919_v0, %v915_v59  ;;  %vm943_vm11 = vmxor %vm941_vm13, %vm1941_vm8 }
 0x96c   :  { %vm950_vm15 = vmxor %vm3162_vm9, %vm946_vm3  ;;  %vm4423_vm3 = vcmp.lt.s32.totalorder %v2002_v7, 8 }
 0x96d   :  { %vm954_vm10 = vmxor %vm950_vm15, %vm1941_vm8  ;;  %v933_v21 = vsel %vm4423_vm3, %v927_v1, %v931_v63 }
 0x96e   :  { %v958_v8 = vsel %vm954_vm10, %v910_v56, %v938_v9  ;;  %vm4424_vm15 = vmmov %vm4423_vm3  ;;  %v939_v27 = vsel %vm4354_vm6, %v923_v14, %v933_v21 }
 0x96f   :  { %962 = vrot.lane.b32.xlu1 %v958_v8, %s1944_s26  ;;  %vm4425_vm10 = vmmov %vm4423_vm3  ;;  %vm947_vm5 = vcmp.ge.f32.partialorder %v911_v57, %v939_v27 }
 0x970   :  { %v929_v12 = vpop.permute.xlu1 %928  ;;  %vm951_vm13 = vmxor %vm943_vm11, %vm947_vm5 }
 0x971   :  { %v932_v22 = vsel %vm4424_vm15, %v925_v60, %v929_v12  ;;  %v934_v23 = vsel %vm4425_vm10, %v929_v12, %v925_v60  ;;  %vm988_vm5 = vmxor %vm3018_vm1, %vm4304_vm14 }
 0x972   :  { %v936_v24 = vsel %vm4415_vm0, %v920_v10, %v934_v23  ;;  %v937_v25 = vsel %vm4354_vm6, %v922_v11, %v932_v22  ;;  %vm955_vm6 = vmxor %vm951_vm13, %vm1941_vm8 }
 0x973   :  { %vm944_vm2 = vcmp.ge.f32.partialorder %v3122_v43, %v936_v24  ;;  %vm945_vm12 = vcmp.ge.f32.partialorder %v909_v47, %v937_v25  ;;  %v959_v30 = vsel %vm955_vm6, %v911_v57, %v939_v27  ;;  %vm4426_vm6 = vcmp.lt.s32.totalorder %v2002_v7, 4 }
 0x974   :  { %vm948_vm3 = vmxor %vm3162_vm9, %vm944_vm2  ;;  %vm4429_vm9 = vcmp.lt.s32.totalorder %v2002_v7, 124 }
 0x975   :  { %vm949_vm15 = vmxor %vm943_vm11, %vm945_vm12 }
 0x976   :  { %vm953_vm10 = vmxor %vm949_vm15, %vm1941_vm8  ;;  %vm4431_vm15 = vnez %v4248_v46 }
 0x977   :  { %v957_v28 = vsel %vm953_vm10, %v909_v47, %v937_v25  ;;  %vm952_vm0 = vmxor %vm948_vm3, %vm1941_vm8 }
 0x978   :  { %964 = vrot.lane.b32.xlu2 %v957_v28, %s1944_s26  ;;  %v956_v29 = vsel %vm952_vm0, %v3122_v43, %v936_v24  ;;  %vm3218_vm0 = vmxor %vm988_vm5, %vm1941_vm8 }
 0x979   :  { %960 = vrot.lane.b32.xlu0 %v956_v29, %s1944_s26  ;;  %972 = vrot.lane.b32.xlu1 %v956_v29, %s1945_s27  ;;  %vm4430_vm3 = vmmov %vm4426_vm6 }
 0x97a   :  { %vm989_vm10 = vmxor %vm3043_vm7, %vm4431_vm15 }
 0x97b   :  { %vm4432_vm13 = vmmov %vm4429_vm9 }
 0x97c   :  { %vm4433_vm5 = vmmov %vm4429_vm9 }
 0x980   :  { %974 = vrot.lane.b32.xlu2 %v958_v8, %s1945_s27 }
 0x981   :  { %978 = vrot.lane.b32.xlu1 %v959_v30, %s1945_s27  ;;  %966 = vrot.lane.b32.xlu0 %v959_v30, %s1944_s26 }
 0x989   :  { %976 = vrot.lane.b32.xlu0 %v957_v28, %s1945_s27 }
 0x9d2   :  { %v965_v32 = vpop.permute.xlu2 %964 }
 0x9da   :  { %v975_v35 = vpop.permute.xlu2 %974 }
 0x9e1   :  { %v963_v31 = vpop.permute.xlu1 %962 }
 0x9eb   :  { %v973_v33 = vpop.permute.xlu1 %972  ;;  %v961_v34 = vpop.permute.xlu0 %960 }
 0x9ec   :  { %v968_v49 = vsel %vm4433_vm5, %v961_v34, %v965_v32 }
 0x9f3   :  { %v979_v36 = vpop.permute.xlu1 %978  ;;  %v967_v37 = vpop.permute.xlu0 %966 }
 0x9f4   :  { %v983_v38 = vsel %vm4426_vm6, %v979_v36, %v975_v35  ;;  %v969_v40 = vsel %vm4429_vm9, %v963_v31, %v967_v37  ;;  %v981_v43 = vsel %vm4430_vm3, %v975_v35, %v979_v36  ;;  %v971_v47 = vsel %vm4432_vm13, %v967_v37, %v963_v31  ;;  %vm4434_vm6 = vmmov %vm4433_vm5 }
 0x9f5   :  { %v986_v41 = vsel %vm4304_vm14, %v969_v40, %v983_v38  ;;  %v970_v50 = vsel %vm4434_vm6, %v965_v32, %v961_v34  ;;  %vm4435_vm9 = vmmov %vm4430_vm3  ;;  %v987_v56 = vsel %vm4431_vm15, %v971_v47, %v981_v43 }
 0x9f6   :  { %vm994_vm11 = vcmp.ge.f32.partialorder %v958_v8, %v986_v41  ;;  %vm995_vm6 = vcmp.ge.f32.partialorder %v959_v30, %v987_v56 }
 0x9f7   :  { %vm998_vm2 = vmxor %vm3218_vm0, %vm994_vm11 }
 0x9f8   :  { %vm1002_vm12 = vmxor %vm998_vm2, %vm1941_vm8 }
 0x9f9   :  { %v3229_v42 = vsel %vm1002_vm12, %v958_v8, %v986_v41  ;;  %vm4436_vm11 = vmmov %vm4430_vm3 }
 0x9fa   :  { %1010 = vrot.lane.b32.xlu0 %v3229_v42, %s1942_s24  ;;  %vm991_vm2 = vmxor %vm989_vm10, %vm1941_vm8 }
 0x9fb   :  { %v977_v48 = vpop.permute.xlu0 %976  ;;  %vm999_vm10 = vmxor %vm991_vm2, %vm995_vm6 }
 0x9fc   :  { %v980_v51 = vsel %vm4435_vm9, %v973_v33, %v977_v48  ;;  %v982_v52 = vsel %vm4436_vm11, %v977_v48, %v973_v33 }
 0x9fd   :  { %v984_v53 = vsel %vm4304_vm14, %v968_v49, %v982_v52  ;;  %v985_v54 = vsel %vm4431_vm15, %v970_v50, %v980_v51  ;;  %vm1003_vm15 = vmxor %vm999_vm10, %vm1941_vm8 }
 0x9fe   :  { %vm992_vm12 = vcmp.ge.f32.partialorder %v956_v29, %v984_v53  ;;  %vm993_vm3 = vcmp.ge.f32.partialorder %v957_v28, %v985_v54  ;;  %v1007_v60 = vsel %vm1003_vm15, %v959_v30, %v987_v56  ;;  %vm4438_vm15 = vnez %v4242_v19 }
 0x9ff   :  { %vm996_vm13 = vmxor %vm3218_vm0, %vm992_vm12  ;;  %vm4437_vm0 = vnez %v4238_v17 }
 0xa00   :  { %vm997_vm5 = vmxor %vm991_vm2, %vm993_vm3  ;;  %vm4439_vm3 = vcmp.lt.s32.totalorder %v2002_v7, 2 }
 0xa01   :  { %vm1000_vm9 = vmxor %vm996_vm13, %vm1941_vm8 }
 0xa02   :  { %v1004_v57 = vsel %vm1000_vm9, %v956_v29, %v984_v53  ;;  %vm1001_vm11 = vmxor %vm997_vm5, %vm1941_vm8  ;;  %vm4441_vm5 = vcmp.lt.s32.totalorder %v2002_v7, 126 }
 0xa03   :  { %1020 = vrot.lane.b32.xlu0 %v1004_v57, %s1943_s25  ;;  %1008 = vrot.lane.b32.xlu2 %v1004_v57, %s1942_s24  ;;  %v1005_v59 = vsel %vm1001_vm11, %v957_v28, %v985_v54  ;;  %vm1036_vm2 = vmxor %vm3018_vm1, %vm4437_vm0 }
 0xa04   :  { %1012 = vrot.lane.b32.xlu1 %v1005_v59, %s1942_s24  ;;  %vm1037_vm12 = vmxor %vm3043_vm7, %vm4438_vm15 }
 0xa05   :  { %vm4440_vm13 = vmmov %vm4439_vm3 }
 0xa06   :  { %vm4442_vm6 = vmmov %vm4441_vm5 }
 0xa07   :  { %vm3286_vm9 = vmxor %vm1036_vm2, %vm1941_vm8 }
 0xa08   :  { %vm3291_vm11 = vmxor %vm1037_vm12, %vm1941_vm8 }
 0xa0b   :  { %1026 = vrot.lane.b32.xlu0 %v1007_v60, %s1943_s25  ;;  %1014 = vrot.lane.b32.xlu2 %v1007_v60, %s1942_s24 }
 0xa0c   :  { %1022 = vrot.lane.b32.xlu1 %v3229_v42, %s1943_s25 }
 0xa13   :  { %1024 = vrot.lane.b32.xlu2 %v1005_v59, %s1943_s25 }
 0xa5d   :  { %v1009_v61 = vpop.permute.xlu2 %1008 }
 0xa65   :  { %v1015_v62 = vpop.permute.xlu2 %1014 }
 0xa6c   :  { %v1011_v63 = vpop.permute.xlu0 %1010 }
 0xa6d   :  { %v1025_v0 = vpop.permute.xlu2 %1024  ;;  %v1017_v25 = vsel %vm4442_vm6, %v1011_v63, %v1015_v62 }
 0xa75   :  { %v1021_v1 = vpop.permute.xlu0 %1020 }
 0xa76   :  { %v1013_v2 = vpop.permute.xlu1 %1012  ;;  %v1028_v5 = vsel %vm4439_vm3, %v1021_v1, %v1025_v0  ;;  %v1030_v6 = vsel %vm4440_vm13, %v1025_v0, %v1021_v1 }
 0xa77   :  { %v1016_v9 = vsel %vm4441_vm5, %v1009_v61, %v1013_v2  ;;  %v1018_v8 = vsel %vm4442_vm6, %v1013_v2, %v1009_v61  ;;  %v4462_v2 = vmov 0 }
 0xa78   :  { %v1032_v12 = vsel %vm4437_vm0, %v1016_v9, %v1030_v6  ;;  %v1033_v14 = vsel %vm4438_vm15, %v1018_v8, %v1028_v5 }
 0xa79   :  { %vm1040_vm10 = vcmp.ge.f32.partialorder %v1004_v57, %v1032_v12  ;;  %vm1041_vm3 = vcmp.ge.f32.partialorder %v1005_v59, %v1033_v14 }
 0xa7a   :  { %vm1044_vm13 = vmxor %vm3286_vm9, %vm1040_vm10 }
 0xa7b   :  { %vm1045_vm2 = vmxor %vm3291_vm11, %vm1041_vm3  ;;  %vm4448_vm3 = vcmp.lt.s32.totalorder %v2002_v7, 2 }
 0xa7c   :  { %vm1048_vm5 = vmxor %vm1044_vm13, %vm1941_vm8 }
 0xa7d   :  { %v3304_v21 = vsel %vm1048_vm5, %v1004_v57, %v1032_v12  ;;  %vm1049_vm12 = vmxor %vm1045_vm2, %vm1941_vm8  ;;  %v1027_v22 = vpop.permute.xlu0 %1026 }
 0xa7e   :  { %1056 = vrot.lane.b32.xlu1 %v3304_v21, %s1939_s0  ;;  %v1053_v23 = vsel %vm1049_vm12, %v1005_v59, %v1033_v14  ;;  %v1023_v24 = vpop.permute.xlu1 %1022  ;;  %vm4447_vm10 = vmmov %vm4442_vm6 }
 0xa7f   :  { %v1019_v27 = vsel %vm4447_vm10, %v1015_v62, %v1011_v63  ;;  %1060 = vrot.lane.b32.xlu0 %v1053_v23, %s1939_s0  ;;  %v1029_v28 = vsel %vm4448_vm3, %v1023_v24, %v1027_v22  ;;  %vm4449_vm13 = vmmov %vm4448_vm3 }
 0xa80   :  { %v1031_v29 = vsel %vm4449_vm13, %v1027_v22, %v1023_v24  ;;  %v1035_v31 = vsel %vm4438_vm15, %v1019_v27, %v1029_v28  ;;  %vm4451_vm13 = vcmp.lt.s32.totalorder %v2002_v7, 127 }
 0xa81   :  { %v1034_v30 = vsel %vm4437_vm0, %v1017_v25, %v1031_v29  ;;  %vm1043_vm5 = vcmp.ge.f32.partialorder %v1007_v60, %v1035_v31 }
 0xa82   :  { %vm1042_vm2 = vcmp.ge.f32.partialorder %v3229_v42, %v1034_v30  ;;  %vm1047_vm6 = vmxor %vm3291_vm11, %vm1043_vm5  ;;  %vm4454_vm5 = vcmp.lt.s32.totalorder %v2002_v7, 1 }
 0xa83   :  { %vm1046_vm12 = vmxor %vm3286_vm9, %vm1042_vm2  ;;  %vm4450_vm9 = vnez %v4236_v16 }
 0xa84   :  { %vm1050_vm10 = vmxor %vm1046_vm12, %vm1941_vm8 }
 0xa85   :  { %v1054_v32 = vsel %vm1050_vm10, %v3229_v42, %v1034_v30  ;;  %vm1051_vm3 = vmxor %vm1047_vm6, %vm1941_vm8 }
 0xa86   :  { %1058 = vrot.lane.b32.xlu2 %v1054_v32, %s1939_s0  ;;  %v1055_v33 = vsel %vm1051_vm3, %v1007_v60, %v1035_v31  ;;  %vm1084_vm11 = vmxor %vm3018_vm1, %vm4450_vm9 }
 0xa87   :  { %1070 = vrot.lane.b32.xlu0 %v1054_v32, %s1940_s1  ;;  %1062 = vrot.lane.b32.xlu1 %v1055_v33, %s1939_s0  ;;  %vm3344_vm2 = vmxor %vm1084_vm11, %vm1941_vm8 }
 0xa88   :  { %vm4455_vm3 = vmmov %vm4451_vm13 }
 0xa89   :  { %vm4456_vm11 = vmmov %vm4455_vm3 }
 0xa8e   :  { %1068 = vrot.lane.b32.xlu2 %v3304_v21, %s1940_s1 }
 0xa8f   :  { %1072 = vrot.lane.b32.xlu1 %v1053_v23, %s1940_s1 }
 0xa96   :  { %1074 = vrot.lane.b32.xlu2 %v1055_v33, %s1940_s1 }
 0xae0   :  { %v1059_v34 = vpop.permute.xlu2 %1058 }
 0xae8   :  { %v1069_v35 = vpop.permute.xlu2 %1068 }
 0xaf0   :  { %v1057_v36 = vpop.permute.xlu1 %1056  ;;  %v1075_v38 = vpop.permute.xlu2 %1074 }
 0xaf1   :  { %v1061_v37 = vpop.permute.xlu0 %1060 }
 0xaf2   :  { %v1064_v49 = vsel %vm4455_vm3, %v1057_v36, %v1061_v37  ;;  %v1066_v50 = vsel %vm4456_vm11, %v1061_v37, %v1057_v36  ;;  %v4468_v37 = vmov 0 }
 0xaf9   :  { %v1063_v39 = vpop.permute.xlu1 %1062  ;;  %v1071_v40 = vpop.permute.xlu0 %1070 }
 0xafa   :  { %v1065_v41 = vsel %vm4451_vm13, %v1059_v34, %v1063_v39  ;;  %v1079_v43 = vsel %vm4454_vm5, %v1075_v38, %v1071_v40  ;;  %vm4457_vm13 = vnez %v4240_v18 }
 0xafb   :  { %v1082_v47 = vsel %vm4450_vm9, %v1065_v41, %v1079_v43  ;;  %vm1085_vm5 = vmxor %vm3043_vm7, %vm4457_vm13 }
 0xafc   :  { %vm1090_vm12 = vcmp.ge.f32.partialorder %v1054_v32, %v1082_v47  ;;  %vm1087_vm11 = vmxor %vm1085_vm5, %vm1941_vm8 }
 0xafd   :  { %vm1094_vm6 = vmxor %vm3344_vm2, %vm1090_vm12 }
 0xafe   :  { %vm1098_vm10 = vmxor %vm1094_vm6, %vm1941_vm8  ;;  %vm4459_vm6 = vcmp.lt.s32.totalorder %v2002_v7, 1 }
 0xaff   :  { %v3355_v48 = vsel %vm1098_vm10, %v1054_v32, %v1082_v47  ;;  %vm4458_vm12 = vmmov %vm4455_vm3  ;;  %v1077_v53 = vsel %vm4459_vm6, %v1071_v40, %v1075_v38 }
 0xb00   :  { %1106 = vrot.lane.b32.xlu1 %v3355_v48, %s1951_s6  ;;  %v1067_v52 = vsel %vm4458_vm12, %v1063_v39, %v1059_v34  ;;  %vm4460_vm10 = vmmov %vm4459_vm6 }
 0xb01   :  { %v1073_v51 = vpop.permute.xlu1 %1072  ;;  %vm4461_vm3 = vmmov %vm4459_vm6  ;;  %v1083_v60 = vsel %vm4457_vm13, %v1067_v52, %v1077_v53 }
 0xb02   :  { %v1076_v54 = vsel %vm4460_vm10, %v1069_v35, %v1073_v51  ;;  %v1078_v56 = vsel %vm4461_vm3, %v1073_v51, %v1069_v35  ;;  %vm1091_vm0 = vcmp.ge.f32.partialorder %v1055_v33, %v1083_v60 }
 0xb03   :  { %v1080_v57 = vsel %vm4450_vm9, %v1064_v49, %v1078_v56  ;;  %v1081_v59 = vsel %vm4457_vm13, %v1066_v50, %v1076_v54  ;;  %vm1095_vm5 = vmxor %vm1087_vm11, %vm1091_vm0 }
 0xb04   :  { %vm1088_vm15 = vcmp.ge.f32.partialorder %v3304_v21, %v1080_v57  ;;  %vm1089_vm12 = vcmp.ge.f32.partialorder %v1053_v23, %v1081_v59  ;;  %vm1099_vm14 = vmxor %vm1095_vm5, %vm1941_vm8 }
 0xb05   :  { %vm1092_vm6 = vmxor %vm3344_vm2, %vm1088_vm15  ;;  %v1103_v63 = vsel %vm1099_vm14, %v1055_v33, %v1083_v60  ;;  %vm4209_vm15 = vcmp.lt.s32.totalorder %v2002_v7, 64 }
 0xb06   :  { %vm1093_vm10 = vmxor %vm1087_vm11, %vm1089_vm12 }
 0xb07   :  { %vm1097_vm3 = vmxor %vm1093_vm10, %vm1941_vm8 }
 0xb08   :  { %v1101_v61 = vsel %vm1097_vm3, %v1053_v23, %v1081_v59  ;;  %vm1096_vm9 = vmxor %vm1092_vm6, %vm1941_vm8 }
 0xb09   :  { %1108 = vrot.lane.b32.xlu2 %v1101_v61, %s1951_s6  ;;  %v1100_v62 = vsel %vm1096_vm9, %v3304_v21, %v1080_v57  ;;  %vm1121_vm2 = vmxor %vm1941_vm8, %vm3018_vm1 }
 0xb0a   :  { %1104 = vrot.lane.b32.xlu0 %v1100_v62, %s1951_s6  ;;  %vm3397_vm12 = vmxor %vm1121_vm2, %vm1941_vm8 }
 0xb0b   :  { %v4463_v2 = vsel %vm3397_vm12, 4294967295, %v4462_v2  ;;  %vm3408_vm14 = vmxor %vm3043_vm7, %vm1941_vm8 }
 0xb12   :  { %1110 = vrot.lane.b32.xlu0 %v1103_v63, %s1951_s6 }
 0xb63   :  { %v1109_v0 = vpop.permute.xlu2 %1108 }
 0xb72   :  { %v1107_v12 = vpop.permute.xlu1 %1106 }
 0xb7c   :  { %v1105_v1 = vpop.permute.xlu0 %1104 }
 0xb7d   :  { %v1113_v5 = vsel %vm4209_vm15, %v1105_v1, %v1109_v0  ;;  %v1115_v6 = vsel %vm4209_vm15, %v1109_v0, %v1105_v1 }
 0xb7e   :  { %v1117_v8 = vsel %vm3018_vm1, %v1113_v5, %v1115_v6  ;;  %v1118_v10 = vsel %vm3043_vm7, %v1115_v6, %v1113_v5  ;;  %v4477_v6 = vmov 0 }
 0xb7f   :  { %vm1125_vm0 = vcmp.ge.f32.partialorder %v1100_v62, %v1117_v8  ;;  %vm1126_vm9 = vcmp.ge.f32.partialorder %v1101_v61, %v1118_v10 }
 0xb80   :  { %vm1129_vm11 = vmxor %vm3397_vm12, %vm1125_vm0 }
 0xb81   :  { %vm1130_vm6 = vmxor %vm3408_vm14, %vm1126_vm9 }
 0xb82   :  { %vm1134_vm10 = vmxor %vm1130_vm6, %vm1941_vm8 }
 0xb83   :  { %v1138_v11 = vsel %vm1134_vm10, %v1101_v61, %v1118_v10  ;;  %vm1133_vm3 = vmxor %vm1129_vm11, %vm1941_vm8 }
 0xb84   :  { %1145 = vrot.lane.b32.xlu0 %v1138_v11, %s1949_s4  ;;  %v1137_v14 = vsel %vm1133_vm3, %v1100_v62, %v1117_v8  ;;  %v1111_v21 = vpop.permute.xlu0 %1110  ;;  %vm4467_vm3 = vcmp.lt.s32.totalorder %v2002_v7, 96 }
 0xb85   :  { %1141 = vrot.lane.b32.xlu1 %v1137_v14, %s1949_s4  ;;  %v1114_v22 = vsel %vm4209_vm15, %v1107_v12, %v1111_v21  ;;  %v1116_v23 = vsel %vm4209_vm15, %v1111_v21, %v1107_v12 }
 0xb86   :  { %v1119_v24 = vsel %vm3018_vm1, %v1114_v22, %v1116_v23  ;;  %v1120_v25 = vsel %vm3043_vm7, %v1116_v23, %v1114_v22 }
 0xb87   :  { %vm1127_vm5 = vcmp.ge.f32.partialorder %v3355_v48, %v1119_v24  ;;  %vm1128_vm2 = vcmp.ge.f32.partialorder %v1103_v63, %v1120_v25 }
 0xb88   :  { %vm1131_vm0 = vmxor %vm3397_vm12, %vm1127_vm5 }
 0xb89   :  { %vm1132_vm9 = vmxor %vm3408_vm14, %vm1128_vm2  ;;  %vm4466_vm14 = vnez %v4339_v15  ;;  %vm4470_vm2 = vcmp.lt.s32.totalorder %v2002_v7, 32 }
 0xb8a   :  { %vm1136_vm11 = vmxor %vm1132_vm9, %vm1941_vm8 }
 0xb8b   :  { %v1140_v27 = vsel %vm1136_vm11, %v1103_v63, %v1120_v25  ;;  %vm1135_vm6 = vmxor %vm1131_vm0, %vm1941_vm8 }
 0xb8c   :  { %v1139_v28 = vsel %vm1135_vm6, %v3355_v48, %v1119_v24  ;;  %vm1169_vm10 = vmxor %vm1941_vm8, %vm4466_vm14 }
 0xb8d   :  { %1147 = vrot.lane.b32.xlu1 %v1140_v27, %s1949_s4  ;;  %1155 = vrot.lane.b32.xlu0 %v1139_v28, %s1950_s5  ;;  %vm3452_vm5 = vmxor %vm1169_vm10, %vm1941_vm8 }
 0xb8e   :  { %1143 = vrot.lane.b32.xlu2 %v1139_v28, %s1949_s4  ;;  %v4469_v37 = vsel %vm3452_vm5, 4294967295, %v4468_v37  ;;  %vm4471_vm6 = vmmov %vm4467_vm3 }
 0xb8f   :  { %vm4472_vm10 = vmmov %vm4467_vm3 }
 0xb95   :  { %1157 = vrot.lane.b32.xlu1 %v1138_v11, %s1950_s5 }
 0xb96   :  { %1153 = vrot.lane.b32.xlu2 %v1137_v14, %s1950_s5 }
 0xb9e   :  { %1159 = vrot.lane.b32.xlu2 %v1140_v27, %s1950_s5 }
 0xbe8   :  { %v1144_v29 = vpop.permute.xlu2 %1143 }
 0xbf0   :  { %v1154_v30 = vpop.permute.xlu2 %1153 }
 0xbf6   :  { %v1146_v31 = vpop.permute.xlu0 %1145 }
 0xbf7   :  { %v1142_v32 = vpop.permute.xlu1 %1141 }
 0xbf8   :  { %v1160_v33 = vpop.permute.xlu2 %1159  ;;  %v1149_v41 = vsel %vm4471_vm6, %v1142_v32, %v1146_v31  ;;  %v1151_v42 = vsel %vm4472_vm10, %v1146_v31, %v1142_v32 }
 0xbff   :  { %v1148_v34 = vpop.permute.xlu1 %1147  ;;  %v1156_v35 = vpop.permute.xlu0 %1155 }
 0xc00   :  { %v1150_v36 = vsel %vm4467_vm3, %v1144_v29, %v1148_v34  ;;  %v1164_v38 = vsel %vm4470_vm2, %v1160_v33, %v1156_v35  ;;  %v1152_v47 = vsel %vm4467_vm3, %v1148_v34, %v1144_v29  ;;  %v1162_v48 = vsel %vm4470_vm2, %v1156_v35, %v1160_v33 }
 0xc01   :  { %v1167_v39 = vsel %vm4466_vm14, %v1150_v36, %v1164_v38 }
 0xc02   :  { %vm1175_vm0 = vcmp.ge.f32.partialorder %v1139_v28, %v1167_v39 }
 0xc03   :  { %vm1179_vm9 = vmxor %vm3452_vm5, %vm1175_vm0 }
 0xc04   :  { %vm1183_vm11 = vmxor %vm1179_vm9, %vm1941_vm8 }
 0xc05   :  { %v1187_v40 = vsel %vm1183_vm11, %v1139_v28, %v1167_v39  ;;  %vm4473_vm0 = vmmov %vm4470_vm2  ;;  %vm4475_vm11 = vnez %v4341_v20 }
 0xc06   :  { %1191 = vrot.lane.b32.xlu1 %v1187_v40, %s1948_s30  ;;  %vm4474_vm9 = vmmov %vm4473_vm0  ;;  %v1168_v53 = vsel %vm4475_vm11, %v1152_v47, %v1162_v48 }
 0xc07   :  { %v1158_v43 = vpop.permute.xlu1 %1157  ;;  %vm1172_vm6 = vmxor %vm4475_vm11, %vm1941_vm8  ;;  %vm1176_vm15 = vcmp.ge.f32.partialorder %v1140_v27, %v1168_v53 }
 0xc08   :  { %v1161_v49 = vsel %vm4473_vm0, %v1154_v30, %v1158_v43  ;;  %v1163_v50 = vsel %vm4474_vm9, %v1158_v43, %v1154_v30  ;;  %vm1180_vm12 = vmxor %vm1172_vm6, %vm1176_vm15  ;;  %vm4476_vm15 = vcmp.lt.s32.totalorder %v2002_v7, 16  ;;  %v4492_v43 = vmov 0 }
 0xc09   :  { %v1165_v51 = vsel %vm4466_vm14, %v1149_v41, %v1163_v50  ;;  %v1166_v52 = vsel %vm4475_vm11, %v1151_v42, %v1161_v49  ;;  %vm1184_vm11 = vmxor %vm1180_vm12, %vm1941_vm8 }
 0xc0a   :  { %vm1173_vm10 = vcmp.ge.f32.partialorder %v1137_v14, %v1165_v51  ;;  %vm1174_vm3 = vcmp.ge.f32.partialorder %v1138_v11, %v1166_v52  ;;  %v1188_v57 = vsel %vm1184_vm11, %v1140_v27, %v1168_v53  ;;  %vm4479_vm11 = vcmp.lt.s32.totalorder %v2002_v7, 112 }
 0xc0b   :  { %vm1177_vm2 = vmxor %vm3452_vm5, %vm1173_vm10  ;;  %vm4534_vm5 = vcmp.lt.s32.totalorder %v2002_v7, 1 }
 0xc0c   :  { %vm1178_vm0 = vmxor %vm1172_vm6, %vm1174_vm3 }
 0xc0d   :  { %vm1182_vm9 = vmxor %vm1178_vm0, %vm1941_vm8 }
 0xc0e   :  { %v1186_v54 = vsel %vm1182_vm9, %v1138_v11, %v1166_v52  ;;  %vm1181_vm14 = vmxor %vm1177_vm2, %vm1941_vm8 }
 0xc0f   :  { %1193 = vrot.lane.b32.xlu2 %v1186_v54, %s1948_s30  ;;  %v1185_v56 = vsel %vm1181_vm14, %v1137_v14, %v1165_v51  ;;  %vm1217_vm14 = vmxor %vm1941_vm8, %vm4402_vm4 }
 0xc10   :  { %1189 = vrot.lane.b32.xlu0 %v1185_v56, %s1948_s30  ;;  %1201 = vrot.lane.b32.xlu1 %v1185_v56, %s1937_s21  ;;  %vm3503_vm12 = vmxor %vm1217_vm14, %vm1941_vm8 }
 0xc11   :  { %v4478_v6 = vsel %vm3503_vm12, 4294967295, %v4477_v6  ;;  %vm4480_vm2 = vmmov %vm4476_vm15 }
 0xc12   :  { %vm4481_vm0 = vmmov %vm4479_vm11 }
 0xc13   :  { %vm4482_vm9 = vmmov %vm4481_vm0 }
 0xc14   :  { %vm4483_vm14 = vmmov %vm4481_vm0 }
 0xc17   :  { %1203 = vrot.lane.b32.xlu2 %v1187_v40, %s1937_s21 }
 0xc18   :  { %1207 = vrot.lane.b32.xlu1 %v1188_v57, %s1937_s21  ;;  %1195 = vrot.lane.b32.xlu0 %v1188_v57, %s1948_s30 }
 0xc20   :  { %1205 = vrot.lane.b32.xlu0 %v1186_v54, %s1937_s21 }
 0xc69   :  { %v1194_v60 = vpop.permute.xlu2 %1193 }
 0xc71   :  { %v1204_v63 = vpop.permute.xlu2 %1203 }
 0xc78   :  { %v1192_v59 = vpop.permute.xlu1 %1191 }
 0xc82   :  { %v1202_v61 = vpop.permute.xlu1 %1201  ;;  %v1190_v62 = vpop.permute.xlu0 %1189 }
 0xc83   :  { %v1197_v21 = vsel %vm4482_vm9, %v1190_v62, %v1194_v60  ;;  %v1199_v22 = vsel %vm4483_vm14, %v1194_v60, %v1190_v62 }
 0xc8a   :  { %v1208_v0 = vpop.permute.xlu1 %1207  ;;  %v1196_v1 = vpop.permute.xlu0 %1195 }
 0xc8b   :  { %v1212_v5 = vsel %vm4476_vm15, %v1208_v0, %v1204_v63  ;;  %v1198_v9 = vsel %vm4479_vm11, %v1192_v59, %v1196_v1  ;;  %v1210_v11 = vsel %vm4480_vm2, %v1204_v63, %v1208_v0  ;;  %v1200_v12 = vsel %vm4481_vm0, %v1196_v1, %v1192_v59  ;;  %vm4484_vm15 = vmmov %vm4480_vm2 }
 0xc8c   :  { %v1215_v8 = vsel %vm4402_vm4, %v1198_v9, %v1212_v5  ;;  %vm4485_vm11 = vmmov %vm4480_vm2 }
 0xc8d   :  { %vm1223_vm6 = vcmp.ge.f32.partialorder %v1187_v40, %v1215_v8 }
 0xc8e   :  { %vm1227_vm10 = vmxor %vm3503_vm12, %vm1223_vm6  ;;  %vm4486_vm6 = vnez %v4303_v26 }
 0xc8f   :  { %vm1231_vm3 = vmxor %vm1227_vm10, %vm1941_vm8  ;;  %v1216_v28 = vsel %vm4486_vm6, %v1200_v12, %v1210_v11 }
 0xc90   :  { %v3514_v10 = vsel %vm1231_vm3, %v1187_v40, %v1215_v8  ;;  %vm1220_vm10 = vmxor %vm4486_vm6, %vm1941_vm8  ;;  %vm1224_vm14 = vcmp.ge.f32.partialorder %v1188_v57, %v1216_v28 }
 0xc91   :  { %1239 = vrot.lane.b32.xlu0 %v3514_v10, %s1946_s28 }
 0xc92   :  { %v1206_v14 = vpop.permute.xlu0 %1205 }
 0xc93   :  { %v1209_v23 = vsel %vm4484_vm15, %v1202_v61, %v1206_v14  ;;  %v1211_v24 = vsel %vm4485_vm11, %v1206_v14, %v1202_v61  ;;  %v4503_v14 = vmov 0 }
 0xc94   :  { %v1213_v25 = vsel %vm4402_vm4, %v1197_v21, %v1211_v24  ;;  %v1214_v27 = vsel %vm4486_vm6, %v1199_v22, %v1209_v23  ;;  %vm1228_vm4 = vmxor %vm1220_vm10, %vm1224_vm14  ;;  %vm4494_vm14 = vnez %v4273_v55 }
 0xc95   :  { %vm1221_vm3 = vcmp.ge.f32.partialorder %v1185_v56, %v1213_v25  ;;  %vm1222_vm2 = vcmp.ge.f32.partialorder %v1186_v54, %v1214_v27  ;;  %vm1232_vm6 = vmxor %vm1228_vm4, %vm1941_vm8  ;;  %vm4488_vm4 = vcmp.lt.s32.totalorder %v2002_v7, 8 }
 0xc96   :  { %vm1225_vm0 = vmxor %vm3503_vm12, %vm1221_vm3  ;;  %v1236_v31 = vsel %vm1232_vm6, %v1188_v57, %v1216_v28  ;;  %vm4487_vm3 = vnez %v4269_v44  ;;  %vm4497_vm12 = vcmp.lt.s32.totalorder %v2002_v7, 120 }
 0xc97   :  { %vm1226_vm9 = vmxor %vm1220_vm10, %vm1222_vm2  ;;  %vm4490_vm2 = vcmp.lt.s32.totalorder %v2002_v7, 120 }
 0xc98   :  { %vm1229_vm15 = vmxor %vm1225_vm0, %vm1941_vm8 }
 0xc99   :  { %v1233_v29 = vsel %vm1229_vm15, %v1185_v56, %v1213_v25  ;;  %vm1230_vm11 = vmxor %vm1226_vm9, %vm1941_vm8 }
 0xc9a   :  { %1249 = vrot.lane.b32.xlu0 %v1233_v29, %s1947_s29  ;;  %1237 = vrot.lane.b32.xlu2 %v1233_v29, %s1946_s28  ;;  %v1234_v30 = vsel %vm1230_vm11, %v1186_v54, %v1214_v27  ;;  %vm1265_vm10 = vmxor %vm1941_vm8, %vm4487_vm3 }
 0xc9b   :  { %1241 = vrot.lane.b32.xlu1 %v1234_v30, %s1946_s28  ;;  %vm4489_vm6 = vmmov %vm4488_vm4 }
 0xc9c   :  { %vm4491_vm0 = vmmov %vm4490_vm2 }
 0xc9d   :  { %vm3564_vm9 = vmxor %vm1265_vm10, %vm1941_vm8 }
 0xc9e   :  { %v4493_v43 = vsel %vm3564_vm9, 4294967295, %v4492_v43  ;;  %vm3571_vm15 = vmxor %vm4494_vm14, %vm1941_vm8 }
 0xca2   :  { %1255 = vrot.lane.b32.xlu0 %v1236_v31, %s1947_s29  ;;  %1243 = vrot.lane.b32.xlu2 %v1236_v31, %s1946_s28 }
 0xca3   :  { %1251 = vrot.lane.b32.xlu1 %v3514_v10, %s1947_s29 }
 0xcaa   :  { %1253 = vrot.lane.b32.xlu2 %v1234_v30, %s1947_s29 }
 0xcf4   :  { %v1238_v32 = vpop.permute.xlu2 %1237 }
 0xcfc   :  { %v1244_v33 = vpop.permute.xlu2 %1243 }
 0xd03   :  { %v1240_v34 = vpop.permute.xlu0 %1239 }
 0xd04   :  { %v1254_v35 = vpop.permute.xlu2 %1253  ;;  %v1246_v54 = vsel %vm4497_vm12, %v1240_v34, %v1244_v33 }
 0xd0c   :  { %v1250_v36 = vpop.permute.xlu0 %1249 }
 0xd0d   :  { %v1242_v38 = vpop.permute.xlu1 %1241  ;;  %v1257_v39 = vsel %vm4488_vm4, %v1250_v36, %v1254_v35  ;;  %v1259_v40 = vsel %vm4489_vm6, %v1254_v35, %v1250_v36 }
 0xd0e   :  { %v1245_v41 = vsel %vm4490_vm2, %v1238_v32, %v1242_v38  ;;  %v1247_v42 = vsel %vm4491_vm0, %v1242_v38, %v1238_v32 }
 0xd0f   :  { %v1261_v48 = vsel %vm4487_vm3, %v1245_v41, %v1259_v40  ;;  %v1262_v49 = vsel %vm4494_vm14, %v1247_v42, %v1257_v39 }
 0xd10   :  { %vm1269_vm11 = vcmp.ge.f32.partialorder %v1233_v29, %v1261_v48  ;;  %vm1270_vm4 = vcmp.ge.f32.partialorder %v1234_v30, %v1262_v49 }
 0xd11   :  { %vm1273_vm10 = vmxor %vm3564_vm9, %vm1269_vm11 }
 0xd12   :  { %vm1274_vm6 = vmxor %vm3571_vm15, %vm1270_vm4  ;;  %vm4499_vm4 = vcmp.lt.s32.totalorder %v2002_v7, 8 }
 0xd13   :  { %vm1277_vm2 = vmxor %vm1273_vm10, %vm1941_vm8 }
 0xd14   :  { %v3584_v50 = vsel %vm1277_vm2, %v1233_v29, %v1261_v48  ;;  %vm1278_vm0 = vmxor %vm1274_vm6, %vm1941_vm8  ;;  %v1256_v51 = vpop.permute.xlu0 %1255 }
 0xd15   :  { %1285 = vrot.lane.b32.xlu1 %v3584_v50, %s1944_s26  ;;  %v1282_v52 = vsel %vm1278_vm0, %v1234_v30, %v1262_v49  ;;  %v1252_v53 = vpop.permute.xlu1 %1251  ;;  %vm4498_vm11 = vmmov %vm4497_vm12 }
 0xd16   :  { %v1248_v56 = vsel %vm4498_vm11, %v1244_v33, %v1240_v34  ;;  %1289 = vrot.lane.b32.xlu0 %v1282_v52, %s1944_s26  ;;  %v1258_v57 = vsel %vm4499_vm4, %v1252_v53, %v1256_v51  ;;  %vm4500_vm10 = vmmov %vm4499_vm4 }
 0xd17   :  { %v1260_v59 = vsel %vm4500_vm10, %v1256_v51, %v1252_v53  ;;  %v1264_v61 = vsel %vm4494_vm14, %v1248_v56, %v1258_v57  ;;  %vm4508_vm14 = vcmp.lt.s32.totalorder %v2002_v7, 4  ;;  %v4514_v51 = vmov 0 }
 0xd18   :  { %v1263_v60 = vsel %vm4487_vm3, %v1246_v54, %v1260_v59  ;;  %vm1272_vm12 = vcmp.ge.f32.partialorder %v1236_v31, %v1264_v61 }
 0xd19   :  { %vm1271_vm6 = vcmp.ge.f32.partialorder %v3514_v10, %v1263_v60  ;;  %vm1276_vm0 = vmxor %vm3571_vm15, %vm1272_vm12  ;;  %vm4501_vm15 = vnez %v4246_v45 }
 0xd1a   :  { %vm1275_vm2 = vmxor %vm3564_vm9, %vm1271_vm6  ;;  %vm4502_vm6 = vcmp.lt.s32.totalorder %v2002_v7, 124 }
 0xd1b   :  { %vm1279_vm11 = vmxor %vm1275_vm2, %vm1941_vm8  ;;  %vm4505_vm2 = vcmp.lt.s32.totalorder %v2002_v7, 4 }
 0xd1c   :  { %v1283_v62 = vsel %vm1279_vm11, %v3514_v10, %v1263_v60  ;;  %vm1280_vm4 = vmxor %vm1276_vm0, %vm1941_vm8 }
 0xd1d   :  { %1287 = vrot.lane.b32.xlu2 %v1283_v62, %s1944_s26  ;;  %v1284_v63 = vsel %vm1280_vm4, %v1236_v31, %v1264_v61  ;;  %vm1313_vm10 = vmxor %vm1941_vm8, %vm4501_vm15 }
 0xd1e   :  { %1299 = vrot.lane.b32.xlu0 %v1283_v62, %s1945_s27  ;;  %1291 = vrot.lane.b32.xlu1 %v1284_v63, %s1944_s26  ;;  %vm3623_vm12 = vmxor %vm1313_vm10, %vm1941_vm8 }
 0xd1f   :  { %v4504_v14 = vsel %vm3623_vm12, 4294967295, %v4503_v14  ;;  %vm4506_vm10 = vmmov %vm4502_vm6 }
 0xd25   :  { %1297 = vrot.lane.b32.xlu2 %v3584_v50, %s1945_s27 }
 0xd26   :  { %1301 = vrot.lane.b32.xlu1 %v1282_v52, %s1945_s27 }
 0xd2d   :  { %1303 = vrot.lane.b32.xlu2 %v1284_v63, %s1945_s27 }
 0xd77   :  { %v1288_v0 = vpop.permute.xlu2 %1287 }
 0xd7f   :  { %v1298_v1 = vpop.permute.xlu2 %1297 }
 0xd87   :  { %v1286_v5 = vpop.permute.xlu1 %1285  ;;  %v1304_v8 = vpop.permute.xlu2 %1303 }
 0xd88   :  { %v1290_v9 = vpop.permute.xlu0 %1289 }
 0xd89   :  { %v1293_v24 = vsel %vm4502_vm6, %v1286_v5, %v1290_v9  ;;  %v1295_v25 = vsel %vm4506_vm10, %v1290_v9, %v1286_v5 }
 0xd90   :  { %v1292_v10 = vpop.permute.xlu1 %1291  ;;  %v1300_v11 = vpop.permute.xlu0 %1299 }
 0xd91   :  { %v1294_v12 = vsel %vm4502_vm6, %v1288_v0, %v1292_v10  ;;  %v1308_v21 = vsel %vm4505_vm2, %v1304_v8, %v1300_v11  ;;  %vm4507_vm2 = vmmov %vm4502_vm6  ;;  %v1306_v29 = vsel %vm4508_vm14, %v1300_v11, %v1304_v8 }
 0xd92   :  { %v1311_v22 = vsel %vm4501_vm15, %v1294_v12, %v1308_v21  ;;  %v1296_v28 = vsel %vm4507_vm2, %v1292_v10, %v1288_v0 }
 0xd93   :  { %vm1319_vm0 = vcmp.ge.f32.partialorder %v1283_v62, %v1311_v22 }
 0xd94   :  { %vm1323_vm11 = vmxor %vm3623_vm12, %vm1319_vm0 }
 0xd95   :  { %vm1327_vm4 = vmxor %vm1323_vm11, %vm1941_vm8 }
 0xd96   :  { %v1331_v23 = vsel %vm1327_vm4, %v1283_v62, %v1311_v22  ;;  %vm4509_vm0 = vmmov %vm4508_vm14  ;;  %vm4511_vm4 = vnez %v4248_v46 }
 0xd97   :  { %1335 = vrot.lane.b32.xlu1 %v1331_v23, %s1942_s24  ;;  %vm4510_vm11 = vmmov %vm4509_vm0  ;;  %v1312_v34 = vsel %vm4511_vm4, %v1296_v28, %v1306_v29 }
 0xd98   :  { %v1302_v27 = vpop.permute.xlu1 %1301  ;;  %vm1316_vm6 = vmxor %vm4511_vm4, %vm1941_vm8 }
 0xd99   :  { %v1305_v30 = vsel %vm4509_vm0, %v1298_v1, %v1302_v27  ;;  %v1307_v31 = vsel %vm4510_vm11, %v1302_v27, %v1298_v1 }
 0xd9a   :  { %v1309_v32 = vsel %vm4501_vm15, %v1293_v24, %v1307_v31  ;;  %v1310_v33 = vsel %vm4511_vm4, %v1295_v25, %v1305_v30  ;;  %vm1320_vm15 = vcmp.ge.f32.partialorder %v1284_v63, %v1312_v34  ;;  %v4529_v30 = vmov 0 }
 0xd9b   :  { %vm1317_vm10 = vcmp.ge.f32.partialorder %v3584_v50, %v1309_v32  ;;  %vm1318_vm2 = vcmp.ge.f32.partialorder %v1282_v52, %v1310_v33  ;;  %vm1324_vm3 = vmxor %vm1316_vm6, %vm1320_vm15 }
 0xd9c   :  { %vm1321_vm14 = vmxor %vm3623_vm12, %vm1317_vm10 }
 0xd9d   :  { %vm1322_vm0 = vmxor %vm1316_vm6, %vm1318_vm2 }
 0xd9e   :  { %vm1326_vm11 = vmxor %vm1322_vm0, %vm1941_vm8 }
 0xd9f   :  { %v1330_v35 = vsel %vm1326_vm11, %v1282_v52, %v1310_v33  ;;  %vm1325_vm9 = vmxor %vm1321_vm14, %vm1941_vm8 }
 0xda0   :  { %1337 = vrot.lane.b32.xlu2 %v1330_v35, %s1942_s24  ;;  %v1329_v36 = vsel %vm1325_vm9, %v3584_v50, %v1309_v32  ;;  %vm1328_vm4 = vmxor %vm1324_vm3, %vm1941_vm8  ;;  %vm4512_vm9 = vnez %v4238_v17  ;;  %vm4513_vm3 = vcmp.lt.s32.totalorder %v2002_v7, 2 }
 0xda1   :  { %1333 = vrot.lane.b32.xlu0 %v1329_v36, %s1942_s24  ;;  %1345 = vrot.lane.b32.xlu1 %v1329_v36, %s1943_s25  ;;  %v1332_v38 = vsel %vm1328_vm4, %v1284_v63, %v1312_v34  ;;  %vm1361_vm10 = vmxor %vm1941_vm8, %vm4512_vm9  ;;  %vm4516_vm4 = vcmp.lt.s32.totalorder %v2002_v7, 126 }
 0xda2   :  { %vm3676_vm15 = vmxor %vm1361_vm10, %vm1941_vm8 }
 0xda3   :  { %v4515_v51 = vsel %vm3676_vm15, 4294967295, %v4514_v51  ;;  %vm4517_vm0 = vmmov %vm4513_vm3 }
 0xda4   :  { %vm4518_vm11 = vmmov %vm4516_vm4 }
 0xda5   :  { %vm4519_vm10 = vmmov %vm4516_vm4 }
 0xda8   :  { %1347 = vrot.lane.b32.xlu2 %v1331_v23, %s1943_s25 }
 0xda9   :  { %1351 = vrot.lane.b32.xlu1 %v1332_v38, %s1943_s25  ;;  %1339 = vrot.lane.b32.xlu0 %v1332_v38, %s1942_s24 }
 0xdb1   :  { %1349 = vrot.lane.b32.xlu0 %v1330_v35, %s1943_s25 }
 0xdfa   :  { %v1338_v40 = vpop.permute.xlu2 %1337 }
 0xe02   :  { %v1348_v47 = vpop.permute.xlu2 %1347 }
 0xe09   :  { %v1336_v39 = vpop.permute.xlu1 %1335 }
 0xe13   :  { %v1346_v41 = vpop.permute.xlu1 %1345  ;;  %v1334_v42 = vpop.permute.xlu0 %1333 }
 0xe14   :  { %v1341_v60 = vsel %vm4519_vm10, %v1334_v42, %v1338_v40 }
 0xe1b   :  { %v1352_v48 = vpop.permute.xlu1 %1351  ;;  %v1340_v49 = vpop.permute.xlu0 %1339 }
 0xe1c   :  { %v1356_v50 = vsel %vm4513_vm3, %v1352_v48, %v1348_v47  ;;  %v1342_v52 = vsel %vm4516_vm4, %v1336_v39, %v1340_v49  ;;  %v1354_v56 = vsel %vm4517_vm0, %v1348_v47, %v1352_v48  ;;  %v1344_v57 = vsel %vm4518_vm11, %v1340_v49, %v1336_v39  ;;  %vm4520_vm3 = vmmov %vm4516_vm4 }
 0xe1d   :  { %v1359_v53 = vsel %vm4512_vm9, %v1342_v52, %v1356_v50  ;;  %v1343_v61 = vsel %vm4520_vm3, %v1338_v40, %v1334_v42  ;;  %vm4521_vm4 = vmmov %vm4517_vm0 }
 0xe1e   :  { %vm1367_vm6 = vcmp.ge.f32.partialorder %v1331_v23, %v1359_v53 }
 0xe1f   :  { %vm1371_vm2 = vmxor %vm3676_vm15, %vm1367_vm6 }
 0xe20   :  { %vm1375_vm14 = vmxor %vm1371_vm2, %vm1941_vm8  ;;  %vm4523_vm2 = vnez %v4242_v19 }
 0xe21   :  { %v3687_v54 = vsel %vm1375_vm14, %v1331_v23, %v1359_v53  ;;  %vm4522_vm6 = vmmov %vm4517_vm0  ;;  %v1360_v5 = vsel %vm4523_vm2, %v1344_v57, %v1354_v56 }
 0xe22   :  { %1383 = vrot.lane.b32.xlu0 %v3687_v54, %s1939_s0  ;;  %vm1364_vm14 = vmxor %vm4523_vm2, %vm1941_vm8 }
 0xe23   :  { %v1350_v59 = vpop.permute.xlu0 %1349 }
 0xe24   :  { %v1353_v62 = vsel %vm4521_vm4, %v1346_v41, %v1350_v59  ;;  %v1355_v63 = vsel %vm4522_vm6, %v1350_v59, %v1346_v41  ;;  %vm1368_vm4 = vcmp.ge.f32.partialorder %v1332_v38, %v1360_v5 }
 0xe25   :  { %v1357_v0 = vsel %vm4512_vm9, %v1341_v60, %v1355_v63  ;;  %v1358_v1 = vsel %vm4523_vm2, %v1343_v61, %v1353_v62  ;;  %vm1372_vm12 = vmxor %vm1364_vm14, %vm1368_vm4 }
 0xe26   :  { %vm1365_vm0 = vcmp.ge.f32.partialorder %v1329_v36, %v1357_v0  ;;  %vm1366_vm11 = vcmp.ge.f32.partialorder %v1330_v35, %v1358_v1  ;;  %vm1376_vm2 = vmxor %vm1372_vm12, %vm1941_vm8  ;;  %vm4525_vm12 = vcmp.lt.s32.totalorder %v2002_v7, 1 }
 0xe27   :  { %vm1369_vm10 = vmxor %vm3676_vm15, %vm1365_vm0  ;;  %v1380_v10 = vsel %vm1376_vm2, %v1332_v38, %v1360_v5  ;;  %vm4527_vm0 = vcmp.lt.s32.totalorder %v2002_v7, 127 }
 0xe28   :  { %vm1370_vm3 = vmxor %vm1364_vm14, %vm1366_vm11 }
 0xe29   :  { %vm1373_vm6 = vmxor %vm1369_vm10, %vm1941_vm8 }
 0xe2a   :  { %v1377_v9 = vsel %vm1373_vm6, %v1329_v36, %v1357_v0  ;;  %vm1374_vm9 = vmxor %vm1370_vm3, %vm1941_vm8 }
 0xe2b   :  { %1393 = vrot.lane.b32.xlu0 %v1377_v9, %s1940_s1  ;;  %1381 = vrot.lane.b32.xlu2 %v1377_v9, %s1939_s0  ;;  %v1378_v8 = vsel %vm1374_vm9, %v1330_v35, %v1358_v1  ;;  %vm4524_vm9 = vnez %v4236_v16  ;;  %vm4526_vm2 = vmmov %vm4525_vm12 }
 0xe2c   :  { %1385 = vrot.lane.b32.xlu1 %v1378_v8, %s1939_s0  ;;  %vm1409_vm14 = vmxor %vm1941_vm8, %vm4524_vm9 }
 0xe2d   :  { %vm4528_vm11 = vmmov %vm4527_vm0 }
 0xe2e   :  { %vm3737_vm10 = vmxor %vm1409_vm14, %vm1941_vm8 }
 0xe2f   :  { %v4530_v30 = vsel %vm3737_vm10, 4294967295, %v4529_v30  ;;  %vm3744_vm3 = vmxor %vm4457_vm13, %vm1941_vm8 }
 0xe30   :  { %vm4533_vm15 = vmmov %vm4528_vm11 }
 0xe33   :  { %1399 = vrot.lane.b32.xlu0 %v1380_v10, %s1940_s1  ;;  %1387 = vrot.lane.b32.xlu2 %v1380_v10, %s1939_s0 }
 0xe34   :  { %1395 = vrot.lane.b32.xlu1 %v3687_v54, %s1940_s1 }
 0xe3b   :  { %1397 = vrot.lane.b32.xlu2 %v1378_v8, %s1940_s1 }
 0xe85   :  { %v1382_v11 = vpop.permute.xlu2 %1381 }
 0xe8d   :  { %v1388_v12 = vpop.permute.xlu2 %1387 }
 0xe94   :  { %v1384_v21 = vpop.permute.xlu0 %1383 }
 0xe95   :  { %v1398_v22 = vpop.permute.xlu2 %1397  ;;  %v1390_v36 = vsel %vm4528_vm11, %v1384_v21, %v1388_v12  ;;  %v1392_v38 = vsel %vm4533_vm15, %v1388_v12, %v1384_v21 }
 0xe9d   :  { %v1394_v23 = vpop.permute.xlu0 %1393 }
 0xe9e   :  { %v1386_v24 = vpop.permute.xlu1 %1385  ;;  %v1401_v25 = vsel %vm4525_vm12, %v1394_v23, %v1398_v22  ;;  %v1403_v27 = vsel %vm4526_vm2, %v1398_v22, %v1394_v23 }
 0xe9f   :  { %v1389_v28 = vsel %vm4527_vm0, %v1382_v11, %v1386_v24  ;;  %v1391_v29 = vsel %vm4528_vm11, %v1386_v24, %v1382_v11 }
 0xea0   :  { %v1405_v32 = vsel %vm4524_vm9, %v1389_v28, %v1403_v27  ;;  %v1406_v33 = vsel %vm4457_vm13, %v1391_v29, %v1401_v25 }
 0xea1   :  { %vm1413_vm4 = vcmp.ge.f32.partialorder %v1377_v9, %v1405_v32  ;;  %vm1414_vm6 = vcmp.ge.f32.partialorder %v1378_v8, %v1406_v33 }
 0xea2   :  { %vm1417_vm14 = vmxor %vm3737_vm10, %vm1413_vm4 }
 0xea3   :  { %vm1418_vm12 = vmxor %vm3744_vm3, %vm1414_vm6 }
 0xea4   :  { %vm1421_vm2 = vmxor %vm1417_vm14, %vm1941_vm8 }
 0xea5   :  { %vm1422_vm0 = vmxor %vm1418_vm12, %vm1941_vm8  ;;  %v1425_v34 = vsel %vm1421_vm2, %v1377_v9, %v1405_v32  ;;  %v1400_v35 = vpop.permute.xlu0 %1399 }
 0xea6   :  { %v1426_v39 = vsel %vm1422_vm0, %v1378_v8, %v1406_v33  ;;  %v1396_v40 = vpop.permute.xlu1 %1395  ;;  %vm4535_vm4 = vmmov %vm4534_vm5 }
 0xea7   :  { %v1402_v41 = vsel %vm4534_vm5, %v1396_v40, %v1400_v35  ;;  %v1404_v42 = vsel %vm4535_vm4, %v1400_v35, %v1396_v40  ;;  %vm1438_vm6 = vcmp.ge.f32.partialorder %v1426_v39, %v1425_v34  ;;  %vm1437_vm14 = vcmp.ge.f32.partialorder %v1425_v34, %v1426_v39 }
 0xea8   :  { %v1407_v47 = vsel %vm4524_vm9, %v1390_v36, %v1404_v42  ;;  %v1408_v48 = vsel %vm4457_vm13, %v1392_v38, %v1402_v41  ;;  %vm1446_vm12 = vmxor %vm1438_vm6, %vm1941_vm8 }
 0xea9   :  { %vm1415_vm15 = vcmp.ge.f32.partialorder %v3687_v54, %v1407_v47  ;;  %vm1416_vm2 = vcmp.ge.f32.partialorder %v1380_v10, %v1408_v48  ;;  %v1450_v49 = vsel %vm1446_vm12, %v1426_v39, %v1425_v34  ;;  %vm1441_vm0 = vmxor %vm1941_vm8, %vm1437_vm14 }
 0xeaa   :  { %vm1419_vm5 = vmxor %vm3737_vm10, %vm1415_vm15  ;;  %1457 = vrot.lane.b32.xlu0 %v1450_v49, %s1951_s6 }
 0xeab   :  { %vm1420_vm11 = vmxor %vm3744_vm3, %vm1416_vm2  ;;  %vm4536_vm2 = vcmp.lt.s32.totalorder %v2002_v7, 64 }
 0xeac   :  { %vm1423_vm4 = vmxor %vm1419_vm5, %vm1941_vm8 }
 0xead   :  { %vm1424_vm9 = vmxor %vm1420_vm11, %vm1941_vm8  ;;  %v1427_v50 = vsel %vm1423_vm4, %v3687_v54, %v1407_v47  ;;  %vm4540_vm4 = vnez %v4463_v2 }
 0xeae   :  { %v1428_v52 = vsel %vm1424_vm9, %v1380_v10, %v1408_v48  ;;  %vm1445_vm6 = vmxor %vm1441_vm0, %vm1941_vm8 }
 0xeaf   :  { %v1449_v53 = vsel %vm1445_vm6, %v1425_v34, %v1426_v39  ;;  %vm1440_vm12 = vcmp.ge.f32.partialorder %v1428_v52, %v1427_v50  ;;  %vm1439_vm14 = vcmp.ge.f32.partialorder %v1427_v50, %v1428_v52  ;;  %vm1470_vm9 = vmxor %vm1941_vm8, %vm3043_vm7 }
 0xeb0   :  { %1453 = vrot.lane.b32.xlu1 %v1449_v53, %s1951_s6  ;;  %vm1448_vm15 = vmxor %vm1440_vm12, %vm1941_vm8 }
 0xeb1   :  { %vm1443_vm10 = vmxor %vm1941_vm8, %vm1439_vm14  ;;  %v1452_v57 = vsel %vm1448_vm15, %v1428_v52, %v1427_v50 }
 0xeb2   :  { %vm1447_vm3 = vmxor %vm1443_vm10, %vm1941_vm8 }
 0xeb3   :  { %v1451_v56 = vsel %vm1447_vm3, %v1427_v50, %v1428_v52  ;;  %vm4537_vm0 = vmmov %vm4536_vm2 }
 0xeb4   :  { %1455 = vrot.lane.b32.xlu2 %v1451_v56, %s1951_s6  ;;  %vm3796_vm10 = vmxor %vm1470_vm9, %vm1941_vm8 }
 0xeb5   :  { %vm4541_vm3 = vmmov %vm4537_vm0 }
 0xeb6   :  { %vm4542_vm9 = vmmov %vm4537_vm0 }
 0xeb8   :  { %1459 = vrot.lane.b32.xlu1 %v1452_v57, %s1951_s6 }
 0xf0e   :  { %v1456_v5 = vpop.permute.xlu2 %1455 }
 0xf1c   :  { %v1458_v54 = vpop.permute.xlu0 %1457 }
 0xf22   :  { %v1454_v59 = vpop.permute.xlu1 %1453 }
 0xf23   :  { %v1461_v60 = vsel %vm4536_vm2, %v1454_v59, %v1458_v54  ;;  %v1463_v61 = vsel %vm4537_vm0, %v1458_v54, %v1454_v59 }
 0xf24   :  { %v1465_v63 = vsel %vm3018_vm1, %v1461_v60, %v1463_v61  ;;  %v1466_v0 = vsel %vm3043_vm7, %v1463_v61, %v1461_v60 }
 0xf25   :  { %vm1473_vm5 = vcmp.ge.f32.partialorder %v1449_v53, %v1465_v63  ;;  %vm1474_vm11 = vcmp.ge.f32.partialorder %v1450_v49, %v1466_v0 }
 0xf26   :  { %vm1477_vm6 = vmxor %vm4540_vm4, %vm1473_vm5 }
 0xf27   :  { %vm1478_vm12 = vmxor %vm3796_vm10, %vm1474_vm11 }
 0xf28   :  { %vm1482_vm14 = vmxor %vm1478_vm12, %vm1941_vm8 }
 0xf29   :  { %v1486_v1 = vsel %vm1482_vm14, %v1450_v49, %v1466_v0  ;;  %vm1481_vm15 = vmxor %vm1477_vm6, %vm1941_vm8  ;;  %vm4546_vm14 = vcmp.lt.s32.totalorder %v2002_v7, 32 }
 0xf2a   :  { %1493 = vrot.lane.b32.xlu1 %v1486_v1, %s1949_s4  ;;  %v1485_v9 = vsel %vm1481_vm15, %v1449_v53, %v1465_v63  ;;  %v1460_v8 = vpop.permute.xlu1 %1459  ;;  %vm4547_vm15 = vmmov %vm4546_vm14 }
 0xf2b   :  { %1489 = vrot.lane.b32.xlu2 %v1485_v9, %s1949_s4  ;;  %v1462_v10 = vsel %vm4541_vm3, %v1456_v5, %v1460_v8  ;;  %v1464_v11 = vsel %vm4542_vm9, %v1460_v8, %v1456_v5  ;;  %vm4550_vm9 = vnez %v4339_v15 }
 0xf2c   :  { %v1467_v12 = vsel %vm3018_vm1, %v1462_v10, %v1464_v11  ;;  %v1468_v21 = vsel %vm3043_vm7, %v1464_v11, %v1462_v10  ;;  %vm4543_vm1 = vnez %v4341_v20 }
 0xf2d   :  { %vm1475_vm2 = vcmp.ge.f32.partialorder %v1451_v56, %v1467_v12  ;;  %vm1476_vm0 = vcmp.ge.f32.partialorder %v1452_v57, %v1468_v21  ;;  %vm1518_vm7 = vmxor %vm1941_vm8, %vm4543_vm1 }
 0xf2e   :  { %vm1479_vm5 = vmxor %vm4540_vm4, %vm1475_vm2 }
 0xf2f   :  { %vm1480_vm11 = vmxor %vm3796_vm10, %vm1476_vm0  ;;  %vm4544_vm10 = vcmp.lt.s32.totalorder %v2002_v7, 96 }
 0xf30   :  { %vm1483_vm6 = vmxor %vm1479_vm5, %vm1941_vm8  ;;  %vm4551_vm5 = vnez %v4469_v37 }
 0xf31   :  { %v1487_v22 = vsel %vm1483_vm6, %v1451_v56, %v1467_v12  ;;  %vm1484_vm12 = vmxor %vm1480_vm11, %vm1941_vm8 }
 0xf32   :  { %1491 = vrot.lane.b32.xlu0 %v1487_v22, %s1949_s4  ;;  %1503 = vrot.lane.b32.xlu1 %v1487_v22, %s1950_s5  ;;  %v1488_v58 = vsel %vm1484_vm12, %v1452_v57, %v1468_v21  ;;  %vm4545_vm4 = vmmov %vm4544_vm10 }
 0xf33   :  { %1495 = vrot.lane.b32.xlu2 %v1488_v58, %s1949_s4  ;;  %vm3844_vm3 = vmxor %vm1518_vm7, %vm1941_vm8 }
 0xf3a   :  { %1501 = vrot.lane.b32.xlu0 %v1485_v9, %s1950_s5 }
 0xf3b   :  { %1505 = vrot.lane.b32.xlu2 %v1486_v1, %s1950_s5 }
 0xf42   :  { %1507 = vrot.lane.b32.xlu0 %v1488_v58, %s1950_s5 }
 0xf85   :  { %v1490_v3 = vpop.permute.xlu2 %1489 }
 0xf8d   :  { %v1496_v2 = vpop.permute.xlu2 %1495 }
 0xf95   :  { %v1506_v25 = vpop.permute.xlu2 %1505 }
 0xf9c   :  { %v1494_v24 = vpop.permute.xlu1 %1493 }
 0xf9d   :  { %v1497_v28 = vsel %vm4544_vm10, %v1490_v3, %v1494_v24  ;;  %v1499_v29 = vsel %vm4545_vm4, %v1494_v24, %v1490_v3  ;;  %vm4552_vm10 = vmmov %vm4545_vm4 }
 0xfa4   :  { %v1492_v23 = vpop.permute.xlu0 %1491  ;;  %v1504_v38 = vpop.permute.xlu1 %1503 }
 0xfa5   :  { %v1498_v41 = vsel %vm4552_vm10, %v1492_v23, %v1496_v2  ;;  %v1500_v42 = vsel %vm4545_vm4, %v1496_v2, %v1492_v23  ;;  %vm4557_vm10 = vnez %v4478_v6 }
 0xfac   :  { %v1502_v27 = vpop.permute.xlu0 %1501 }
 0xfad   :  { %v1509_v31 = vsel %vm4546_vm14, %v1502_v27, %v1506_v25  ;;  %v1511_v32 = vsel %vm4547_vm15, %v1506_v25, %v1502_v27  ;;  %vm4553_vm15 = vmmov %vm4546_vm14 }
 0xfae   :  { %v1513_v34 = vsel %vm4550_vm9, %v1497_v28, %v1511_v32  ;;  %v1514_v35 = vsel %vm4543_vm1, %v1499_v29, %v1509_v31 }
 0xfaf   :  { %vm1521_vm2 = vcmp.ge.f32.partialorder %v1485_v9, %v1513_v34  ;;  %vm1522_vm0 = vcmp.ge.f32.partialorder %v1486_v1, %v1514_v35 }
 0xfb0   :  { %vm1525_vm11 = vmxor %vm4551_vm5, %vm1521_vm2 }
 0xfb1   :  { %vm1526_vm6 = vmxor %vm3844_vm3, %vm1522_vm0 }
 0xfb2   :  { %vm1529_vm12 = vmxor %vm1525_vm11, %vm1941_vm8 }
 0xfb3   :  { %v3857_v36 = vsel %vm1529_vm12, %v1485_v9, %v1513_v34  ;;  %vm1530_vm7 = vmxor %vm1526_vm6, %vm1941_vm8 }
 0xfb4   :  { %1537 = vrot.lane.b32.xlu1 %v3857_v36, %s1948_s30  ;;  %v1534_v39 = vsel %vm1530_vm7, %v1486_v1, %v1514_v35  ;;  %v1508_v40 = vpop.permute.xlu0 %1507 }
 0xfb5   :  { %1541 = vrot.lane.b32.xlu0 %v1534_v39, %s1948_s30  ;;  %v1510_v47 = vsel %vm4546_vm14, %v1504_v38, %v1508_v40  ;;  %v1512_v48 = vsel %vm4553_vm15, %v1508_v40, %v1504_v38 }
 0xfb6   :  { %v1515_v49 = vsel %vm4550_vm9, %v1498_v41, %v1512_v48  ;;  %v1516_v50 = vsel %vm4543_vm1, %v1500_v42, %v1510_v47  ;;  %vm4554_vm1 = vcmp.lt.s32.totalorder %v2002_v7, 112  ;;  %vm4556_vm9 = vnez %v4299_v13 }
 0xfb7   :  { %vm1523_vm2 = vcmp.ge.f32.partialorder %v1487_v22, %v1515_v49  ;;  %vm1524_vm0 = vcmp.ge.f32.partialorder %v1488_v58, %v1516_v50  ;;  %vm4558_vm15 = vmmov %vm4554_vm1 }
 0xfb8   :  { %vm1527_vm11 = vmxor %vm4551_vm5, %vm1523_vm2 }
 0xfb9   :  { %vm1528_vm6 = vmxor %vm3844_vm3, %vm1524_vm0  ;;  %vm4555_vm3 = vcmp.lt.s32.totalorder %v2002_v7, 16  ;;  %vm4560_vm0 = vnez %v4303_v26 }
 0xfba   :  { %vm1531_vm12 = vmxor %vm1527_vm11, %vm1941_vm8 }
 0xfbb   :  { %v1535_v52 = vsel %vm1531_vm12, %v1487_v22, %v1515_v49  ;;  %vm1532_vm7 = vmxor %vm1528_vm6, %vm1941_vm8 }
 0xfbc   :  { %1539 = vrot.lane.b32.xlu2 %v1535_v52, %s1948_s30  ;;  %v1536_v15 = vsel %vm1532_vm7, %v1488_v58, %v1516_v50  ;;  %vm4559_vm2 = vmmov %vm4554_vm1 }
 0xfbd   :  { %1551 = vrot.lane.b32.xlu0 %v1535_v52, %s1937_s21  ;;  %1543 = vrot.lane.b32.xlu1 %v1536_v15, %s1948_s30  ;;  %vm1566_vm11 = vmxor %vm1941_vm8, %vm4560_vm0 }
 0xfbe   :  { %vm4561_vm6 = vmmov %vm4554_vm1 }
 0xfbf   :  { %vm4562_vm12 = vmmov %vm4555_vm3 }
 0xfc0   :  { %vm4563_vm7 = vmmov %vm4555_vm3 }
 0xfc4   :  { %1549 = vrot.lane.b32.xlu2 %v3857_v36, %s1937_s21 }
 0xfc5   :  { %1553 = vrot.lane.b32.xlu1 %v1534_v39, %s1937_s21 }
 0xfcc   :  { %1555 = vrot.lane.b32.xlu2 %v1536_v15, %s1937_s21 }
0x1016   :  { %v1540_v20 = vpop.permute.xlu2 %1539 }
0x101e   :  { %v1550_v37 = vpop.permute.xlu2 %1549 }
0x1026   :  { %v1538_v53 = vpop.permute.xlu1 %1537  ;;  %v1556_v57 = vpop.permute.xlu2 %1555 }
0x1027   :  { %v1542_v56 = vpop.permute.xlu0 %1541 }
0x1028   :  { %v1545_v0 = vsel %vm4558_vm15, %v1538_v53, %v1542_v56  ;;  %v1547_v1 = vsel %vm4559_vm2, %v1542_v56, %v1538_v53 }
0x102f   :  { %v1544_v54 = vpop.permute.xlu1 %1543  ;;  %v1552_v59 = vpop.permute.xlu0 %1551 }
0x1030   :  { %v1546_v60 = vsel %vm4554_vm1, %v1540_v20, %v1544_v54  ;;  %v1560_v61 = vsel %vm4555_vm3, %v1556_v57, %v1552_v59  ;;  %v1548_v9 = vsel %vm4561_vm6, %v1544_v54, %v1540_v20  ;;  %v1558_v8 = vsel %vm4562_vm12, %v1552_v59, %v1556_v57  ;;  %vm4564_vm1 = vmmov %vm4555_vm3 }
0x1031   :  { %v1563_v62 = vsel %vm4556_vm9, %v1546_v60, %v1560_v61  ;;  %vm1568_vm3 = vmxor %vm1566_vm11, %vm1941_vm8  ;;  %v1564_v22 = vsel %vm4560_vm0, %v1548_v9, %v1558_v8  ;;  %vm4566_vm12 = vcmp.lt.s32.totalorder %v2002_v7, 120 }
0x1032   :  { %vm1571_vm5 = vcmp.ge.f32.partialorder %v1535_v52, %v1563_v62  ;;  %vm1572_vm6 = vcmp.ge.f32.partialorder %v1536_v15, %v1564_v22 }
0x1033   :  { %vm1575_vm4 = vmxor %vm4557_vm10, %vm1571_vm5 }
0x1034   :  { %vm1579_vm14 = vmxor %vm1575_vm4, %vm1941_vm8 }
0x1035   :  { %v1583_v63 = vsel %vm1579_vm14, %v1535_v52, %v1563_v62  ;;  %vm1576_vm11 = vmxor %vm1568_vm3, %vm1572_vm6 }
0x1036   :  { %1587 = vrot.lane.b32.xlu1 %v1583_v63, %s1946_s28  ;;  %vm4571_vm6 = vmmov %vm4566_vm12 }
0x1037   :  { %v1554_v5 = vpop.permute.xlu1 %1553 }
0x1038   :  { %v1557_v10 = vsel %vm4563_vm7, %v1550_v37, %v1554_v5  ;;  %v1559_v11 = vsel %vm4564_vm1, %v1554_v5, %v1550_v37  ;;  %vm4567_vm7 = vnez %v4269_v44 }
0x1039   :  { %v1561_v12 = vsel %vm4556_vm9, %v1545_v0, %v1559_v11  ;;  %v1562_v21 = vsel %vm4560_vm0, %v1547_v1, %v1557_v10  ;;  %vm1580_vm0 = vmxor %vm1576_vm11, %vm1941_vm8 }
0x103a   :  { %vm1569_vm5 = vcmp.ge.f32.partialorder %v3857_v36, %v1561_v12  ;;  %vm1570_vm4 = vcmp.ge.f32.partialorder %v1534_v39, %v1562_v21  ;;  %v1584_v26 = vsel %vm1580_vm0, %v1536_v15, %v1564_v22  ;;  %vm4573_vm11 = vmmov %vm4571_vm6 }
0x103b   :  { %vm1573_vm14 = vmxor %vm4557_vm10, %vm1569_vm5  ;;  %vm4565_vm10 = vcmp.lt.s32.totalorder %v2002_v7, 8 }
0x103c   :  { %vm1574_vm15 = vmxor %vm1568_vm3, %vm1570_vm4  ;;  %vm4568_vm3 = vnez %v4493_v43 }
0x103d   :  { %vm1578_vm2 = vmxor %vm1574_vm15, %vm1941_vm8  ;;  %vm4570_vm15 = vnez %v4273_v55 }
0x103e   :  { %v1582_v13 = vsel %vm1578_vm2, %v1534_v39, %v1562_v21  ;;  %vm1577_vm9 = vmxor %vm1573_vm14, %vm1941_vm8 }
0x103f   :  { %1589 = vrot.lane.b32.xlu2 %v1582_v13, %s1946_s28  ;;  %v1581_v58 = vsel %vm1577_vm9, %v3857_v36, %v1561_v12  ;;  %vm4569_vm14 = vmmov %vm4565_vm10 }
0x1040   :  { %1585 = vrot.lane.b32.xlu0 %v1581_v58, %s1946_s28  ;;  %1597 = vrot.lane.b32.xlu1 %v1581_v58, %s1947_s29  ;;  %vm1614_vm2 = vmxor %vm1941_vm8, %vm4570_vm15 }
0x1041   :  { %vm4572_vm9 = vmmov %vm4571_vm6 }
0x1042   :  { %vm4574_vm0 = vmmov %vm4565_vm10 }
0x1047   :  { %1599 = vrot.lane.b32.xlu2 %v1583_v63, %s1947_s29 }
0x1048   :  { %1603 = vrot.lane.b32.xlu1 %v1584_v26, %s1947_s29  ;;  %1591 = vrot.lane.b32.xlu0 %v1584_v26, %s1946_s28 }
0x1050   :  { %1601 = vrot.lane.b32.xlu0 %v1582_v13, %s1947_s29 }
0x1099   :  { %v1590_v3 = vpop.permute.xlu2 %1589 }
0x10a1   :  { %v1600_v24 = vpop.permute.xlu2 %1599 }
0x10a8   :  { %v1588_v6 = vpop.permute.xlu1 %1587 }
0x10b2   :  { %v1598_v2 = vpop.permute.xlu1 %1597  ;;  %v1586_v23 = vpop.permute.xlu0 %1585 }
0x10b3   :  { %v1593_v36 = vsel %vm4572_vm9, %v1586_v23, %v1590_v3  ;;  %v1595_v38 = vsel %vm4573_vm11, %v1590_v3, %v1586_v23 }
0x10ba   :  { %v1604_v25 = vpop.permute.xlu1 %1603  ;;  %v1592_v27 = vpop.permute.xlu0 %1591 }
0x10bb   :  { %v1608_v28 = vsel %vm4565_vm10, %v1604_v25, %v1600_v24  ;;  %v1594_v29 = vsel %vm4566_vm12, %v1588_v6, %v1592_v27  ;;  %v1606_v33 = vsel %vm4569_vm14, %v1600_v24, %v1604_v25  ;;  %v1596_v34 = vsel %vm4571_vm6, %v1592_v27, %v1588_v6  ;;  %vm4575_vm10 = vmmov %vm4574_vm0 }
0x10bc   :  { %v1611_v31 = vsel %vm4567_vm7, %v1594_v29, %v1608_v28  ;;  %vm1616_vm12 = vmxor %vm1614_vm2, %vm1941_vm8  ;;  %v1612_v47 = vsel %vm4570_vm15, %v1596_v34, %v1606_v33 }
0x10bd   :  { %vm1619_vm1 = vcmp.ge.f32.partialorder %v1583_v63, %v1611_v31  ;;  %vm1620_vm6 = vcmp.ge.f32.partialorder %v1584_v26, %v1612_v47 }
0x10be   :  { %vm1623_vm5 = vmxor %vm4568_vm3, %vm1619_vm1 }
0x10bf   :  { %vm1627_vm4 = vmxor %vm1623_vm5, %vm1941_vm8 }
0x10c0   :  { %v3943_v32 = vsel %vm1627_vm4, %v1583_v63, %v1611_v31  ;;  %vm1624_vm2 = vmxor %vm1616_vm12, %vm1620_vm6 }
0x10c1   :  { %1635 = vrot.lane.b32.xlu0 %v3943_v32, %s1944_s26 }
0x10c2   :  { %v1602_v35 = vpop.permute.xlu0 %1601 }
0x10c3   :  { %v1605_v39 = vsel %vm4574_vm0, %v1598_v2, %v1602_v35  ;;  %v1607_v40 = vsel %vm4575_vm10, %v1602_v35, %v1598_v2  ;;  %vm4577_vm0 = vcmp.lt.s32.totalorder %v2002_v7, 4 }
0x10c4   :  { %v1609_v41 = vsel %vm4567_vm7, %v1593_v36, %v1607_v40  ;;  %v1610_v42 = vsel %vm4570_vm15, %v1595_v38, %v1605_v39  ;;  %vm1628_vm15 = vmxor %vm1624_vm2, %vm1941_vm8  ;;  %v1856_v38 = vld [vmem:[%s4153_s2] ss:$0 sm:$0xff]  ;;  %s1953_s2 = smov [#allocation7]  }
0x10c5   :  { %vm1617_vm1 = vcmp.ge.f32.partialorder %v1581_v58, %v1609_v41  ;;  %vm1618_vm5 = vcmp.ge.f32.partialorder %v1582_v13, %v1610_v42  ;;  %v1632_v55 = vsel %vm1628_vm15, %v1584_v26, %v1612_v47  ;;  %vm4578_vm10 = vmmov %vm4577_vm0  ;;  %s1821_s9 = sshll.u32 %s1953_s2, 4  ;;  %s1822_s9 = int_to_ptr.vmem [resolvable:$true] %s1821_s9 }
0x10c6   :  { %vm1621_vm4 = vmxor %vm4568_vm3, %vm1617_vm1  ;;  %vm4576_vm3 = vnez %v4248_v46 }
0x10c7   :  { %vm1622_vm14 = vmxor %vm1616_vm12, %vm1618_vm5  ;;  %vm4579_vm12 = vcmp.lt.s32.totalorder %v2002_v7, 124 }
0x10c8   :  { %vm1625_vm9 = vmxor %vm1621_vm4, %vm1941_vm8  ;;  %vm4583_vm4 = vnez %v4246_v45 }
0x10c9   :  { %v1629_v48 = vsel %vm1625_vm9, %v1581_v58, %v1609_v41  ;;  %vm1626_vm7 = vmxor %vm1622_vm14, %vm1941_vm8  ;;  %vm4584_vm9 = vnez %v4504_v14 }
0x10ca   :  { %1645 = vrot.lane.b32.xlu0 %v1629_v48, %s1945_s27  ;;  %1633 = vrot.lane.b32.xlu2 %v1629_v48, %s1944_s26  ;;  %v1630_v44 = vsel %vm1626_vm7, %v1582_v13, %v1610_v42  ;;  %vm1662_vm11 = vmxor %vm1941_vm8, %vm4576_vm3 }
0x10cb   :  { %1637 = vrot.lane.b32.xlu1 %v1630_v44, %s1944_s26  ;;  %vm4580_vm1 = vmmov %vm4579_vm12 }
0x10cc   :  { %vm3994_vm5 = vmxor %vm1662_vm11, %vm1941_vm8 }
0x10d2   :  { %1651 = vrot.lane.b32.xlu0 %v1632_v55, %s1945_s27  ;;  %1639 = vrot.lane.b32.xlu2 %v1632_v55, %s1944_s26 }
0x10d3   :  { %1647 = vrot.lane.b32.xlu1 %v3943_v32, %s1945_s27 }
0x10da   :  { %1649 = vrot.lane.b32.xlu2 %v1630_v44, %s1945_s27 }
0x1124   :  { %v1634_v43 = vpop.permute.xlu2 %1633 }
0x112c   :  { %v1640_v49 = vpop.permute.xlu2 %1639 }
0x1133   :  { %v1636_v50 = vpop.permute.xlu0 %1635 }
0x1134   :  { %v1650_v52 = vpop.permute.xlu2 %1649 }
0x113c   :  { %v1646_v15 = vpop.permute.xlu0 %1645 }
0x113d   :  { %v1638_v20 = vpop.permute.xlu1 %1637  ;;  %v1653_v37 = vsel %vm4577_vm0, %v1646_v15, %v1650_v52  ;;  %v1655_v53 = vsel %vm4578_vm10, %v1650_v52, %v1646_v15  ;;  %vm4585_vm0 = vmmov %vm4580_vm1 }
0x113e   :  { %v1641_v56 = vsel %vm4579_vm12, %v1634_v43, %v1638_v20  ;;  %v1643_v57 = vsel %vm4580_vm1, %v1638_v20, %v1634_v43  ;;  %v1642_v1 = vsel %vm4585_vm0, %v1636_v50, %v1640_v49  ;;  %vm4586_vm10 = vmmov %vm4585_vm0  ;;  %vm4587_vm12 = vcmp.lt.s32.totalorder %v2002_v7, 4  ;;  %v1777_v20 = vld [vmem:[#allocation5] sm:$0xff] }
0x113f   :  { %v1657_v59 = vsel %vm4583_vm4, %v1641_v56, %v1655_v53  ;;  %v1658_v60 = vsel %vm4576_vm3, %v1643_v57, %v1653_v37  ;;  %v1644_v5 = vsel %vm4586_vm10, %v1640_v49, %v1636_v50  ;;  %vm4588_vm1 = vmmov %vm4587_vm12  ;;  %vm4592_vm0 = vnez %v4515_v51  ;;  %v1778_v37 = vld [vmem:[#allocation5 + $0x8] sm:$0xff] }
0x1140   :  { %vm1665_vm14 = vcmp.ge.f32.partialorder %v1629_v48, %v1657_v59  ;;  %vm1666_vm6 = vcmp.ge.f32.partialorder %v1630_v44, %v1658_v60  ;;  %v1793_v51 = vshrl.u32 %v49_v4, 7 }
0x1141   :  { %vm1669_vm7 = vmxor %vm4584_vm9, %vm1665_vm14 }
0x1142   :  { %vm1670_vm2 = vmxor %vm3994_vm5, %vm1666_vm6  ;;  %1853 = vset.pattern.permute.xlu1 %v1793_v51 }
0x1143   :  { %vm1673_vm15 = vmxor %vm1669_vm7, %vm1941_vm8 }
0x1144   :  { %v4007_v61 = vsel %vm1673_vm15, %v1629_v48, %v1657_v59  ;;  %vm1674_vm11 = vmxor %vm1670_vm2, %vm1941_vm8  ;;  %v1652_v62 = vpop.permute.xlu0 %1651 }
0x1145   :  { %1681 = vrot.lane.b32.xlu1 %v4007_v61, %s1942_s24  ;;  %v1678_v63 = vsel %vm1674_vm11, %v1630_v44, %v1658_v60  ;;  %v1648_v0 = vpop.permute.xlu1 %1647 }
0x1146   :  { %1685 = vrot.lane.b32.xlu0 %v1678_v63, %s1942_s24  ;;  %v1654_v9 = vsel %vm4587_vm12, %v1648_v0, %v1652_v62  ;;  %v1656_v8 = vsel %vm4588_vm1, %v1652_v62, %v1648_v0 }
0x1147   :  { %v1659_v10 = vsel %vm4583_vm4, %v1642_v1, %v1656_v8  ;;  %v1660_v11 = vsel %vm4576_vm3, %v1644_v5, %v1654_v9  ;;  %vm4589_vm3 = vcmp.lt.s32.totalorder %v2002_v7, 126  ;;  %vm4591_vm4 = vnez %v4238_v17 }
0x1148   :  { %vm1667_vm14 = vcmp.ge.f32.partialorder %v3943_v32, %v1659_v10  ;;  %vm1668_vm6 = vcmp.ge.f32.partialorder %v1632_v55, %v1660_v11  ;;  %vm4593_vm1 = vmmov %vm4589_vm3 }
0x1149   :  { %vm1671_vm7 = vmxor %vm4584_vm9, %vm1667_vm14 }
0x114a   :  { %vm1672_vm2 = vmxor %vm3994_vm5, %vm1668_vm6  ;;  %vm4590_vm5 = vcmp.lt.s32.totalorder %v2002_v7, 2  ;;  %vm4595_vm6 = vnez %v4242_v19 }
0x114b   :  { %vm1675_vm15 = vmxor %vm1671_vm7, %vm1941_vm8 }
0x114c   :  { %v1679_v12 = vsel %vm1675_vm15, %v3943_v32, %v1659_v10  ;;  %vm1676_vm11 = vmxor %vm1672_vm2, %vm1941_vm8 }
0x114d   :  { %1683 = vrot.lane.b32.xlu2 %v1679_v12, %s1942_s24  ;;  %v1680_v45 = vsel %vm1676_vm11, %v1632_v55, %v1660_v11  ;;  %vm4594_vm14 = vmmov %vm4593_vm1  ;;  %v1952_v11 = vmov 0  }
0x114e   :  { %1695 = vrot.lane.b32.xlu0 %v1679_v12, %s1943_s25  ;;  %1687 = vrot.lane.b32.xlu1 %v1680_v45, %s1942_s24  ;;  %vm1710_vm7 = vmxor %vm1941_vm8, %vm4595_vm6 }
0x114f   :  { %vm4596_vm2 = vmmov %vm4593_vm1  ;;  %1855 = vset.pattern.permute.xlu0 %v1952_v11 }
0x1150   :  { %vm4597_vm15 = vmmov %vm4590_vm5 }
0x1151   :  { %vm4598_vm11 = vmmov %vm4590_vm5 }
0x1155   :  { %1693 = vrot.lane.b32.xlu2 %v4007_v61, %s1943_s25 }
0x1156   :  { %1697 = vrot.lane.b32.xlu1 %v1678_v63, %s1943_s25 }
0x115d   :  { %1699 = vrot.lane.b32.xlu2 %v1680_v45, %s1943_s25 }
0x11a7   :  { %v1684_v46 = vpop.permute.xlu2 %1683 }
0x11af   :  { %v1694_v14 = vpop.permute.xlu2 %1693 }
0x11b7   :  { %v1682_v21 = vpop.permute.xlu1 %1681  ;;  %v1700_v13 = vpop.permute.xlu2 %1699 }
0x11b8   :  { %v1686_v22 = vpop.permute.xlu0 %1685 }
0x11b9   :  { %v1689_v24 = vsel %vm4593_vm1, %v1682_v21, %v1686_v22  ;;  %v1691_v25 = vsel %vm4594_vm14, %v1686_v22, %v1682_v21 }
0x11c0   :  { %v1688_v58 = vpop.permute.xlu1 %1687  ;;  %v1696_v26 = vpop.permute.xlu0 %1695 }
0x11c1   :  { %v1690_v6 = vsel %vm4589_vm3, %v1684_v46, %v1688_v58  ;;  %v1704_v3 = vsel %vm4590_vm5, %v1700_v13, %v1696_v26  ;;  %v1692_v28 = vsel %vm4596_vm2, %v1688_v58, %v1684_v46  ;;  %v1702_v29 = vsel %vm4597_vm15, %v1696_v26, %v1700_v13  ;;  %vm4599_vm3 = vmmov %vm4590_vm5 }
0x11c2   :  { %v1707_v2 = vsel %vm4591_vm4, %v1690_v6, %v1704_v3  ;;  %vm1712_vm5 = vmxor %vm1710_vm7, %vm1941_vm8  ;;  %v1708_v35 = vsel %vm4595_vm6, %v1692_v28, %v1702_v29  ;;  %vm4600_vm15 = vcmp.lt.s32.totalorder %v2002_v7, 1 }
0x11c3   :  { %vm1715_vm9 = vcmp.ge.f32.partialorder %v1679_v12, %v1707_v2  ;;  %vm1716_vm2 = vcmp.ge.f32.partialorder %v1680_v45, %v1708_v35  ;;  %vm1758_vm7 = vmxor %vm1941_vm8, %vm4457_vm13 }
0x11c4   :  { %vm1719_vm10 = vmxor %vm4592_vm0, %vm1715_vm9 }
0x11c5   :  { %vm1723_vm12 = vmxor %vm1719_vm10, %vm1941_vm8 }
0x11c6   :  { %v4049_v23 = vsel %vm1723_vm12, %v1679_v12, %v1707_v2 }
0x11c7   :  { %1731 = vrot.lane.b32.xlu1 %v4049_v23, %s1939_s0 }
0x11c8   :  { %v1698_v27 = vpop.permute.xlu1 %1697 }
0x11c9   :  { %v1701_v31 = vsel %vm4598_vm11, %v1694_v14, %v1698_v27  ;;  %v1703_v32 = vsel %vm4599_vm3, %v1698_v27, %v1694_v14  ;;  %vm4601_vm11 = vmmov %vm4600_vm15  ;;  %vm4602_vm3 = vcmp.lt.s32.totalorder %v2002_v7, 127 }
0x11ca   :  { %v1705_v33 = vsel %vm4591_vm4, %v1689_v24, %v1703_v32  ;;  %v1706_v34 = vsel %vm4595_vm6, %v1691_v25, %v1701_v31  ;;  %vm1720_vm6 = vmxor %vm1712_vm5, %vm1716_vm2 }
0x11cb   :  { %vm1713_vm9 = vcmp.ge.f32.partialorder %v4007_v61, %v1705_v33  ;;  %vm1714_vm10 = vcmp.ge.f32.partialorder %v1678_v63, %v1706_v34 }
0x11cc   :  { %vm1717_vm12 = vmxor %vm4592_vm0, %vm1713_vm9 }
0x11cd   :  { %vm1718_vm1 = vmxor %vm1712_vm5, %vm1714_vm10  ;;  %vm4606_vm10 = vnez %v4236_v16 }
0x11ce   :  { %vm1722_vm14 = vmxor %vm1718_vm1, %vm1941_vm8 }
0x11cf   :  { %v4079_v17 = vsel %vm1722_vm14, %v1678_v63, %v1706_v34  ;;  %vm1721_vm4 = vmxor %vm1717_vm12, %vm1941_vm8  ;;  %vm4607_vm14 = vnez %v4530_v30 }
0x11d0   :  { %1733 = vrot.lane.b32.xlu2 %v4079_v17, %s1939_s0  ;;  %v1725_v36 = vsel %vm1721_vm4, %v4007_v61, %v1705_v33  ;;  %vm1724_vm0 = vmxor %vm1720_vm6, %vm1941_vm8 }
0x11d1   :  { %1729 = vrot.lane.b32.xlu0 %v1725_v36, %s1939_s0  ;;  %1741 = vrot.lane.b32.xlu1 %v1725_v36, %s1940_s1  ;;  %v1728_v19 = vsel %vm1724_vm0, %v1680_v45, %v1708_v35  ;;  %vm4603_vm5 = vmmov %vm4602_vm3 }
0x11d2   :  { %vm4110_vm9 = vmxor %vm1758_vm7, %vm1941_vm8 }
0x11d3   :  { %vm4608_vm7 = vmmov %vm4602_vm3 }
0x11d8   :  { %1743 = vrot.lane.b32.xlu2 %v4049_v23, %s1940_s1 }
0x11d9   :  { %1747 = vrot.lane.b32.xlu1 %v1728_v19, %s1940_s1  ;;  %1735 = vrot.lane.b32.xlu0 %v1728_v19, %s1939_s0 }
0x11e1   :  { %1745 = vrot.lane.b32.xlu0 %v4079_v17, %s1940_s1  ;;  %1796 = vperm.xlu1 %1853, %v1856_v38  }
0x11e9   :  { %1854 = vset.pattern.permute.xlu1 %v1952_v11 }
0x122a   :  { %v1734_v40 = vpop.permute.xlu2 %1733 }
0x1232   :  { %v1744_v47 = vpop.permute.xlu2 %1743 }
0x1239   :  { %v1732_v39 = vpop.permute.xlu1 %1731 }
0x1243   :  { %v1742_v41 = vpop.permute.xlu1 %1741  ;;  %v1730_v42 = vpop.permute.xlu0 %1729 }
0x1244   :  { %v1737_v56 = vsel %vm4608_vm7, %v1730_v42, %v1734_v40 }
0x124b   :  { %v1748_v48 = vpop.permute.xlu1 %1747  ;;  %v1736_v44 = vpop.permute.xlu0 %1735 }
0x124c   :  { %v1750_v4 = vsel %vm4600_vm15, %v1744_v47, %v1748_v48  ;;  %v1752_v55 = vsel %vm4601_vm11, %v1748_v48, %v1744_v47  ;;  %v1738_v43 = vsel %vm4602_vm3, %v1732_v39, %v1736_v44  ;;  %v1740_v49 = vsel %vm4603_vm5, %v1736_v44, %v1732_v39  ;;  %vm4609_vm15 = vmmov %vm4602_vm3 }
0x124d   :  { %v1755_v52 = vsel %vm4606_vm10, %v1738_v43, %v1752_v55  ;;  %v1756_v15 = vsel %vm4457_vm13, %v1740_v49, %v1750_v4  ;;  %v1739_v60 = vsel %vm4609_vm15, %v1734_v40, %v1730_v42  ;;  %vm4610_vm3 = vmmov %vm4601_vm11 }
0x124e   :  { %vm1763_vm12 = vcmp.ge.f32.partialorder %v4049_v23, %v1755_v52  ;;  %vm1764_vm1 = vcmp.ge.f32.partialorder %v1728_v19, %v1756_v15 }
0x124f   :  { %vm1767_vm2 = vmxor %vm4607_vm14, %vm1763_vm12 }
0x1250   :  { %vm1768_vm4 = vmxor %vm4110_vm9, %vm1764_vm1 }
0x1251   :  { %vm1771_vm6 = vmxor %vm1767_vm2, %vm1941_vm8 }
0x1252   :  { %vm1772_vm0 = vmxor %vm1768_vm4, %vm1941_vm8  ;;  %v1775_v53 = vsel %vm1771_vm6, %v4049_v23, %v1755_v52 }
0x1253   :  { %v1776_v57 = vsel %vm1772_vm0, %v1728_v19, %v1756_v15  ;;  %v1746_v54 = vpop.permute.xlu0 %1745  ;;  %v1781_v59 = vmul.f32 %v1777_v20, %v1775_v53  ;;  %v1797_v30 = vpop.permute.xlu1 %1796 }
0x1254   :  { %v1749_v61 = vsel %vm4601_vm11, %v1742_v41, %v1746_v54  ;;  %v1751_v62 = vsel %vm4610_vm3, %v1746_v54, %v1742_v41  ;;  %v1782_v63 = vmul.f32 %v1778_v37, %v1776_v57 }
0x1255   :  { %v1753_v0 = vsel %vm4606_vm10, %v1737_v56, %v1751_v62  ;;  %v1754_v1 = vsel %vm4457_vm13, %v1739_v60, %v1749_v61  ;;  %vm1814_vm13 = vcmask 58368  }
0x1256   :  { %vm1761_vm5 = vcmp.ge.f32.partialorder %v1725_v36, %v1753_v0  ;;  %vm1762_vm12 = vcmp.ge.f32.partialorder %v4079_v17, %v1754_v1  ;;  %v1786_v5 = vadd.f32 %v1782_v63, %v1781_v59 }
0x1257   :  { %vm1765_vm1 = vmxor %vm4607_vm14, %vm1761_vm5 }
0x1258   :  { %vm1766_vm2 = vmxor %vm4110_vm9, %vm1762_vm12  ;;  %1787 = vadd.xlane.f32.xlu0 %v1786_v5 }
0x1259   :  { %vm1769_vm4 = vmxor %vm1765_vm1, %vm1941_vm8 }
0x125a   :  { %vm1770_vm6 = vmxor %vm1766_vm2, %vm1941_vm8  ;;  %v1773_v16 = vsel %vm1769_vm4, %v1725_v36, %v1753_v0  ;;  %vm1811_vm8 = vcmask 1041409  }
0x125b   :  { %v1774_v9 = vsel %vm1770_vm6, %v4079_v17, %v1754_v1  ;;  %v1779_v18 = vmul.f32 %v1777_v20, %v1773_v16 }
0x125c   :  { %v1780_v8 = vmul.f32 %v1778_v37, %v1774_v9 }
0x125e   :  { %v1783_v10 = vadd.f32 %v1780_v8, %v1779_v18 }
0x1260   :  { %1784 = vadd.xlane.f32.xlu2 %v1783_v10 }
0x12cb   :  { %v1788_v46 = vpop.xlane.xlu0 %1787 }
0x12cc   :  { %v1800_v14 = vadd.f32 %v1797_v30, %v1788_v46 }
0x12d3   :  { %v1785_v12 = vpop.xlane.xlu2 %1784 }
0x12d4   :  { %v1799_v45 = vadd.f32 %v1797_v30, %v1785_v12 }
0x12d6   :  { %1804 = vperm.xlu1 %1854, %v1799_v45  }
0x12de   :  { %1807 = vperm.xlu1 %1854, %v1800_v14  }
0x1348   :  { %v1805_v21 = vpop.permute.xlu1 %1804 }
0x1349   :  { %v1809_v13 = vperm.slane %v1805_v21, %v2002_v7 }
0x1350   :  { %v1808_v22 = vpop.permute.xlu1 %1807 }
0x1351   :  { %v1810_v58 = vperm.slane %v1808_v22, %v2002_v7 }
0x1353   :  { %v1812_v26 = vsel %vm1811_vm8, %v1810_v58, %v1809_v13 }
0x1354   :  { %1815 = vst.msk [vmem:[#allocation7] sm:$0x3] %vm1814_vm13, %v1812_v26 }
0x1355   :  { %1826 = dma.vmem_to_hbm [thread:$0]  %s1822_s9, 32, %s1824_s12, [#allocation4]  }
0x1356   :  { %1933 = dma.done.wait [#allocation4], 32  }
0x1357   :  { %1934 = vsyncadd [#allocation4], 4294967264 }
0x1358   :  { %1831 = vsyncpa [#allocation3], 1 }
0x1359   :  { %1832 = vsyncpa [#allocation6], 1 }
0x135a   :  { %1833 = vsyncpa [#allocation4], 1 }

</bundles_post_ra>
